<compile_context>
chip_gen: v7x
topology: tpu7x:2x2x1
jax: 0.10.0
libtpu: 0.0.40
codegen_flags: <defaults>
</compile_context>

<pallas_src>
import functools

import jax
import jax.numpy as jnp
from jax.experimental import pallas as pl
from jax.experimental.pallas import tpu as pltpu

IMG_DIM = 784
H1, H2, H3 = 1024, 512, 256
OUT_PAD = 128   # layer-4 output padded from 1 -> 128 lanes (column 0 is real)


def _leaky_relu(x, slope=0.2):
    return jnp.where(x > 0, x, slope * x)


def _round_up(x, m):
    return ((x + m - 1) // m) * m


def _disc_kernel(x_ref,
                 w1_ref, b1_ref,
                 w2_ref, b2_ref,
                 w3_ref, b3_ref,
                 w4_ref, b4_ref,
                 o_ref):
    # Layer 1: 896 (zero-padded 784) -> 1024.  bf16 MXU matmul, f32 accumulate.
    h = jnp.dot(x_ref[...], w1_ref[...], preferred_element_type=jnp.float32)
    h = _leaky_relu(h + b1_ref[...])
    # Dropout(0.3): inference-mode identity.
    # TODO(synk): training-mode dropout would need pltpu.prng_* in-kernel RNG.

    # Layer 2: 1024 -> 512
    h = jnp.dot(h.astype(jnp.bfloat16), w2_ref[...],
                preferred_element_type=jnp.float32)
    h = _leaky_relu(h + b2_ref[...])

    # Layer 3: 512 -> 256
    h = jnp.dot(h.astype(jnp.bfloat16), w3_ref[...],
                preferred_element_type=jnp.float32)
    h = _leaky_relu(h + b3_ref[...])

    # Layer 4: 256 -> 128 (padded from 1) + Sigmoid; lane-dense (TB,128) store.
    logits = jnp.dot(h.astype(jnp.bfloat16), w4_ref[...],
                     preferred_element_type=jnp.float32) + b4_ref[...]
    o_ref[...] = jax.nn.sigmoid(logits)


def init_params(key, img_dim=IMG_DIM):
    """Deterministic init matching the PyTorch layer shapes.

    PyTorch nn.Linear(in, out) has weight (out, in); we store the transpose
    (in, out) so the kernel can do x @ W directly (== x @ W_torch.T + b).
    """
    dims = [(img_dim, H1), (H1, H2), (H2, H3), (H3, 1)]
    params = []
    for (din, dout) in dims:
        key, kw, kb = jax.random.split(key, 3)
        bound = 1.0 / (din ** 0.5)
        w = jax.random.uniform(kw, (din, dout), jnp.float32, -bound, bound)
        b = jax.random.uniform(kb, (1, dout), jnp.float32, -bound, bound)
        params.extend([w, b])
    return tuple(params)


def _choose_batch_tile(batch, batch_tile):
    if batch >= 2 * batch_tile:
        return batch_tile
    # Small / medium batch: aim for >=2 grid steps (both TensorCores on v7x),
    # keep rows a multiple of 16 (bf16 sublane packing).
    half = _round_up(max(1, -(-batch // 2)), 16)
    return max(16, min(batch_tile, half))


@functools.partial(jax.jit, static_argnames=("batch_tile",))
def mlp_discriminator(img, params, batch_tile=256):
    """img: (B, 784) float32 -> (B, 1) probability of being real."""
    B, D = img.shape
    d_pad = _round_up(D, 128)                 # 784 -> 896 (7 * 128)
    TB = _choose_batch_tile(B, batch_tile)
    Bp = _round_up(B, TB)

    # One fused pad+cast: (B, D) f32 -> (Bp, d_pad) bf16.
    x = jnp.zeros((Bp, d_pad), jnp.bfloat16).at[:B, :D].set(
        img.astype(jnp.bfloat16))

    w1, b1, w2, b2, w3, b3, w4, b4 = params
    # Weights cast to bf16 once; w1 rows padded to d_pad, w4/b4 cols to 128.
    w1p = jnp.zeros((d_pad, H1), jnp.bfloat16).at[:D, :].set(
        w1.astype(jnp.bfloat16))
    w2p = w2.astype(jnp.bfloat16)
    w3p = w3.astype(jnp.bfloat16)
    w4p = jnp.zeros((H3, OUT_PAD), jnp.bfloat16).at[:, :1].set(
        w4.astype(jnp.bfloat16))
    b4p = jnp.zeros((1, OUT_PAD), jnp.float32).at[:, :1].set(b4)

    # Grid-invariant full blocks (weights/biases resident in VMEM, ~3.2 MB bf16).
    full = lambda a: pl.BlockSpec(a.shape, lambda i: (0, 0))

    flops = 2 * Bp * (d_pad * H1 + H1 * H2 + H2 * H3 + H3 * OUT_PAD)
    bytes_accessed = (
        x.size * 2 + Bp * OUT_PAD * 4
        + (w1p.size + w2p.size + w3p.size + w4p.size) * 2
        + (b1.size + b2.size + b3.size + b4p.size) * 4)

    out = pl.pallas_call(
        _disc_kernel,
        out_shape=jax.ShapeDtypeStruct((Bp, OUT_PAD), jnp.float32),
        grid=(Bp // TB,),
        in_specs=[
            pl.BlockSpec((TB, d_pad), lambda i: (i, 0)),   # x tile
            full(w1p), full(b1),
            full(w2p), full(b2),
            full(w3p), full(b3),
            full(w4p), full(b4p),
        ],
        out_specs=pl.BlockSpec((TB, OUT_PAD), lambda i: (i, 0)),
        compiler_params=pltpu.CompilerParams(
            dimension_semantics=("parallel",),
            vmem_limit_bytes=32 * 1024 * 1024),
        cost_estimate=pl.CostEstimate(
            flops=flops,
            transcendentals=Bp * OUT_PAD,
            bytes_accessed=bytes_accessed),
    )(x, w1p, b1, w2p, b2, w3p, b3, w4p, b4p)

    # Drop padded batch rows and the 127 padded output lanes.
    return out[:B, 0:1]


def _reference(img, params):
    w1, b1, w2, b2, w3, b3, w4, b4 = params
    h = _leaky_relu(img @ w1 + b1)
    h = _leaky_relu(h @ w2 + b2)
    h = _leaky_relu(h @ w3 + b3)
    return jax.nn.sigmoid(h @ w4 + b4)


if __name__ == "__main__":
    key = jax.random.PRNGKey(0)
    k_img, k_params = jax.random.split(key)

    batch, img_dim = 2, 784
    img = jax.random.normal(k_img, (batch, img_dim), jnp.float32)
    params = init_params(k_params, img_dim=img_dim)

    out = mlp_discriminator(img, params)
    out = jax.block_until_ready(out)

    ref = _reference(img, params)
    assert out.shape == (batch, 1), out.shape
    # bf16 matmuls (f32 accumulate) vs. f32 reference -> loosened tolerance.
    assert jnp.allclose(out, ref, atol=2e-2, rtol=2e-2), (out, ref)

    print("KERNEL_OK")
</pallas_src>

<mosaic_0001>
module attributes {stable_mosaic.version = 11 : i64} {
  func.func @_disc_kernel(%arg0: i32, %arg1: memref<16x896xbf16, #tpu.memory_space<vmem>>, %arg2: memref<896x1024xbf16, #tpu.memory_space<vmem>>, %arg3: memref<1x1024xf32, #tpu.memory_space<vmem>>, %arg4: memref<1024x512xbf16, #tpu.memory_space<vmem>>, %arg5: memref<1x512xf32, #tpu.memory_space<vmem>>, %arg6: memref<512x256xbf16, #tpu.memory_space<vmem>>, %arg7: memref<1x256xf32, #tpu.memory_space<vmem>>, %arg8: memref<256x128xbf16, #tpu.memory_space<vmem>>, %arg9: memref<1x128xf32, #tpu.memory_space<vmem>>, %arg10: memref<16x128xf32, #tpu.memory_space<vmem>>) attributes {dimension_semantics = [#tpu.dimension_semantics<parallel>], iteration_bounds = array<i64: 1>, scalar_prefetch = 0 : i64, scratch_operands = 0 : i64, tpu.core_type = #tpu.core_type<tc>, window_params = [{transform_indices = @transform_0, window_bounds = array<i64: 16, 896>}, {pipeline_mode = #tpu.pipeline_mode<synchronous>, transform_indices = @transform_1, window_bounds = array<i64: 896, 1024>}, {pipeline_mode = #tpu.pipeline_mode<synchronous>, transform_indices = @transform_2, window_bounds = array<i64: 1, 1024>}, {pipeline_mode = #tpu.pipeline_mode<synchronous>, transform_indices = @transform_3, window_bounds = array<i64: 1024, 512>}, {pipeline_mode = #tpu.pipeline_mode<synchronous>, transform_indices = @transform_4, window_bounds = array<i64: 1, 512>}, {pipeline_mode = #tpu.pipeline_mode<synchronous>, transform_indices = @transform_5, window_bounds = array<i64: 512, 256>}, {pipeline_mode = #tpu.pipeline_mode<synchronous>, transform_indices = @transform_6, window_bounds = array<i64: 1, 256>}, {pipeline_mode = #tpu.pipeline_mode<synchronous>, transform_indices = @transform_7, window_bounds = array<i64: 256, 128>}, {pipeline_mode = #tpu.pipeline_mode<synchronous>, transform_indices = @transform_8, window_bounds = array<i64: 1, 128>}, {transform_indices = @transform_9, window_bounds = array<i64: 16, 128>}]} {
    %c0 = arith.constant 0 : index
    %c0_0 = arith.constant 0 : index
    %0 = vector.load %arg1[%c0, %c0_0] : memref<16x896xbf16, #tpu.memory_space<vmem>>, vector<16x896xbf16>
    %c0_1 = arith.constant 0 : index
    %c0_2 = arith.constant 0 : index
    %1 = vector.load %arg2[%c0_1, %c0_2] : memref<896x1024xbf16, #tpu.memory_space<vmem>>, vector<896x1024xbf16>
    %cst = arith.constant dense<0.000000e+00> : vector<16x1024xf32>
    %2 = tpu.matmul %0, %1, %cst {dimension_numbers = #tpu.dot_dimension_numbers<[1], [0], [0], [1], [0, 0, 1, 1], [], []>} : vector<16x896xbf16>, vector<896x1024xbf16>, vector<16x1024xf32> -> vector<16x1024xf32>
    %c0_3 = arith.constant 0 : index
    %c0_4 = arith.constant 0 : index
    %3 = vector.load %arg3[%c0_3, %c0_4] : memref<1x1024xf32, #tpu.memory_space<vmem>>, vector<1x1024xf32>
    %4 = vector.broadcast %3 : vector<1x1024xf32> to vector<16x1024xf32>
    %5 = arith.addf %2, %4 : vector<16x1024xf32>
    %cst_5 = arith.constant 0.000000e+00 : f32
    %6 = vector.broadcast %cst_5 : f32 to vector<16x1024xf32>
    %7 = arith.cmpf ogt, %5, %6 : vector<16x1024xf32>
    %cst_6 = arith.constant 2.000000e-01 : f32
    %8 = vector.broadcast %cst_6 : f32 to vector<16x1024xf32>
    %9 = arith.mulf %8, %5 : vector<16x1024xf32>
    %10 = arith.select %7, %5, %9 : vector<16x1024xi1>, vector<16x1024xf32>
    %11 = arith.truncf %10 : vector<16x1024xf32> to vector<16x1024xbf16>
    %c0_7 = arith.constant 0 : index
    %c0_8 = arith.constant 0 : index
    %12 = vector.load %arg4[%c0_7, %c0_8] : memref<1024x512xbf16, #tpu.memory_space<vmem>>, vector<1024x512xbf16>
    %cst_9 = arith.constant dense<0.000000e+00> : vector<16x512xf32>
    %13 = tpu.matmul %11, %12, %cst_9 {dimension_numbers = #tpu.dot_dimension_numbers<[1], [0], [0], [1], [0, 0, 1, 1], [], []>} : vector<16x1024xbf16>, vector<1024x512xbf16>, vector<16x512xf32> -> vector<16x512xf32>
    %c0_10 = arith.constant 0 : index
    %c0_11 = arith.constant 0 : index
    %14 = vector.load %arg5[%c0_10, %c0_11] : memref<1x512xf32, #tpu.memory_space<vmem>>, vector<1x512xf32>
    %15 = vector.broadcast %14 : vector<1x512xf32> to vector<16x512xf32>
    %16 = arith.addf %13, %15 : vector<16x512xf32>
    %cst_12 = arith.constant 0.000000e+00 : f32
    %17 = vector.broadcast %cst_12 : f32 to vector<16x512xf32>
    %18 = arith.cmpf ogt, %16, %17 : vector<16x512xf32>
    %cst_13 = arith.constant 2.000000e-01 : f32
    %19 = vector.broadcast %cst_13 : f32 to vector<16x512xf32>
    %20 = arith.mulf %19, %16 : vector<16x512xf32>
    %21 = arith.select %18, %16, %20 : vector<16x512xi1>, vector<16x512xf32>
    %22 = arith.truncf %21 : vector<16x512xf32> to vector<16x512xbf16>
    %c0_14 = arith.constant 0 : index
    %c0_15 = arith.constant 0 : index
    %23 = vector.load %arg6[%c0_14, %c0_15] : memref<512x256xbf16, #tpu.memory_space<vmem>>, vector<512x256xbf16>
    %cst_16 = arith.constant dense<0.000000e+00> : vector<16x256xf32>
    %24 = tpu.matmul %22, %23, %cst_16 {dimension_numbers = #tpu.dot_dimension_numbers<[1], [0], [0], [1], [0, 0, 1, 1], [], []>} : vector<16x512xbf16>, vector<512x256xbf16>, vector<16x256xf32> -> vector<16x256xf32>
    %c0_17 = arith.constant 0 : index
    %c0_18 = arith.constant 0 : index
    %25 = vector.load %arg7[%c0_17, %c0_18] : memref<1x256xf32, #tpu.memory_space<vmem>>, vector<1x256xf32>
    %26 = vector.broadcast %25 : vector<1x256xf32> to vector<16x256xf32>
    %27 = arith.addf %24, %26 : vector<16x256xf32>
    %cst_19 = arith.constant 0.000000e+00 : f32
    %28 = vector.broadcast %cst_19 : f32 to vector<16x256xf32>
    %29 = arith.cmpf ogt, %27, %28 : vector<16x256xf32>
    %cst_20 = arith.constant 2.000000e-01 : f32
    %30 = vector.broadcast %cst_20 : f32 to vector<16x256xf32>
    %31 = arith.mulf %30, %27 : vector<16x256xf32>
    %32 = arith.select %29, %27, %31 : vector<16x256xi1>, vector<16x256xf32>
    %33 = arith.truncf %32 : vector<16x256xf32> to vector<16x256xbf16>
    %c0_21 = arith.constant 0 : index
    %c0_22 = arith.constant 0 : index
    %34 = vector.load %arg8[%c0_21, %c0_22] : memref<256x128xbf16, #tpu.memory_space<vmem>>, vector<256x128xbf16>
    %cst_23 = arith.constant dense<0.000000e+00> : vector<16x128xf32>
    %35 = tpu.matmul %33, %34, %cst_23 {dimension_numbers = #tpu.dot_dimension_numbers<[1], [0], [0], [1], [0, 0, 1, 1], [], []>} : vector<16x256xbf16>, vector<256x128xbf16>, vector<16x128xf32> -> vector<16x128xf32>
    %c0_24 = arith.constant 0 : index
    %c0_25 = arith.constant 0 : index
    %36 = vector.load %arg9[%c0_24, %c0_25] : memref<1x128xf32, #tpu.memory_space<vmem>>, vector<1x128xf32>
    %37 = vector.broadcast %36 : vector<1x128xf32> to vector<16x128xf32>
    %38 = arith.addf %35, %37 : vector<16x128xf32>
    %39 = arith.negf %38 : vector<16x128xf32>
    %40 = math.exp %39 : vector<16x128xf32>
    %cst_26 = arith.constant 1.000000e+00 : f32
    %41 = vector.broadcast %cst_26 : f32 to vector<16x128xf32>
    %42 = arith.addf %41, %40 : vector<16x128xf32>
    %43 = arith.divf %41, %42 : vector<16x128xf32>
    %c0_27 = arith.constant 0 : index
    %c0_28 = arith.constant 0 : index
    %44 = vector.load %arg10[%c0_27, %c0_28] : memref<16x128xf32, #tpu.memory_space<vmem>>, vector<16x128xf32>
    tpu.vector_store %arg10[%c0_27, %c0_28], %43 {strides = array<i32>} : memref<16x128xf32, #tpu.memory_space<vmem>>, vector<16x128xf32>,
    return
  }
  func.func @transform_0(%arg0: i32) -> (i32, i32) {
    %c0_i32 = arith.constant 0 : i32
    %c0_i32_0 = arith.constant 0 : i32
    return %arg0, %c0_i32 : i32, i32
  }
  func.func @transform_1(%arg0: i32) -> (i32, i32) {
    %c0_i32 = arith.constant 0 : i32
    %c0_i32_0 = arith.constant 0 : i32
    %c0_i32_1 = arith.constant 0 : i32
    return %c0_i32, %c0_i32_0 : i32, i32
  }
  func.func @transform_2(%arg0: i32) -> (i32, i32) {
    %c0_i32 = arith.constant 0 : i32
    %c0_i32_0 = arith.constant 0 : i32
    %c0_i32_1 = arith.constant 0 : i32
    return %c0_i32, %c0_i32_0 : i32, i32
  }
  func.func @transform_3(%arg0: i32) -> (i32, i32) {
    %c0_i32 = arith.constant 0 : i32
    %c0_i32_0 = arith.constant 0 : i32
    %c0_i32_1 = arith.constant 0 : i32
    return %c0_i32, %c0_i32_0 : i32, i32
  }
  func.func @transform_4(%arg0: i32) -> (i32, i32) {
    %c0_i32 = arith.constant 0 : i32
    %c0_i32_0 = arith.constant 0 : i32
    %c0_i32_1 = arith.constant 0 : i32
    return %c0_i32, %c0_i32_0 : i32, i32
  }
  func.func @transform_5(%arg0: i32) -> (i32, i32) {
    %c0_i32 = arith.constant 0 : i32
    %c0_i32_0 = arith.constant 0 : i32
    %c0_i32_1 = arith.constant 0 : i32
    return %c0_i32, %c0_i32_0 : i32, i32
  }
  func.func @transform_6(%arg0: i32) -> (i32, i32) {
    %c0_i32 = arith.constant 0 : i32
    %c0_i32_0 = arith.constant 0 : i32
    %c0_i32_1 = arith.constant 0 : i32
    return %c0_i32, %c0_i32_0 : i32, i32
  }
  func.func @transform_7(%arg0: i32) -> (i32, i32) {
    %c0_i32 = arith.constant 0 : i32
    %c0_i32_0 = arith.constant 0 : i32
    %c0_i32_1 = arith.constant 0 : i32
    return %c0_i32, %c0_i32_0 : i32, i32
  }
  func.func @transform_8(%arg0: i32) -> (i32, i32) {
    %c0_i32 = arith.constant 0 : i32
    %c0_i32_0 = arith.constant 0 : i32
    %c0_i32_1 = arith.constant 0 : i32
    return %c0_i32, %c0_i32_0 : i32, i32
  }
  func.func @transform_9(%arg0: i32) -> (i32, i32) {
    %c0_i32 = arith.constant 0 : i32
    %c0_i32_0 = arith.constant 0 : i32
    return %arg0, %c0_i32 : i32, i32
  }
}

</mosaic_0001>

<bundles_post_ra>
// kernel: mlp_discriminator.1
= control target key start
LH: loop header
LB: loop body
LE: loop exit
PB: predicated region body
PF: predicated region fallthrough
CT: control target
= control target key end

     0   :  { %s10218_s1 = inlined_call_operand.vmem [shape: bf16[896,1024], index: 1, kind: input, shape index: {}]   ;;  %s10219_s0 = inlined_call_operand.vmem [shape: bf16[16,896], index: 0, kind: input, shape index: {}]   ;;  %s10220_s3 = inlined_call_operand.vmem [shape: bf16[1024,512], index: 3, kind: input, shape index: {}]   ;;  %s10221_s2 = inlined_call_operand.vmem [shape: f32[1,1024], index: 2, kind: input, shape index: {}]   ;;  %s10222_s5 = inlined_call_operand.vmem [shape: bf16[512,256], index: 5, kind: input, shape index: {}]   ;;  %s10223_s7 = inlined_call_operand.vmem [shape: bf16[256,128], index: 7, kind: input, shape index: {}]   ;;  %s10224_s4 = inlined_call_operand.vmem [shape: f32[1,512], index: 4, kind: input, shape index: {}]   ;;  %s10225_s6 = inlined_call_operand.vmem [shape: f32[1,256], index: 6, kind: input, shape index: {}]   ;;  %s10226_s8 = inlined_call_operand.vmem [shape: f32[1,128], index: 8, kind: input, shape index: {}]   ;;  %s10227_s9 = inlined_call_operand.vmem [shape: f32[16,128], index: 9, kind: output, shape index: {}]  }
   0x1   :  { %v41_v0 = vld [vmem:[%s10218_s1] sm:$0xff]  ;;  %v7773_v59 = vld [vmem:[%s10219_s0 + $0xc] ss:$28 sps:$4 sm:$0xff]  }
   0x2   :  { %v45_v1 = vld [vmem:[%s10218_s1 + $0x20] sm:$0xff]  ;;  %2882 = vmatprep.mubr.bf16.mxu0 %v7773_v59 }
   0x3   :  { %v169_v2 = vld [vmem:[%s10218_s1 + $0x400] sm:$0xff]  ;;  %v6179_v3 = vcombine.high %v41_v0, %v45_v1  ;;  %v6178_v5 = vcombine.low %v41_v0, %v45_v1 }
   0x4   :  { %v173_v4 = vld [vmem:[%s10218_s1 + $0x420] sm:$0xff] }
   0x5   :  { %v49_v6 = vld [vmem:[%s10218_s1 + $0x40] sm:$0xff]  ;;  %v6307_v8 = vcombine.high %v169_v2, %v173_v4  ;;  %v6306_v9 = vcombine.low %v169_v2, %v173_v4  ;;  %2807 = vmatprep.subr.bf16.mxu1 %v6179_v3 }
   0x6   :  { %v53_v7 = vld [vmem:[%s10218_s1 + $0x60] sm:$0xff]  ;;  %2808 = vmatpush1.bf16.msra.mxu1 %v6178_v5 }
   0x7   :  { %v6187_v10 = vcombine.high %v49_v6, %v53_v7  ;;  %v177_v11 = vld [vmem:[%s10218_s1 + $0x440] sm:$0xff]  ;;  %2850 = vmatprep.subr.bf16.mxu0 %v6307_v8  ;;  %v6186_v18 = vcombine.low %v49_v6, %v53_v7 }
   0x8   :  { %v181_v12 = vld [vmem:[%s10218_s1 + $0x460] sm:$0xff]  ;;  %2851 = vmatpush1.bf16.msra.mxu0 %v6306_v9 }
   0x9   :  { %v57_v13 = vld [vmem:[%s10218_s1 + $0x80] sm:$0xff]  ;;  %v6315_v14 = vcombine.high %v177_v11, %v181_v12  ;;  %2809 = vmatprep.subr.bf16.mxu1 %v6187_v10  ;;  %v6314_v19 = vcombine.low %v177_v11, %v181_v12 }
   0xa   :  { %v61_v15 = vld [vmem:[%s10218_s1 + $0xa0] sm:$0xff]  ;;  %2810 = vmatpush1.bf16.msra.mxu1 %v6186_v18 }
   0xb   :  { %v185_v16 = vld [vmem:[%s10218_s1 + $0x480] sm:$0xff]  ;;  %v6195_v20 = vcombine.high %v57_v13, %v61_v15  ;;  %2852 = vmatprep.subr.bf16.mxu0 %v6315_v14  ;;  %v6194_v26 = vcombine.low %v57_v13, %v61_v15 }
   0xc   :  { %v189_v17 = vld [vmem:[%s10218_s1 + $0x4a0] sm:$0xff]  ;;  %2853 = vmatpush1.bf16.msra.mxu0 %v6314_v19 }
   0xd   :  { %v6323_v21 = vcombine.high %v185_v16, %v189_v17  ;;  %v65_v22 = vld [vmem:[%s10218_s1 + $0xc0] sm:$0xff]  ;;  %2811 = vmatprep.subr.bf16.mxu1 %v6195_v20  ;;  %v6322_v27 = vcombine.low %v185_v16, %v189_v17 }
   0xe   :  { %v69_v23 = vld [vmem:[%s10218_s1 + $0xe0] sm:$0xff]  ;;  %2812 = vmatpush1.bf16.msra.mxu1 %v6194_v26 }
   0xf   :  { %v193_v24 = vld [vmem:[%s10218_s1 + $0x4c0] sm:$0xff]  ;;  %v6203_v28 = vcombine.high %v65_v22, %v69_v23  ;;  %2854 = vmatprep.subr.bf16.mxu0 %v6323_v21  ;;  %v6202_v34 = vcombine.low %v65_v22, %v69_v23 }
  0x10   :  { %v197_v25 = vld [vmem:[%s10218_s1 + $0x4e0] sm:$0xff]  ;;  %2855 = vmatpush1.bf16.msra.mxu0 %v6322_v27 }
  0x11   :  { %v6331_v29 = vcombine.high %v193_v24, %v197_v25  ;;  %v73_v30 = vld [vmem:[%s10218_s1 + $0x100] sm:$0xff]  ;;  %2813 = vmatprep.subr.bf16.mxu1 %v6203_v28  ;;  %v6330_v35 = vcombine.low %v193_v24, %v197_v25 }
  0x12   :  { %v77_v31 = vld [vmem:[%s10218_s1 + $0x120] sm:$0xff]  ;;  %2814 = vmatpush1.bf16.msra.mxu1 %v6202_v34 }
  0x13   :  { %v201_v32 = vld [vmem:[%s10218_s1 + $0x500] sm:$0xff]  ;;  %v6211_v36 = vcombine.high %v73_v30, %v77_v31  ;;  %2856 = vmatprep.subr.bf16.mxu0 %v6331_v29  ;;  %v6210_v42 = vcombine.low %v73_v30, %v77_v31 }
  0x14   :  { %v205_v33 = vld [vmem:[%s10218_s1 + $0x520] sm:$0xff]  ;;  %2857 = vmatpush1.bf16.msra.mxu0 %v6330_v35 }
  0x15   :  { %v6339_v37 = vcombine.high %v201_v32, %v205_v33  ;;  %v81_v38 = vld [vmem:[%s10218_s1 + $0x140] sm:$0xff]  ;;  %2815 = vmatprep.subr.bf16.mxu1 %v6211_v36  ;;  %v6338_v43 = vcombine.low %v201_v32, %v205_v33 }
  0x16   :  { %v85_v39 = vld [vmem:[%s10218_s1 + $0x160] sm:$0xff]  ;;  %2816 = vmatpush1.bf16.msra.mxu1 %v6210_v42 }
  0x17   :  { %v209_v40 = vld [vmem:[%s10218_s1 + $0x540] sm:$0xff]  ;;  %v6219_v44 = vcombine.high %v81_v38, %v85_v39  ;;  %2858 = vmatprep.subr.bf16.mxu0 %v6339_v37  ;;  %v6218_v50 = vcombine.low %v81_v38, %v85_v39 }
  0x18   :  { %v213_v41 = vld [vmem:[%s10218_s1 + $0x560] sm:$0xff]  ;;  %2859 = vmatpush1.bf16.msra.mxu0 %v6338_v43 }
  0x19   :  { %v6347_v45 = vcombine.high %v209_v40, %v213_v41  ;;  %v89_v46 = vld [vmem:[%s10218_s1 + $0x180] sm:$0xff]  ;;  %2817 = vmatprep.subr.bf16.mxu1 %v6219_v44  ;;  %v6346_v52 = vcombine.low %v209_v40, %v213_v41 }
  0x1a   :  { %v93_v47 = vld [vmem:[%s10218_s1 + $0x1a0] sm:$0xff]  ;;  %2818 = vmatpush1.bf16.msra.mxu1 %v6218_v50 }
  0x1b   :  { %v217_v48 = vld [vmem:[%s10218_s1 + $0x580] sm:$0xff]  ;;  %v6227_v53 = vcombine.high %v89_v46, %v93_v47  ;;  %2860 = vmatprep.subr.bf16.mxu0 %v6347_v45  ;;  %v6226_v60 = vcombine.low %v89_v46, %v93_v47 }
  0x1c   :  { %v221_v49 = vld [vmem:[%s10218_s1 + $0x5a0] sm:$0xff]  ;;  %2861 = vmatpush1.bf16.msra.mxu0 %v6346_v52 }
  0x1d   :  { %v97_v51 = vld [vmem:[%s10218_s1 + $0x1c0] sm:$0xff]  ;;  %v6355_v55 = vcombine.high %v217_v48, %v221_v49  ;;  %2819 = vmatprep.subr.bf16.mxu1 %v6227_v53  ;;  %v6354_v61 = vcombine.low %v217_v48, %v221_v49 }
  0x1e   :  { %v101_v54 = vld [vmem:[%s10218_s1 + $0x1e0] sm:$0xff]  ;;  %2820 = vmatpush1.bf16.msra.mxu1 %v6226_v60 }
  0x1f   :  { %v225_v56 = vld [vmem:[%s10218_s1 + $0x5c0] sm:$0xff]  ;;  %v6235_v62 = vcombine.high %v97_v51, %v101_v54  ;;  %2862 = vmatprep.subr.bf16.mxu0 %v6355_v55  ;;  %v6234_v4 = vcombine.low %v97_v51, %v101_v54 }
  0x20   :  { %v7765_v57 = vld [vmem:[%s10219_s0 + $0x4] ss:$28 sps:$4 sm:$0xff]   ;;  %2863 = vmatpush1.bf16.msra.mxu0 %v6354_v61 }
  0x21   :  { %v229_v58 = vld [vmem:[%s10218_s1 + $0x5e0] sm:$0xff]  ;;  %2839 = vmatprep.mubr.bf16.mxu1 %v7765_v57  ;;  %2821 = vmatprep.subr.bf16.mxu1 %v6235_v62 }
  0x22   :  { %v6363_v63 = vcombine.high %v225_v56, %v229_v58  ;;  %v105_v0 = vld [vmem:[%s10218_s1 + $0x200] sm:$0xff]  ;;  %v6362_v5 = vcombine.low %v225_v56, %v229_v58  ;;  %2822 = vmatpush1.bf16.msra.mxu1 %v6234_v4 }
  0x23   :  { %v109_v1 = vld [vmem:[%s10218_s1 + $0x220] sm:$0xff] }
  0x24   :  { %v233_v2 = vld [vmem:[%s10218_s1 + $0x600] sm:$0xff]  ;;  %v6243_v6 = vcombine.high %v105_v0, %v109_v1  ;;  %2864 = vmatprep.subr.bf16.mxu0 %v6363_v63  ;;  %v6242_v12 = vcombine.low %v105_v0, %v109_v1 }
  0x25   :  { %v237_v3 = vld [vmem:[%s10218_s1 + $0x620] sm:$0xff]  ;;  %2865 = vmatpush1.bf16.msra.mxu0 %v6362_v5 }
  0x26   :  { %v6371_v7 = vcombine.high %v233_v2, %v237_v3  ;;  %v113_v8 = vld [vmem:[%s10218_s1 + $0x240] sm:$0xff]  ;;  %2823 = vmatprep.subr.bf16.mxu1 %v6243_v6  ;;  %v6370_v13 = vcombine.low %v233_v2, %v237_v3  ;;  %v42_v2 = vld [vmem:[%s10218_s1 + $0x8] sm:$0xff] }
  0x27   :  { %v117_v9 = vld [vmem:[%s10218_s1 + $0x260] sm:$0xff]  ;;  %2824 = vmatpush1.bf16.msra.mxu1 %v6242_v12  ;;  %v46_v3 = vld [vmem:[%s10218_s1 + $0x28] sm:$0xff] }
  0x28   :  { %v241_v10 = vld [vmem:[%s10218_s1 + $0x640] sm:$0xff]  ;;  %v6251_v14 = vcombine.high %v113_v8, %v117_v9  ;;  %2866 = vmatprep.subr.bf16.mxu0 %v6371_v7  ;;  %v6250_v20 = vcombine.low %v113_v8, %v117_v9  ;;  %v6181_v8 = vcombine.high %v42_v2, %v46_v3 }
  0x29   :  { %v245_v11 = vld [vmem:[%s10218_s1 + $0x660] sm:$0xff]  ;;  %2867 = vmatpush1.bf16.msra.mxu0 %v6370_v13 }
  0x2a   :  { %v6379_v15 = vcombine.high %v241_v10, %v245_v11  ;;  %v121_v16 = vld [vmem:[%s10218_s1 + $0x280] sm:$0xff]  ;;  %2825 = vmatprep.subr.bf16.mxu1 %v6251_v14  ;;  %v6378_v21 = vcombine.low %v241_v10, %v245_v11  ;;  %v50_v10 = vld [vmem:[%s10218_s1 + $0x48] sm:$0xff] }
  0x2b   :  { %v125_v17 = vld [vmem:[%s10218_s1 + $0x2a0] sm:$0xff]  ;;  %2826 = vmatpush1.bf16.msra.mxu1 %v6250_v20  ;;  %v54_v11 = vld [vmem:[%s10218_s1 + $0x68] sm:$0xff] }
  0x2c   :  { %v249_v18 = vld [vmem:[%s10218_s1 + $0x680] sm:$0xff]  ;;  %v6259_v22 = vcombine.high %v121_v16, %v125_v17  ;;  %2868 = vmatprep.subr.bf16.mxu0 %v6379_v15  ;;  %v6258_v28 = vcombine.low %v121_v16, %v125_v17  ;;  %v6180_v15 = vcombine.low %v42_v2, %v46_v3  ;;  %v58_v20 = vld [vmem:[%s10218_s1 + $0x88] sm:$0xff] }
  0x2d   :  { %v253_v19 = vld [vmem:[%s10218_s1 + $0x6a0] sm:$0xff]  ;;  %2869 = vmatpush1.bf16.msra.mxu0 %v6378_v21  ;;  %v62_v21 = vld [vmem:[%s10218_s1 + $0xa8] sm:$0xff] }
  0x2e   :  { %v6387_v23 = vcombine.high %v249_v18, %v253_v19  ;;  %v129_v24 = vld [vmem:[%s10218_s1 + $0x2c0] sm:$0xff]  ;;  %2827 = vmatprep.subr.bf16.mxu1 %v6259_v22  ;;  %v6386_v29 = vcombine.low %v249_v18, %v253_v19  ;;  %v6189_v18 = vcombine.high %v50_v10, %v54_v11  ;;  %v7916_v22 = vld [vmem:[%s10219_s0 + $0x14] ss:$28 sps:$4 sm:$0xff]  }
  0x2f   :  { %v133_v25 = vld [vmem:[%s10218_s1 + $0x2e0] sm:$0xff]  ;;  %2828 = vmatpush1.bf16.msra.mxu1 %v6258_v28 }
  0x30   :  { %v257_v26 = vld [vmem:[%s10218_s1 + $0x6c0] sm:$0xff]  ;;  %v6267_v30 = vcombine.high %v129_v24, %v133_v25  ;;  %2870 = vmatprep.subr.bf16.mxu0 %v6387_v23  ;;  %v6266_v36 = vcombine.low %v129_v24, %v133_v25  ;;  %v6188_v25 = vcombine.low %v50_v10, %v54_v11 }
  0x31   :  { %v261_v27 = vld [vmem:[%s10218_s1 + $0x6e0] sm:$0xff]  ;;  %2871 = vmatpush1.bf16.msra.mxu0 %v6386_v29  ;;  %v66_v29 = vld [vmem:[%s10218_s1 + $0xc8] sm:$0xff] }
  0x32   :  { %v6395_v31 = vcombine.high %v257_v26, %v261_v27  ;;  %v137_v32 = vld [vmem:[%s10218_s1 + $0x300] sm:$0xff]  ;;  %2829 = vmatprep.subr.bf16.mxu1 %v6267_v30  ;;  %v6394_v37 = vcombine.low %v257_v26, %v261_v27  ;;  %v6197_v27 = vcombine.high %v58_v20, %v62_v21  ;;  %v70_v30 = vld [vmem:[%s10218_s1 + $0xe8] sm:$0xff] }
  0x33   :  { %v141_v33 = vld [vmem:[%s10218_s1 + $0x320] sm:$0xff]  ;;  %2830 = vmatpush1.bf16.msra.mxu1 %v6266_v36 }
  0x34   :  { %v265_v34 = vld [vmem:[%s10218_s1 + $0x700] sm:$0xff]  ;;  %v6275_v38 = vcombine.high %v137_v32, %v141_v33  ;;  %2872 = vmatprep.subr.bf16.mxu0 %v6395_v31  ;;  %v6274_v44 = vcombine.low %v137_v32, %v141_v33  ;;  %v6196_v33 = vcombine.low %v58_v20, %v62_v21 }
  0x35   :  { %v269_v35 = vld [vmem:[%s10218_s1 + $0x720] sm:$0xff]  ;;  %2873 = vmatpush1.bf16.msra.mxu0 %v6394_v37  ;;  %v74_v37 = vld [vmem:[%s10218_s1 + $0x108] sm:$0xff] }
  0x36   :  { %v6403_v39 = vcombine.high %v265_v34, %v269_v35  ;;  %v145_v40 = vld [vmem:[%s10218_s1 + $0x340] sm:$0xff]  ;;  %2831 = vmatprep.subr.bf16.mxu1 %v6275_v38  ;;  %v6402_v45 = vcombine.low %v265_v34, %v269_v35  ;;  %v6205_v35 = vcombine.high %v66_v29, %v70_v30  ;;  %v78_v38 = vld [vmem:[%s10218_s1 + $0x128] sm:$0xff] }
  0x37   :  { %v149_v41 = vld [vmem:[%s10218_s1 + $0x360] sm:$0xff]  ;;  %2832 = vmatpush1.bf16.msra.mxu1 %v6274_v44 }
  0x38   :  { %v273_v42 = vld [vmem:[%s10218_s1 + $0x740] sm:$0xff]  ;;  %v6283_v46 = vcombine.high %v145_v40, %v149_v41  ;;  %2874 = vmatprep.subr.bf16.mxu0 %v6403_v39  ;;  %v6282_v52 = vcombine.low %v145_v40, %v149_v41  ;;  %v6204_v41 = vcombine.low %v66_v29, %v70_v30 }
  0x39   :  { %v277_v43 = vld [vmem:[%s10218_s1 + $0x760] sm:$0xff]  ;;  %2875 = vmatpush1.bf16.msra.mxu0 %v6402_v45  ;;  %v82_v45 = vld [vmem:[%s10218_s1 + $0x148] sm:$0xff] }
  0x3a   :  { %v6411_v47 = vcombine.high %v273_v42, %v277_v43  ;;  %v153_v48 = vld [vmem:[%s10218_s1 + $0x380] sm:$0xff]  ;;  %2833 = vmatprep.subr.bf16.mxu1 %v6283_v46  ;;  %v6410_v53 = vcombine.low %v273_v42, %v277_v43  ;;  %v6213_v43 = vcombine.high %v74_v37, %v78_v38  ;;  %v86_v46 = vld [vmem:[%s10218_s1 + $0x168] sm:$0xff] }
  0x3b   :  { %v157_v49 = vld [vmem:[%s10218_s1 + $0x3a0] sm:$0xff]  ;;  %2834 = vmatpush1.bf16.msra.mxu1 %v6282_v52 }
  0x3c   :  { %v281_v50 = vld [vmem:[%s10218_s1 + $0x780] sm:$0xff]  ;;  %v6291_v54 = vcombine.high %v153_v48, %v157_v49  ;;  %2876 = vmatprep.subr.bf16.mxu0 %v6411_v47  ;;  %v6290_v62 = vcombine.low %v153_v48, %v157_v49  ;;  %v6212_v49 = vcombine.low %v74_v37, %v78_v38 }
  0x3d   :  { %v285_v51 = vld [vmem:[%s10218_s1 + $0x7a0] sm:$0xff]  ;;  %2877 = vmatpush1.bf16.msra.mxu0 %v6410_v53  ;;  %v90_v53 = vld [vmem:[%s10218_s1 + $0x188] sm:$0xff] }
  0x3e   :  { %v6419_v55 = vcombine.high %v281_v50, %v285_v51  ;;  %v161_v56 = vld [vmem:[%s10218_s1 + $0x3c0] sm:$0xff]  ;;  %2835 = vmatprep.subr.bf16.mxu1 %v6291_v54  ;;  %v6418_v63 = vcombine.low %v281_v50, %v285_v51  ;;  %v6221_v51 = vcombine.high %v82_v45, %v86_v46  ;;  %v94_v54 = vld [vmem:[%s10218_s1 + $0x1a8] sm:$0xff] }
  0x3f   :  { %v165_v58 = vld [vmem:[%s10218_s1 + $0x3e0] sm:$0xff]  ;;  %2836 = vmatpush1.bf16.msra.mxu1 %v6290_v62  ;;  %v6228_v3 = vcombine.low %v90_v53, %v94_v54 }
  0x40   :  { %v289_v60 = vld [vmem:[%s10218_s1 + $0x7c0] sm:$0xff]  ;;  %v6299_v0 = vcombine.high %v161_v56, %v165_v58  ;;  %2878 = vmatprep.subr.bf16.mxu0 %v6419_v55  ;;  %v6298_v6 = vcombine.low %v161_v56, %v165_v58  ;;  %v6220_v58 = vcombine.low %v82_v45, %v86_v46 }
  0x41   :  { %v293_v61 = vld [vmem:[%s10218_s1 + $0x7e0] sm:$0xff]  ;;  %2879 = vmatpush1.bf16.msra.mxu0 %v6418_v63  ;;  %v98_v63 = vld [vmem:[%s10218_s1 + $0x1c8] sm:$0xff] }
  0x42   :  { %v6427_v1 = vcombine.high %v289_v60, %v293_v61  ;;  %v297_v4 = vld [vmem:[%s10218_s1 + $0x800] sm:$0xff]  ;;  %2837 = vmatprep.subr.bf16.mxu1 %v6299_v0  ;;  %v6426_v7 = vcombine.low %v289_v60, %v293_v61  ;;  %v6229_v61 = vcombine.high %v90_v53, %v94_v54  ;;  %v102_v0 = vld [vmem:[%s10218_s1 + $0x1e8] sm:$0xff] }
  0x43   :  { %v301_v5 = vld [vmem:[%s10218_s1 + $0x820] sm:$0xff]  ;;  %2838 = vmatpush1.bf16.msra.mxu1 %v6298_v6  ;;  %v6236_v11 = vcombine.low %v98_v63, %v102_v0 }
  0x44   :  { %2880 = vmatprep.subr.bf16.mxu0 %v6427_v1  ;;  %v6435_v9 = vcombine.high %v297_v4, %v301_v5  ;;  %v7894_v12 = vld [vmem:[%s10219_s0] ss:$28 sps:$4 sm:$0xff]   ;;  %v7905_v16 = vld [vmem:[%s10219_s0 + $0x8] ss:$28 sps:$4 sm:$0xff]   ;;  %v6434_v17 = vcombine.low %v297_v4, %v301_v5  ;;  %2979 = vmatprep.subr.bf16.mxu1 %v6181_v8  ;;  %v6237_v5 = vcombine.high %v98_v63, %v102_v0 }
  0x45   :  { %v305_v13 = vld [vmem:[%s10218_s1 + $0x840] sm:$0xff]  ;;  %2881 = vmatpush1.bf16.msra.mxu0 %v6426_v7  ;;  %v106_v7 = vld [vmem:[%s10218_s1 + $0x208] sm:$0xff] }
  0x46   :  { %v309_v14 = vld [vmem:[%s10218_s1 + $0x860] sm:$0xff]  ;;  %2893 = vmatprep.subr.bf16.mxu0 %v6435_v9  ;;  %2840 = vmatmul.mubr.bf16.vlgmr.msra.gmra.mrb[0].mxu1 %v7894_v12  ;;  %v110_v8 = vld [vmem:[%s10218_s1 + $0x228] sm:$0xff] }
  0x47   :  { %v6443_v19 = vcombine.high %v305_v13, %v309_v14  ;;  %v313_v23 = vld [vmem:[%s10218_s1 + $0x880] sm:$0xff]  ;;  %2980 = vmatpush1.bf16.msra.mxu1 %v6180_v15  ;;  %v6442_v26 = vcombine.low %v305_v13, %v309_v14  ;;  %3011 = vmatprep.mubr.bf16.mxu1 %v7765_v57  ;;  %v6245_v14 = vcombine.high %v106_v7, %v110_v8 }
  0x48   :  { %v317_v24 = vld [vmem:[%s10218_s1 + $0x8a0] sm:$0xff]  ;;  %2883 = vmatmul.mubr.bf16.vlgmr.msra.gmra.mrb[0].mxu0 %v7905_v16  ;;  %2981 = vmatprep.subr.bf16.mxu1 %v6189_v18  ;;  %v118_v18 = vld [vmem:[%s10218_s1 + $0x268] sm:$0xff]  ;;  %v6244_v21 = vcombine.low %v106_v7, %v110_v8 }
  0x49   :  { %2894 = vmatpush1.bf16.msra.mxu0 %v6434_v17  ;;  %v6451_v28 = vcombine.high %v313_v23, %v317_v24  ;;  %2925 = vmatprep.mubr.bf16.mxu0 %v7916_v22  ;;  %v321_v31 = vld [vmem:[%s10218_s1 + $0x8c0] sm:$0xff]  ;;  %v6450_v34 = vcombine.low %v313_v23, %v317_v24  ;;  %v114_v17 = vld [vmem:[%s10218_s1 + $0x248] sm:$0xff] }
  0x4a   :  { %2895 = vmatprep.subr.bf16.mxu0 %v6443_v19  ;;  %v325_v32 = vld [vmem:[%s10218_s1 + $0x8e0] sm:$0xff]  ;;  %v6253_v24 = vcombine.high %v114_v17, %v118_v18  ;;  %v6252_v30 = vcombine.low %v114_v17, %v118_v18 }
  0x4b   :  { %2982 = vmatpush1.bf16.msra.mxu1 %v6188_v25  ;;  %v6459_v36 = vcombine.high %v321_v31, %v325_v32  ;;  %v329_v39 = vld [vmem:[%s10218_s1 + $0x900] sm:$0xff]  ;;  %v6458_v42 = vcombine.low %v321_v31, %v325_v32 }
  0x4c   :  { %2983 = vmatprep.subr.bf16.mxu1 %v6197_v27  ;;  %v333_v40 = vld [vmem:[%s10218_s1 + $0x920] sm:$0xff]  ;;  %v126_v27 = vld [vmem:[%s10218_s1 + $0x2a8] sm:$0xff] }
  0x4d   :  { %2896 = vmatpush1.bf16.msra.mxu0 %v6442_v26  ;;  %v6467_v44 = vcombine.high %v329_v39, %v333_v40  ;;  %v337_v47 = vld [vmem:[%s10218_s1 + $0x940] sm:$0xff]  ;;  %v6466_v50 = vcombine.low %v329_v39, %v333_v40  ;;  %v122_v26 = vld [vmem:[%s10218_s1 + $0x288] sm:$0xff] }
  0x4e   :  { %2897 = vmatprep.subr.bf16.mxu0 %v6451_v28  ;;  %v341_v48 = vld [vmem:[%s10218_s1 + $0x960] sm:$0xff]  ;;  %v6261_v32 = vcombine.high %v122_v26, %v126_v27  ;;  %v6260_v38 = vcombine.low %v122_v26, %v126_v27 }
  0x4f   :  { %2984 = vmatpush1.bf16.msra.mxu1 %v6196_v33  ;;  %v6475_v52 = vcombine.high %v337_v47, %v341_v48  ;;  %v345_v55 = vld [vmem:[%s10218_s1 + $0x980] sm:$0xff]  ;;  %v6474_v60 = vcombine.low %v337_v47, %v341_v48 }
  0x50   :  { %2985 = vmatprep.subr.bf16.mxu1 %v6205_v35  ;;  %v349_v56 = vld [vmem:[%s10218_s1 + $0x9a0] sm:$0xff]  ;;  %v134_v35 = vld [vmem:[%s10218_s1 + $0x2e8] sm:$0xff] }
  0x51   :  { %2898 = vmatpush1.bf16.msra.mxu0 %v6450_v34  ;;  %v6483_v62 = vcombine.high %v345_v55, %v349_v56  ;;  %v353_v1 = vld [vmem:[%s10218_s1 + $0x9c0] sm:$0xff]  ;;  %v6482_v4 = vcombine.low %v345_v55, %v349_v56  ;;  %v130_v34 = vld [vmem:[%s10218_s1 + $0x2c8] sm:$0xff] }
  0x52   :  { %2899 = vmatprep.subr.bf16.mxu0 %v6459_v36  ;;  %v357_v2 = vld [vmem:[%s10218_s1 + $0x9e0] sm:$0xff]  ;;  %v6269_v40 = vcombine.high %v130_v34, %v134_v35  ;;  %v6268_v46 = vcombine.low %v130_v34, %v134_v35 }
  0x53   :  { %2986 = vmatpush1.bf16.msra.mxu1 %v6204_v41  ;;  %v6491_v6 = vcombine.high %v353_v1, %v357_v2  ;;  %v361_v9 = vld [vmem:[%s10218_s1 + $0xa00] sm:$0xff]  ;;  %v6490_v13 = vcombine.low %v353_v1, %v357_v2 }
  0x54   :  { %2987 = vmatprep.subr.bf16.mxu1 %v6213_v43  ;;  %v365_v10 = vld [vmem:[%s10218_s1 + $0xa20] sm:$0xff]  ;;  %v142_v43 = vld [vmem:[%s10218_s1 + $0x328] sm:$0xff] }
  0x55   :  { %2900 = vmatpush1.bf16.msra.mxu0 %v6458_v42  ;;  %v6499_v15 = vcombine.high %v361_v9, %v365_v10  ;;  %v369_v19 = vld [vmem:[%s10218_s1 + $0xa40] sm:$0xff]  ;;  %v6498_v23 = vcombine.low %v361_v9, %v365_v10  ;;  %v138_v42 = vld [vmem:[%s10218_s1 + $0x308] sm:$0xff] }
  0x56   :  { %2901 = vmatprep.subr.bf16.mxu0 %v6467_v44  ;;  %v373_v20 = vld [vmem:[%s10218_s1 + $0xa60] sm:$0xff]  ;;  %v6277_v48 = vcombine.high %v138_v42, %v142_v43  ;;  %v6276_v54 = vcombine.low %v138_v42, %v142_v43 }
  0x57   :  { %2988 = vmatpush1.bf16.msra.mxu1 %v6212_v49  ;;  %v6507_v25 = vcombine.high %v369_v19, %v373_v20  ;;  %v377_v28 = vld [vmem:[%s10218_s1 + $0xa80] sm:$0xff]  ;;  %v6506_v31 = vcombine.low %v369_v19, %v373_v20 }
  0x58   :  { %2989 = vmatprep.subr.bf16.mxu1 %v6221_v51  ;;  %v381_v29 = vld [vmem:[%s10218_s1 + $0xaa0] sm:$0xff]  ;;  %v150_v51 = vld [vmem:[%s10218_s1 + $0x368] sm:$0xff] }
  0x59   :  { %2902 = vmatpush1.bf16.msra.mxu0 %v6466_v50  ;;  %v6515_v33 = vcombine.high %v377_v28, %v381_v29  ;;  %v385_v36 = vld [vmem:[%s10218_s1 + $0xac0] sm:$0xff]  ;;  %v6514_v39 = vcombine.low %v377_v28, %v381_v29  ;;  %v146_v50 = vld [vmem:[%s10218_s1 + $0x348] sm:$0xff] }
  0x5a   :  { %2903 = vmatprep.subr.bf16.mxu0 %v6475_v52  ;;  %v389_v37 = vld [vmem:[%s10218_s1 + $0xae0] sm:$0xff]  ;;  %v6285_v56 = vcombine.high %v146_v50, %v150_v51  ;;  %v6284_v0 = vcombine.low %v146_v50, %v150_v51  ;;  %v8111_v28 = vld [vmem:[%s10219_s0 + $0x10] ss:$28 sps:$4 sm:$0xff]  }
  0x5b   :  { %2990 = vmatpush1.bf16.msra.mxu1 %v6220_v58  ;;  %v6523_v41 = vcombine.high %v385_v36, %v389_v37  ;;  %v393_v44 = vld [vmem:[%s10218_s1 + $0xb00] sm:$0xff]  ;;  %v6522_v47 = vcombine.low %v385_v36, %v389_v37 }
  0x5c   :  { %2991 = vmatprep.subr.bf16.mxu1 %v6229_v61  ;;  %v397_v45 = vld [vmem:[%s10218_s1 + $0xb20] sm:$0xff]  ;;  %v158_v61 = vld [vmem:[%s10218_s1 + $0x3a8] sm:$0xff] }
  0x5d   :  { %2904 = vmatpush1.bf16.msra.mxu0 %v6474_v60  ;;  %v6531_v49 = vcombine.high %v393_v44, %v397_v45  ;;  %v401_v52 = vld [vmem:[%s10218_s1 + $0xb40] sm:$0xff]  ;;  %v6530_v55 = vcombine.low %v393_v44, %v397_v45  ;;  %v154_v60 = vld [vmem:[%s10218_s1 + $0x388] sm:$0xff] }
  0x5e   :  { %2905 = vmatprep.subr.bf16.mxu0 %v6483_v62  ;;  %v405_v53 = vld [vmem:[%s10218_s1 + $0xb60] sm:$0xff]  ;;  %v6293_v2 = vcombine.high %v154_v60, %v158_v61  ;;  %v6292_v8 = vcombine.low %v154_v60, %v158_v61 }
  0x5f   :  { %2992 = vmatpush1.bf16.msra.mxu1 %v6228_v3  ;;  %v6539_v58 = vcombine.high %v401_v52, %v405_v53  ;;  %v409_v62 = vld [vmem:[%s10218_s1 + $0xb80] sm:$0xff]  ;;  %v6538_v1 = vcombine.low %v401_v52, %v405_v53 }
  0x60   :  { %2993 = vmatprep.subr.bf16.mxu1 %v6237_v5  ;;  %v413_v63 = vld [vmem:[%s10218_s1 + $0xba0] sm:$0xff]  ;;  %v166_v5 = vld [vmem:[%s10218_s1 + $0x3e8] sm:$0xff] }
  0x61   :  { %2906 = vmatpush1.bf16.msra.mxu0 %v6482_v4  ;;  %v6547_v3 = vcombine.high %v409_v62, %v413_v63  ;;  %v162_v4 = vld [vmem:[%s10218_s1 + $0x3c8] sm:$0xff]  ;;  %v421_v7 = vld [vmem:[%s10218_s1 + $0xbe0] sm:$0xff]  ;;  %v6546_v9 = vcombine.low %v409_v62, %v413_v63 }
  0x62   :  { %2907 = vmatprep.subr.bf16.mxu0 %v6491_v6  ;;  %v417_v6 = vld [vmem:[%s10218_s1 + $0xbc0] sm:$0xff]  ;;  %v6301_v10 = vcombine.high %v162_v4, %v166_v5  ;;  %v6300_v18 = vcombine.low %v162_v4, %v166_v5 }
  0x63   :  { %2994 = vmatpush1.bf16.msra.mxu1 %v6236_v11  ;;  %v6555_v11 = vcombine.high %v417_v6, %v421_v7  ;;  %v429_v17 = vld [vmem:[%s10218_s1 + $0xc20] sm:$0xff]  ;;  %v6554_v19 = vcombine.low %v417_v6, %v421_v7 }
  0x64   :  { %2995 = vmatprep.subr.bf16.mxu1 %v6245_v14  ;;  %v174_v14 = vld [vmem:[%s10218_s1 + $0x428] sm:$0xff]  ;;  %v437_v26 = vld [vmem:[%s10218_s1 + $0xc60] sm:$0xff] }
  0x65   :  { %2908 = vmatpush1.bf16.msra.mxu0 %v6490_v13  ;;  %v170_v13 = vld [vmem:[%s10218_s1 + $0x408] sm:$0xff]  ;;  %v441_v34 = vld [vmem:[%s10218_s1 + $0xc80] sm:$0xff] }
  0x66   :  { %2909 = vmatprep.subr.bf16.mxu0 %v6499_v15  ;;  %v425_v15 = vld [vmem:[%s10218_s1 + $0xc00] sm:$0xff]  ;;  %v6309_v20 = vcombine.high %v170_v13, %v174_v14  ;;  %v6308_v27 = vcombine.low %v170_v13, %v174_v14 }
  0x67   :  { %2996 = vmatpush1.bf16.msra.mxu1 %v6244_v21  ;;  %v6563_v21 = vcombine.high %v425_v15, %v429_v17  ;;  %v6562_v29 = vcombine.low %v425_v15, %v429_v17  ;;  %v445_v35 = vld [vmem:[%s10218_s1 + $0xca0] sm:$0xff] }
  0x68   :  { %2997 = vmatprep.subr.bf16.mxu1 %v6253_v24  ;;  %v182_v24 = vld [vmem:[%s10218_s1 + $0x468] sm:$0xff]  ;;  %v449_v42 = vld [vmem:[%s10218_s1 + $0xcc0] sm:$0xff]  ;;  %v6578_v45 = vcombine.low %v441_v34, %v445_v35 }
  0x69   :  { %2910 = vmatpush1.bf16.msra.mxu0 %v6498_v23  ;;  %v178_v23 = vld [vmem:[%s10218_s1 + $0x448] sm:$0xff]  ;;  %v453_v43 = vld [vmem:[%s10218_s1 + $0xce0] sm:$0xff] }
  0x6a   :  { %2911 = vmatprep.subr.bf16.mxu0 %v6507_v25  ;;  %v433_v25 = vld [vmem:[%s10218_s1 + $0xc40] sm:$0xff]  ;;  %v6316_v36 = vcombine.low %v178_v23, %v182_v24  ;;  %v6586_v52 = vcombine.low %v449_v42, %v453_v43 }
  0x6b   :  { %2998 = vmatpush1.bf16.msra.mxu1 %v6252_v30  ;;  %v6317_v30 = vcombine.high %v178_v23, %v182_v24  ;;  %v6570_v37 = vcombine.low %v433_v25, %v437_v26  ;;  %v461_v50 = vld [vmem:[%s10218_s1 + $0xd20] sm:$0xff]  ;;  %v47_v23 = vld [vmem:[%s10218_s1 + $0x30] sm:$0xff] }
  0x6c   :  { %2999 = vmatprep.subr.bf16.mxu1 %v6261_v32  ;;  %v186_v32 = vld [vmem:[%s10218_s1 + $0x488] sm:$0xff]  ;;  %v469_v60 = vld [vmem:[%s10218_s1 + $0xd60] sm:$0xff] }
  0x6d   :  { %2912 = vmatpush1.bf16.msra.mxu0 %v6506_v31  ;;  %v6571_v31 = vcombine.high %v433_v25, %v437_v26  ;;  %v477_v4 = vld [vmem:[%s10218_s1 + $0xda0] sm:$0xff] }
  0x6e   :  { %2913 = vmatprep.subr.bf16.mxu0 %v6515_v33  ;;  %v190_v33 = vld [vmem:[%s10218_s1 + $0x4a8] sm:$0xff]  ;;  %v485_v13 = vld [vmem:[%s10218_s1 + $0xde0] sm:$0xff] }
  0x6f   :  { %3000 = vmatpush1.bf16.msra.mxu1 %v6260_v38  ;;  %v6325_v38 = vcombine.high %v186_v32, %v190_v33  ;;  %v6324_v44 = vcombine.low %v186_v32, %v190_v33  ;;  %v55_v32 = vld [vmem:[%s10218_s1 + $0x70] sm:$0xff] }
  0x70   :  { %3001 = vmatprep.subr.bf16.mxu1 %v6269_v40  ;;  %v198_v40 = vld [vmem:[%s10218_s1 + $0x4e8] sm:$0xff]  ;;  %v8216_v33 = vld [vmem:[%s10219_s0 + $0x18] ss:$28 sps:$4 sm:$0xff]  }
  0x71   :  { %2914 = vmatpush1.bf16.msra.mxu0 %v6514_v39  ;;  %v6579_v39 = vcombine.high %v441_v34, %v445_v35 }
  0x72   :  { %2915 = vmatprep.subr.bf16.mxu0 %v6523_v41  ;;  %v7618_v41 = vmov 0  }
  0x73   :  { %3002 = vmatpush1.bf16.msra.mxu1 %v6268_v46 }
  0x74   :  { %3003 = vmatprep.subr.bf16.mxu1 %v6277_v48  ;;  %v202_v48 = vld [vmem:[%s10218_s1 + $0x508] sm:$0xff] }
  0x75   :  { %2916 = vmatpush1.bf16.msra.mxu0 %v6522_v47  ;;  %v6587_v47 = vcombine.high %v449_v42, %v453_v43 }
  0x76   :  { %2917 = vmatprep.subr.bf16.mxu0 %v6531_v49  ;;  %v206_v49 = vld [vmem:[%s10218_s1 + $0x528] sm:$0xff] }
  0x77   :  { %3004 = vmatpush1.bf16.msra.mxu1 %v6276_v54  ;;  %v6341_v53 = vcombine.high %v202_v48, %v206_v49  ;;  %v6340_v61 = vcombine.low %v202_v48, %v206_v49  ;;  %v67_v48 = vld [vmem:[%s10218_s1 + $0xd0] sm:$0xff] }
  0x78   :  { %3005 = vmatprep.subr.bf16.mxu1 %v6285_v56  ;;  %v214_v56 = vld [vmem:[%s10218_s1 + $0x568] sm:$0xff]  ;;  %v71_v49 = vld [vmem:[%s10218_s1 + $0xf0] sm:$0xff] }
  0x79   :  { %2918 = vmatpush1.bf16.msra.mxu0 %v6530_v55  ;;  %v210_v55 = vld [vmem:[%s10218_s1 + $0x548] sm:$0xff] }
  0x7a   :  { %2919 = vmatprep.subr.bf16.mxu0 %v6539_v58  ;;  %v465_v58 = vld [vmem:[%s10218_s1 + $0xd40] sm:$0xff]  ;;  %v6349_v63 = vcombine.high %v210_v55, %v214_v56  ;;  %v6348_v5 = vcombine.low %v210_v55, %v214_v56  ;;  %v79_v55 = vld [vmem:[%s10218_s1 + $0x130] sm:$0xff] }
  0x7b   :  { %3006 = vmatpush1.bf16.msra.mxu1 %v6284_v0  ;;  %v6603_v0 = vcombine.high %v465_v58, %v469_v60  ;;  %v6602_v6 = vcombine.low %v465_v58, %v469_v60  ;;  %v6206_v58 = vcombine.low %v67_v48, %v71_v49 }
  0x7c   :  { %3007 = vmatprep.subr.bf16.mxu1 %v6293_v2  ;;  %v222_v2 = vld [vmem:[%s10218_s1 + $0x5a8] sm:$0xff] }
  0x7d   :  { %2920 = vmatpush1.bf16.msra.mxu0 %v6538_v1  ;;  %v218_v1 = vld [vmem:[%s10218_s1 + $0x588] sm:$0xff] }
  0x7e   :  { %2921 = vmatprep.subr.bf16.mxu0 %v6547_v3  ;;  %v473_v3 = vld [vmem:[%s10218_s1 + $0xd80] sm:$0xff]  ;;  %v6357_v7 = vcombine.high %v218_v1, %v222_v2  ;;  %v6356_v14 = vcombine.low %v218_v1, %v222_v2  ;;  %v87_v1 = vld [vmem:[%s10218_s1 + $0x170] sm:$0xff] }
  0x7f   :  { %3008 = vmatpush1.bf16.msra.mxu1 %v6292_v8  ;;  %v6611_v8 = vcombine.high %v473_v3, %v477_v4  ;;  %v6610_v15 = vcombine.low %v473_v3, %v477_v4 }
  0x80   :  { %3009 = vmatprep.subr.bf16.mxu1 %v6301_v10  ;;  %v230_v10 = vld [vmem:[%s10218_s1 + $0x5e8] sm:$0xff] }
  0x81   :  { %2922 = vmatpush1.bf16.msra.mxu0 %v6546_v9  ;;  %v226_v9 = vld [vmem:[%s10218_s1 + $0x5c8] sm:$0xff] }
  0x82   :  { %2923 = vmatprep.subr.bf16.mxu0 %v6555_v11  ;;  %v481_v11 = vld [vmem:[%s10218_s1 + $0xdc0] sm:$0xff]  ;;  %v6365_v17 = vcombine.high %v226_v9, %v230_v10  ;;  %v6364_v24 = vcombine.low %v226_v9, %v230_v10  ;;  %v95_v9 = vld [vmem:[%s10218_s1 + $0x1b0] sm:$0xff] }
  0x83   :  { %3010 = vmatpush1.bf16.msra.mxu1 %v6300_v18  ;;  %v6619_v18 = vcombine.high %v481_v11, %v485_v13  ;;  %v6618_v25 = vcombine.low %v481_v11, %v485_v13 }
  0x84   :  { %3022 = vmatprep.subr.bf16.mxu1 %v6309_v20  ;;  %v238_v20 = vld [vmem:[%s10218_s1 + $0x628] sm:$0xff] }
  0x85   :  { %2924 = vmatpush1.bf16.msra.mxu0 %v6554_v19  ;;  %v234_v19 = vld [vmem:[%s10218_s1 + $0x608] sm:$0xff] }
  0x86   :  { %2936 = vmatprep.subr.bf16.mxu0 %v6563_v21  ;;  %3012 = vmatmul.mubr.bf16.vlgmr.msra.gmra.mrb[4].mxu1 %v7894_v12  ;;  %v194_v12 = vld [vmem:[%s10218_s1 + $0x4c8] sm:$0xff]  ;;  %v43_v21 = vld [vmem:[%s10218_s1 + $0x10] sm:$0xff]  ;;  %v6373_v26 = vcombine.high %v234_v19, %v238_v20  ;;  %v6372_v34 = vcombine.low %v234_v19, %v238_v20 }
  0x87   :  { %3023 = vmatpush1.bf16.msra.mxu1 %v6308_v27  ;;  %3054 = vmatprep.mubr.bf16.mxu1 %v7773_v59  ;;  %v6333_v46 = vcombine.high %v194_v12, %v198_v40  ;;  %v457_v59 = vld [vmem:[%s10218_s1 + $0xd00] sm:$0xff]  ;;  %v6332_v51 = vcombine.low %v194_v12, %v198_v40  ;;  %v6183_v27 = vcombine.high %v43_v21, %v47_v23  ;;  %v59_v12 = vld [vmem:[%s10218_s1 + $0x90] sm:$0xff] }
  0x88   :  { %2926 = vmatmul.mubr.bf16.vlgmr.msra.gmra.mrb[0].mxu0 %v8111_v28  ;;  %3024 = vmatprep.subr.bf16.mxu1 %v6317_v30  ;;  %v6595_v54 = vcombine.high %v457_v59, %v461_v50  ;;  %v6594_v62 = vcombine.low %v457_v59, %v461_v50  ;;  %v246_v30 = vld [vmem:[%s10218_s1 + $0x668] sm:$0xff]  ;;  %v6182_v35 = vcombine.low %v43_v21, %v47_v23  ;;  %v63_v40 = vld [vmem:[%s10218_s1 + $0xb0] sm:$0xff] }
  0x89   :  { %2937 = vmatpush1.bf16.msra.mxu0 %v6562_v29  ;;  %2968 = vmatprep.mubr.bf16.mxu0 %v7618_v41  ;;  %v242_v29 = vld [vmem:[%s10218_s1 + $0x648] sm:$0xff]  ;;  %v6198_v50 = vcombine.low %v59_v12, %v63_v40  ;;  %v103_v19 = vld [vmem:[%s10218_s1 + $0x1f0] sm:$0xff] }
  0x8a   :  { %2938 = vmatprep.subr.bf16.mxu0 %v6571_v31  ;;  %v51_v31 = vld [vmem:[%s10218_s1 + $0x50] sm:$0xff]  ;;  %v6380_v42 = vcombine.low %v242_v29, %v246_v30 }
  0x8b   :  { %3025 = vmatpush1.bf16.msra.mxu1 %v6316_v36  ;;  %v6381_v36 = vcombine.high %v242_v29, %v246_v30  ;;  %v6190_v43 = vcombine.low %v51_v31, %v55_v32  ;;  %v111_v29 = vld [vmem:[%s10218_s1 + $0x230] sm:$0xff] }
  0x8c   :  { %3026 = vmatprep.subr.bf16.mxu1 %v6325_v38  ;;  %v250_v38 = vld [vmem:[%s10218_s1 + $0x688] sm:$0xff] }
  0x8d   :  { %2939 = vmatpush1.bf16.msra.mxu0 %v6570_v37  ;;  %v6191_v37 = vcombine.high %v51_v31, %v55_v32 }
  0x8e   :  { %2940 = vmatprep.subr.bf16.mxu0 %v6579_v39  ;;  %v254_v39 = vld [vmem:[%s10218_s1 + $0x6a8] sm:$0xff] }
  0x8f   :  { %3027 = vmatpush1.bf16.msra.mxu1 %v6324_v44  ;;  %v6389_v44 = vcombine.high %v250_v38, %v254_v39  ;;  %v6388_v59 = vcombine.low %v250_v38, %v254_v39  ;;  %v119_v38 = vld [vmem:[%s10218_s1 + $0x270] sm:$0xff] }
  0x90   :  { %3028 = vmatprep.subr.bf16.mxu1 %v6333_v46  ;;  %v258_v46 = vld [vmem:[%s10218_s1 + $0x6c8] sm:$0xff] }
  0x91   :  { %2941 = vmatpush1.bf16.msra.mxu0 %v6578_v45  ;;  %v6199_v45 = vcombine.high %v59_v12, %v63_v40 }
  0x92   :  { %2942 = vmatprep.subr.bf16.mxu0 %v6587_v47  ;;  %v262_v47 = vld [vmem:[%s10218_s1 + $0x6e8] sm:$0xff] }
  0x93   :  { %3029 = vmatpush1.bf16.msra.mxu1 %v6332_v51  ;;  %v6397_v51 = vcombine.high %v258_v46, %v262_v47  ;;  %v6396_v56 = vcombine.low %v258_v46, %v262_v47  ;;  %v127_v46 = vld [vmem:[%s10218_s1 + $0x2b0] sm:$0xff] }
  0x94   :  { %3030 = vmatprep.subr.bf16.mxu1 %v6341_v53  ;;  %v270_v53 = vld [vmem:[%s10218_s1 + $0x728] sm:$0xff] }
  0x95   :  { %2943 = vmatpush1.bf16.msra.mxu0 %v6586_v52  ;;  %v6207_v52 = vcombine.high %v67_v48, %v71_v49 }
  0x96   :  { %2944 = vmatprep.subr.bf16.mxu0 %v6595_v54  ;;  %v75_v54 = vld [vmem:[%s10218_s1 + $0x110] sm:$0xff] }
  0x97   :  { %3031 = vmatpush1.bf16.msra.mxu1 %v6340_v61  ;;  %v6215_v61 = vcombine.high %v75_v54, %v79_v55  ;;  %v6214_v3 = vcombine.low %v75_v54, %v79_v55  ;;  %v330_v55 = vld [vmem:[%s10218_s1 + $0x908] sm:$0xff] }
  0x98   :  { %3032 = vmatprep.subr.bf16.mxu1 %v6349_v63  ;;  %v278_v63 = vld [vmem:[%s10218_s1 + $0x768] sm:$0xff] }
  0x99   :  { %2945 = vmatpush1.bf16.msra.mxu0 %v6594_v62  ;;  %v274_v62 = vld [vmem:[%s10218_s1 + $0x748] sm:$0xff] }
  0x9a   :  { %2946 = vmatprep.subr.bf16.mxu0 %v6603_v0  ;;  %v83_v0 = vld [vmem:[%s10218_s1 + $0x150] sm:$0xff]  ;;  %v6413_v4 = vcombine.high %v274_v62, %v278_v63  ;;  %v6412_v10 = vcombine.low %v274_v62, %v278_v63 }
  0x9b   :  { %3033 = vmatpush1.bf16.msra.mxu1 %v6348_v5  ;;  %v6223_v5 = vcombine.high %v83_v0, %v87_v1  ;;  %v6222_v11 = vcombine.low %v83_v0, %v87_v1  ;;  %v338_v1 = vld [vmem:[%s10218_s1 + $0x948] sm:$0xff] }
  0x9c   :  { %3034 = vmatprep.subr.bf16.mxu1 %v6357_v7  ;;  %v286_v7 = vld [vmem:[%s10218_s1 + $0x7a8] sm:$0xff] }
  0x9d   :  { %2947 = vmatpush1.bf16.msra.mxu0 %v6602_v6  ;;  %v282_v6 = vld [vmem:[%s10218_s1 + $0x788] sm:$0xff] }
  0x9e   :  { %2948 = vmatprep.subr.bf16.mxu0 %v6611_v8  ;;  %v91_v8 = vld [vmem:[%s10218_s1 + $0x190] sm:$0xff]  ;;  %v6421_v13 = vcombine.high %v282_v6, %v286_v7  ;;  %v6420_v20 = vcombine.low %v282_v6, %v286_v7 }
  0x9f   :  { %3035 = vmatpush1.bf16.msra.mxu1 %v6356_v14  ;;  %v6231_v14 = vcombine.high %v91_v8, %v95_v9  ;;  %v6230_v21 = vcombine.low %v91_v8, %v95_v9  ;;  %v346_v9 = vld [vmem:[%s10218_s1 + $0x988] sm:$0xff] }
  0xa0   :  { %3036 = vmatprep.subr.bf16.mxu1 %v6365_v17  ;;  %v294_v17 = vld [vmem:[%s10218_s1 + $0x7e8] sm:$0xff] }
  0xa1   :  { %2949 = vmatpush1.bf16.msra.mxu0 %v6610_v15  ;;  %v290_v15 = vld [vmem:[%s10218_s1 + $0x7c8] sm:$0xff] }
  0xa2   :  { %2950 = vmatprep.subr.bf16.mxu0 %v6619_v18  ;;  %v99_v18 = vld [vmem:[%s10218_s1 + $0x1d0] sm:$0xff]  ;;  %v6429_v23 = vcombine.high %v290_v15, %v294_v17  ;;  %v6428_v30 = vcombine.low %v290_v15, %v294_v17 }
  0xa3   :  { %3037 = vmatpush1.bf16.msra.mxu1 %v6364_v24  ;;  %v6239_v24 = vcombine.high %v99_v18, %v103_v19  ;;  %v6238_v31 = vcombine.low %v99_v18, %v103_v19  ;;  %v354_v19 = vld [vmem:[%s10218_s1 + $0x9c8] sm:$0xff] }
  0xa4   :  { %3038 = vmatprep.subr.bf16.mxu1 %v6373_v26  ;;  %v302_v26 = vld [vmem:[%s10218_s1 + $0x828] sm:$0xff] }
  0xa5   :  { %2951 = vmatpush1.bf16.msra.mxu0 %v6618_v25  ;;  %v298_v25 = vld [vmem:[%s10218_s1 + $0x808] sm:$0xff] }
  0xa6   :  { %3151 = vmatprep.subr.bf16.mxu0 %v6183_v27  ;;  %v107_v27 = vld [vmem:[%s10218_s1 + $0x210] sm:$0xff]  ;;  %v6437_v32 = vcombine.high %v298_v25, %v302_v26  ;;  %v6436_v39 = vcombine.low %v298_v25, %v302_v26 }
  0xa7   :  { %3039 = vmatpush1.bf16.msra.mxu1 %v6372_v34  ;;  %v6247_v34 = vcombine.high %v107_v27, %v111_v29  ;;  %v6246_v12 = vcombine.low %v107_v27, %v111_v29  ;;  %v362_v29 = vld [vmem:[%s10218_s1 + $0xa08] sm:$0xff] }
  0xa8   :  { %2969 = vmatmul.mubr.bf16.vlgmr.msra.gmra.mrb[0].mxu0 %v8216_v33  ;;  %3040 = vmatprep.subr.bf16.mxu1 %v6381_v36  ;;  %v310_v36 = vld [vmem:[%s10218_s1 + $0x868] sm:$0xff] }
  0xa9   :  { %3152 = vmatpush1.bf16.msra.mxu0 %v6182_v35  ;;  %3183 = vmatprep.mubr.bf16.mxu0 %v7765_v57  ;;  %v266_v57 = vld [vmem:[%s10218_s1 + $0x708] sm:$0xff] }
  0xaa   :  { %3153 = vmatprep.subr.bf16.mxu0 %v6191_v37  ;;  %v6405_v60 = vcombine.high %v266_v57, %v270_v53  ;;  %v6404_v2 = vcombine.low %v266_v57, %v270_v53  ;;  %v306_v35 = vld [vmem:[%s10218_s1 + $0x848] sm:$0xff]  ;;  %v115_v37 = vld [vmem:[%s10218_s1 + $0x250] sm:$0xff] }
  0xab   :  { %3041 = vmatpush1.bf16.msra.mxu1 %v6380_v42  ;;  %v6445_v40 = vcombine.high %v306_v35, %v310_v36  ;;  %v6255_v42 = vcombine.high %v115_v37, %v119_v38  ;;  %v6444_v47 = vcombine.low %v306_v35, %v310_v36  ;;  %v6254_v48 = vcombine.low %v115_v37, %v119_v38  ;;  %v370_v38 = vld [vmem:[%s10218_s1 + $0xa48] sm:$0xff] }
  0xac   :  { %3042 = vmatprep.subr.bf16.mxu1 %v6389_v44  ;;  %v318_v44 = vld [vmem:[%s10218_s1 + $0x8a8] sm:$0xff] }
  0xad   :  { %3154 = vmatpush1.bf16.msra.mxu0 %v6190_v43  ;;  %v314_v43 = vld [vmem:[%s10218_s1 + $0x888] sm:$0xff] }
  0xae   :  { %3155 = vmatprep.subr.bf16.mxu0 %v6199_v45  ;;  %v123_v45 = vld [vmem:[%s10218_s1 + $0x290] sm:$0xff]  ;;  %v6453_v49 = vcombine.high %v314_v43, %v318_v44 }
  0xaf   :  { %3043 = vmatpush1.bf16.msra.mxu1 %v6388_v59  ;;  %v6263_v59 = vcombine.high %v123_v45, %v127_v46  ;;  %v6262_v57 = vcombine.low %v123_v45, %v127_v46  ;;  %v378_v46 = vld [vmem:[%s10218_s1 + $0xa88] sm:$0xff] }
  0xb0   :  { %3044 = vmatprep.subr.bf16.mxu1 %v6397_v51  ;;  %v131_v51 = vld [vmem:[%s10218_s1 + $0x2d0] sm:$0xff] }
  0xb1   :  { %3156 = vmatpush1.bf16.msra.mxu0 %v6198_v50  ;;  %v326_v50 = vld [vmem:[%s10218_s1 + $0x8e8] sm:$0xff] }
  0xb2   :  { %3157 = vmatprep.subr.bf16.mxu0 %v6207_v52  ;;  %v6452_v52 = vcombine.low %v314_v43, %v318_v44 }
  0xb3   :  { %3045 = vmatpush1.bf16.msra.mxu1 %v6396_v56  ;;  %v334_v56 = vld [vmem:[%s10218_s1 + $0x928] sm:$0xff] }
  0xb4   :  { %3046 = vmatprep.subr.bf16.mxu1 %v6405_v60  ;;  %v143_v60 = vld [vmem:[%s10218_s1 + $0x330] sm:$0xff]  ;;  %v6469_v63 = vcombine.high %v330_v55, %v334_v56 }
  0xb5   :  { %3158 = vmatpush1.bf16.msra.mxu0 %v6206_v58  ;;  %v139_v58 = vld [vmem:[%s10218_s1 + $0x310] sm:$0xff] }
  0xb6   :  { %3159 = vmatprep.subr.bf16.mxu0 %v6215_v61  ;;  %v6279_v0 = vcombine.high %v139_v58, %v143_v60  ;;  %v6278_v6 = vcombine.low %v139_v58, %v143_v60 }
  0xb7   :  { %3047 = vmatpush1.bf16.msra.mxu1 %v6404_v2  ;;  %v342_v2 = vld [vmem:[%s10218_s1 + $0x968] sm:$0xff] }
  0xb8   :  { %3048 = vmatprep.subr.bf16.mxu1 %v6413_v4  ;;  %v151_v4 = vld [vmem:[%s10218_s1 + $0x370] sm:$0xff]  ;;  %v6477_v7 = vcombine.high %v338_v1, %v342_v2 }
  0xb9   :  { %3160 = vmatpush1.bf16.msra.mxu0 %v6214_v3  ;;  %v147_v3 = vld [vmem:[%s10218_s1 + $0x350] sm:$0xff] }
  0xba   :  { %3161 = vmatprep.subr.bf16.mxu0 %v6223_v5  ;;  %v6468_v5 = vcombine.low %v330_v55, %v334_v56  ;;  %v6287_v8 = vcombine.high %v147_v3, %v151_v4  ;;  %v6286_v15 = vcombine.low %v147_v3, %v151_v4  ;;  %v199_v55 = vld [vmem:[%s10218_s1 + $0x4f0] sm:$0xff] }
  0xbb   :  { %3049 = vmatpush1.bf16.msra.mxu1 %v6412_v10  ;;  %v350_v10 = vld [vmem:[%s10218_s1 + $0x9a8] sm:$0xff] }
  0xbc   :  { %3050 = vmatprep.subr.bf16.mxu1 %v6421_v13  ;;  %v159_v13 = vld [vmem:[%s10218_s1 + $0x3b0] sm:$0xff]  ;;  %v6485_v17 = vcombine.high %v346_v9, %v350_v10 }
  0xbd   :  { %3162 = vmatpush1.bf16.msra.mxu0 %v6222_v11  ;;  %v155_v11 = vld [vmem:[%s10218_s1 + $0x390] sm:$0xff] }
  0xbe   :  { %3163 = vmatprep.subr.bf16.mxu0 %v6231_v14  ;;  %v6476_v14 = vcombine.low %v338_v1, %v342_v2  ;;  %v6295_v18 = vcombine.high %v155_v11, %v159_v13  ;;  %v6294_v25 = vcombine.low %v155_v11, %v159_v13  ;;  %v207_v1 = vld [vmem:[%s10218_s1 + $0x530] sm:$0xff] }
  0xbf   :  { %3051 = vmatpush1.bf16.msra.mxu1 %v6420_v20  ;;  %v358_v20 = vld [vmem:[%s10218_s1 + $0x9e8] sm:$0xff] }
  0xc0   :  { %3052 = vmatprep.subr.bf16.mxu1 %v6429_v23  ;;  %v167_v23 = vld [vmem:[%s10218_s1 + $0x3f0] sm:$0xff]  ;;  %v6493_v26 = vcombine.high %v354_v19, %v358_v20 }
  0xc1   :  { %3164 = vmatpush1.bf16.msra.mxu0 %v6230_v21  ;;  %v163_v21 = vld [vmem:[%s10218_s1 + $0x3d0] sm:$0xff] }
  0xc2   :  { %3165 = vmatprep.subr.bf16.mxu0 %v6239_v24  ;;  %v6484_v24 = vcombine.low %v346_v9, %v350_v10  ;;  %v6303_v27 = vcombine.high %v163_v21, %v167_v23  ;;  %v6302_v35 = vcombine.low %v163_v21, %v167_v23  ;;  %v215_v9 = vld [vmem:[%s10218_s1 + $0x570] sm:$0xff] }
  0xc3   :  { %3053 = vmatpush1.bf16.msra.mxu1 %v6428_v30  ;;  %v366_v30 = vld [vmem:[%s10218_s1 + $0xa28] sm:$0xff] }
  0xc4   :  { %3065 = vmatprep.subr.bf16.mxu1 %v6437_v32  ;;  %v175_v32 = vld [vmem:[%s10218_s1 + $0x430] sm:$0xff]  ;;  %v6501_v36 = vcombine.high %v362_v29, %v366_v30 }
  0xc5   :  { %3166 = vmatpush1.bf16.msra.mxu0 %v6238_v31  ;;  %v171_v31 = vld [vmem:[%s10218_s1 + $0x410] sm:$0xff] }
  0xc6   :  { %3167 = vmatprep.subr.bf16.mxu0 %v6247_v34  ;;  %3055 = vmatmul.mubr.bf16.vlgmr.msra.gmra.mrb[4].mxu1 %v7905_v16  ;;  %v322_v16 = vld [vmem:[%s10218_s1 + $0x8c8] sm:$0xff]  ;;  %v6492_v34 = vcombine.low %v354_v19, %v358_v20  ;;  %v6311_v37 = vcombine.high %v171_v31, %v175_v32  ;;  %v6310_v43 = vcombine.low %v171_v31, %v175_v32  ;;  %v223_v19 = vld [vmem:[%s10218_s1 + $0x5b0] sm:$0xff] }
  0xc7   :  { %3066 = vmatpush1.bf16.msra.mxu1 %v6436_v39  ;;  %3097 = vmatprep.mubr.bf16.mxu1 %v7916_v22  ;;  %v135_v22 = vld [vmem:[%s10218_s1 + $0x2f0] sm:$0xff]  ;;  %v6461_v53 = vcombine.high %v322_v16, %v326_v50  ;;  %v6460_v61 = vcombine.low %v322_v16, %v326_v50  ;;  %v374_v39 = vld [vmem:[%s10218_s1 + $0xa68] sm:$0xff] }
  0xc8   :  { %3067 = vmatprep.subr.bf16.mxu1 %v6445_v40  ;;  %v6271_v54 = vcombine.high %v131_v51, %v135_v22  ;;  %v6270_v62 = vcombine.low %v131_v51, %v135_v22  ;;  %v183_v40 = vld [vmem:[%s10218_s1 + $0x470] sm:$0xff]  ;;  %v6509_v44 = vcombine.high %v370_v38, %v374_v39  ;;  %v6508_v16 = vcombine.low %v370_v38, %v374_v39 }
  0xc9   :  { %3168 = vmatpush1.bf16.msra.mxu0 %v6246_v12  ;;  %v179_v12 = vld [vmem:[%s10218_s1 + $0x450] sm:$0xff] }
  0xca   :  { %3169 = vmatprep.subr.bf16.mxu0 %v6255_v42  ;;  %v6500_v42 = vcombine.low %v362_v29, %v366_v30  ;;  %v6319_v45 = vcombine.high %v179_v12, %v183_v40  ;;  %v6318_v50 = vcombine.low %v179_v12, %v183_v40  ;;  %v231_v29 = vld [vmem:[%s10218_s1 + $0x5f0] sm:$0xff] }
  0xcb   :  { %3068 = vmatpush1.bf16.msra.mxu1 %v6444_v47  ;;  %v382_v47 = vld [vmem:[%s10218_s1 + $0xaa8] sm:$0xff]  ;;  %v239_v38 = vld [vmem:[%s10218_s1 + $0x630] sm:$0xff] }
  0xcc   :  { %3069 = vmatprep.subr.bf16.mxu1 %v6453_v49  ;;  %v191_v49 = vld [vmem:[%s10218_s1 + $0x4b0] sm:$0xff]  ;;  %v6517_v51 = vcombine.high %v378_v46, %v382_v47  ;;  %v6516_v56 = vcombine.low %v378_v46, %v382_v47 }
  0xcd   :  { %3170 = vmatpush1.bf16.msra.mxu0 %v6254_v48  ;;  %v187_v48 = vld [vmem:[%s10218_s1 + $0x490] sm:$0xff] }
  0xce   :  { %3171 = vmatprep.subr.bf16.mxu0 %v6263_v59  ;;  %v7606_v59 = vld [vmem:[%s10219_s0] ss:$28 sps:$4 sm:$0xff]   ;;  %v6327_v22 = vcombine.high %v187_v48, %v191_v49  ;;  %v6326_v58 = vcombine.low %v187_v48, %v191_v49  ;;  %v247_v46 = vld [vmem:[%s10218_s1 + $0x670] sm:$0xff] }
  0xcf   :  { %3070 = vmatpush1.bf16.msra.mxu1 %v6452_v52  ;;  %v386_v52 = vld [vmem:[%s10218_s1 + $0xac8] sm:$0xff] }
  0xd0   :  { %3071 = vmatprep.subr.bf16.mxu1 %v6461_v53  ;;  %v7607_v53 = vld [vmem:[%s10219_s0 + $0xc] ss:$28 sps:$4 sm:$0xff]  }
  0xd1   :  { %3172 = vmatpush1.bf16.msra.mxu0 %v6262_v57  ;;  %v390_v57 = vld [vmem:[%s10218_s1 + $0xae8] sm:$0xff] }
  0xd2   :  { %3173 = vmatprep.subr.bf16.mxu0 %v6271_v54  ;;  %v195_v54 = vld [vmem:[%s10218_s1 + $0x4d0] sm:$0xff]  ;;  %v6525_v60 = vcombine.high %v386_v52, %v390_v57  ;;  %v6524_v2 = vcombine.low %v386_v52, %v390_v57 }
  0xd3   :  { %3072 = vmatpush1.bf16.msra.mxu1 %v6460_v61  ;;  %v6335_v61 = vcombine.high %v195_v54, %v199_v55  ;;  %v6334_v3 = vcombine.low %v195_v54, %v199_v55  ;;  %v450_v54 = vld [vmem:[%s10218_s1 + $0xcc8] sm:$0xff] }
  0xd4   :  { %3073 = vmatprep.subr.bf16.mxu1 %v6469_v63  ;;  %v398_v63 = vld [vmem:[%s10218_s1 + $0xb28] sm:$0xff] }
  0xd5   :  { %3174 = vmatpush1.bf16.msra.mxu0 %v6270_v62  ;;  %v394_v62 = vld [vmem:[%s10218_s1 + $0xb08] sm:$0xff] }
  0xd6   :  { %3175 = vmatprep.subr.bf16.mxu0 %v6279_v0  ;;  %v203_v0 = vld [vmem:[%s10218_s1 + $0x510] sm:$0xff]  ;;  %v6533_v4 = vcombine.high %v394_v62, %v398_v63  ;;  %v6532_v10 = vcombine.low %v394_v62, %v398_v63  ;;  %v458_v63 = vld [vmem:[%s10218_s1 + $0xd08] sm:$0xff] }
  0xd7   :  { %3074 = vmatpush1.bf16.msra.mxu1 %v6468_v5  ;;  %v6343_v5 = vcombine.high %v203_v0, %v207_v1  ;;  %v6342_v11 = vcombine.low %v203_v0, %v207_v1  ;;  %v462_v0 = vld [vmem:[%s10218_s1 + $0xd28] sm:$0xff]  ;;  %v267_v1 = vld [vmem:[%s10218_s1 + $0x710] sm:$0xff] }
  0xd8   :  { %3075 = vmatprep.subr.bf16.mxu1 %v6477_v7  ;;  %v406_v7 = vld [vmem:[%s10218_s1 + $0xb68] sm:$0xff] }
  0xd9   :  { %3176 = vmatpush1.bf16.msra.mxu0 %v6278_v6  ;;  %v402_v6 = vld [vmem:[%s10218_s1 + $0xb48] sm:$0xff] }
  0xda   :  { %3177 = vmatprep.subr.bf16.mxu0 %v6287_v8  ;;  %v211_v8 = vld [vmem:[%s10218_s1 + $0x550] sm:$0xff]  ;;  %v6541_v13 = vcombine.high %v402_v6, %v406_v7  ;;  %v6540_v20 = vcombine.low %v402_v6, %v406_v7  ;;  %v6597_v6 = vcombine.high %v458_v63, %v462_v0  ;;  %v466_v7 = vld [vmem:[%s10218_s1 + $0xd48] sm:$0xff] }
  0xdb   :  { %3076 = vmatpush1.bf16.msra.mxu1 %v6476_v14  ;;  %v6351_v14 = vcombine.high %v211_v8, %v215_v9  ;;  %v6350_v21 = vcombine.low %v211_v8, %v215_v9  ;;  %v470_v8 = vld [vmem:[%s10218_s1 + $0xd68] sm:$0xff]  ;;  %v275_v9 = vld [vmem:[%s10218_s1 + $0x750] sm:$0xff] }
  0xdc   :  { %3077 = vmatprep.subr.bf16.mxu1 %v6485_v17  ;;  %v414_v17 = vld [vmem:[%s10218_s1 + $0xba8] sm:$0xff] }
  0xdd   :  { %3178 = vmatpush1.bf16.msra.mxu0 %v6286_v15  ;;  %v410_v15 = vld [vmem:[%s10218_s1 + $0xb88] sm:$0xff] }
  0xde   :  { %3179 = vmatprep.subr.bf16.mxu0 %v6295_v18  ;;  %v219_v18 = vld [vmem:[%s10218_s1 + $0x590] sm:$0xff]  ;;  %v6549_v23 = vcombine.high %v410_v15, %v414_v17  ;;  %v6548_v30 = vcombine.low %v410_v15, %v414_v17  ;;  %v6605_v15 = vcombine.high %v466_v7, %v470_v8  ;;  %v474_v17 = vld [vmem:[%s10218_s1 + $0xd88] sm:$0xff] }
  0xdf   :  { %3078 = vmatpush1.bf16.msra.mxu1 %v6484_v24  ;;  %v6359_v24 = vcombine.high %v219_v18, %v223_v19  ;;  %v6358_v31 = vcombine.low %v219_v18, %v223_v19  ;;  %v478_v18 = vld [vmem:[%s10218_s1 + $0xda8] sm:$0xff]  ;;  %v283_v19 = vld [vmem:[%s10218_s1 + $0x790] sm:$0xff] }
  0xe0   :  { %3079 = vmatprep.subr.bf16.mxu1 %v6493_v26  ;;  %v422_v26 = vld [vmem:[%s10218_s1 + $0xbe8] sm:$0xff] }
  0xe1   :  { %3180 = vmatpush1.bf16.msra.mxu0 %v6294_v25  ;;  %v418_v25 = vld [vmem:[%s10218_s1 + $0xbc8] sm:$0xff] }
  0xe2   :  { %3181 = vmatprep.subr.bf16.mxu0 %v6303_v27  ;;  %v227_v27 = vld [vmem:[%s10218_s1 + $0x5d0] sm:$0xff]  ;;  %v6557_v32 = vcombine.high %v418_v25, %v422_v26  ;;  %v6556_v39 = vcombine.low %v418_v25, %v422_v26  ;;  %v6613_v25 = vcombine.high %v474_v17, %v478_v18  ;;  %v482_v26 = vld [vmem:[%s10218_s1 + $0xdc8] sm:$0xff] }
  0xe3   :  { %3080 = vmatpush1.bf16.msra.mxu1 %v6492_v34  ;;  %v6367_v34 = vcombine.high %v227_v27, %v231_v29  ;;  %v6366_v12 = vcombine.low %v227_v27, %v231_v29  ;;  %v486_v27 = vld [vmem:[%s10218_s1 + $0xde8] sm:$0xff]  ;;  %v291_v29 = vld [vmem:[%s10218_s1 + $0x7d0] sm:$0xff] }
  0xe4   :  { %3081 = vmatprep.subr.bf16.mxu1 %v6501_v36  ;;  %v430_v36 = vld [vmem:[%s10218_s1 + $0xc28] sm:$0xff] }
  0xe5   :  { %3182 = vmatpush1.bf16.msra.mxu0 %v6302_v35  ;;  %v426_v35 = vld [vmem:[%s10218_s1 + $0xc08] sm:$0xff] }
  0xe6   :  { %3194 = vmatprep.subr.bf16.mxu0 %v6311_v37  ;;  %v235_v37 = vld [vmem:[%s10218_s1 + $0x610] sm:$0xff]  ;;  %v6565_v40 = vcombine.high %v426_v35, %v430_v36  ;;  %v6564_v47 = vcombine.low %v426_v35, %v430_v36  ;;  %v6612_v36 = vcombine.low %v474_v17, %v478_v18 }
  0xe7   :  { %3082 = vmatpush1.bf16.msra.mxu1 %v6500_v42  ;;  %v6375_v42 = vcombine.high %v235_v37, %v239_v38  ;;  %v6374_v48 = vcombine.low %v235_v37, %v239_v38  ;;  %v339_v17 = vld [vmem:[%s10218_s1 + $0x950] sm:$0xff] }
  0xe8   :  { %3184 = vmatmul.mubr.bf16.vlgmr.msra.gmra.mrb[4].mxu0 %v7606_v59  ;;  %3083 = vmatprep.subr.bf16.mxu1 %v6509_v44  ;;  %v438_v44 = vld [vmem:[%s10218_s1 + $0xc68] sm:$0xff]  ;;  %v343_v18 = vld [vmem:[%s10218_s1 + $0x970] sm:$0xff] }
  0xe9   :  { %3195 = vmatpush1.bf16.msra.mxu0 %v6310_v43  ;;  %3226 = vmatprep.mubr.bf16.mxu0 %v7607_v53  ;;  %v434_v43 = vld [vmem:[%s10218_s1 + $0xc48] sm:$0xff] }
  0xea   :  { %3196 = vmatprep.subr.bf16.mxu0 %v6319_v45  ;;  %v243_v45 = vld [vmem:[%s10218_s1 + $0x650] sm:$0xff]  ;;  %v6573_v49 = vcombine.high %v434_v43, %v438_v44  ;;  %v442_v59 = vld [vmem:[%s10218_s1 + $0xc88] sm:$0xff]  ;;  %v6572_v52 = vcombine.low %v434_v43, %v438_v44  ;;  %v48_v44 = vld [vmem:[%s10218_s1 + $0x38] sm:$0xff] }
  0xeb   :  { %3084 = vmatpush1.bf16.msra.mxu1 %v6508_v16  ;;  %v446_v16 = vld [vmem:[%s10218_s1 + $0xca8] sm:$0xff]  ;;  %v6382_v57 = vcombine.low %v243_v45, %v247_v46 }
  0xec   :  { %3085 = vmatprep.subr.bf16.mxu1 %v6517_v51  ;;  %v251_v51 = vld [vmem:[%s10218_s1 + $0x690] sm:$0xff]  ;;  %v6581_v53 = vcombine.high %v442_v59, %v446_v16 }
  0xed   :  { %3197 = vmatpush1.bf16.msra.mxu0 %v6318_v50  ;;  %v6383_v50 = vcombine.high %v243_v45, %v247_v46  ;;  %v6620_v45 = vcombine.low %v482_v26, %v486_v27 }
  0xee   :  { %3198 = vmatprep.subr.bf16.mxu0 %v6327_v22  ;;  %v255_v22 = vld [vmem:[%s10218_s1 + $0x6b0] sm:$0xff] }
  0xef   :  { %3086 = vmatpush1.bf16.msra.mxu1 %v6516_v56  ;;  %v6391_v55 = vcombine.high %v251_v51, %v255_v22  ;;  %v259_v56 = vld [vmem:[%s10218_s1 + $0x6d0] sm:$0xff] }
  0xf0   :  { %3087 = vmatprep.subr.bf16.mxu1 %v6525_v60  ;;  %v6580_v60 = vcombine.low %v442_v59, %v446_v16  ;;  %v52_v59 = vld [vmem:[%s10218_s1 + $0x58] sm:$0xff] }
  0xf1   :  { %3199 = vmatpush1.bf16.msra.mxu0 %v6326_v58  ;;  %v263_v58 = vld [vmem:[%s10218_s1 + $0x6f0] sm:$0xff] }
  0xf2   :  { %3200 = vmatprep.subr.bf16.mxu0 %v6335_v61  ;;  %v6390_v61 = vcombine.low %v251_v51, %v255_v22 }
  0xf3   :  { %3088 = vmatpush1.bf16.msra.mxu1 %v6524_v2  ;;  %v6399_v2 = vcombine.high %v259_v56, %v263_v58 }
  0xf4   :  { %3089 = vmatprep.subr.bf16.mxu1 %v6533_v4 }
  0xf5   :  { %3201 = vmatpush1.bf16.msra.mxu0 %v6334_v3  ;;  %v271_v3 = vld [vmem:[%s10218_s1 + $0x730] sm:$0xff] }
  0xf6   :  { %3202 = vmatprep.subr.bf16.mxu0 %v6343_v5  ;;  %v6398_v5 = vcombine.low %v259_v56, %v263_v58  ;;  %v7608_v56 = vld [vmem:[%s10219_s0 + $0x8] ss:$28 sps:$4 sm:$0xff]  }
  0xf7   :  { %3090 = vmatpush1.bf16.msra.mxu1 %v6532_v10  ;;  %v6407_v10 = vcombine.high %v267_v1, %v271_v3 }
  0xf8   :  { %3091 = vmatprep.subr.bf16.mxu1 %v6541_v13  ;;  %v6596_v13 = vcombine.low %v458_v63, %v462_v0  ;;  %v327_v63 = vld [vmem:[%s10218_s1 + $0x8f0] sm:$0xff] }
  0xf9   :  { %3203 = vmatpush1.bf16.msra.mxu0 %v6342_v11  ;;  %v279_v11 = vld [vmem:[%s10218_s1 + $0x770] sm:$0xff] }
  0xfa   :  { %3204 = vmatprep.subr.bf16.mxu0 %v6351_v14  ;;  %v6406_v14 = vcombine.low %v267_v1, %v271_v3  ;;  %v72_v1 = vld [vmem:[%s10218_s1 + $0xf8] sm:$0xff]  ;;  %v7610_v3 = vld [vmem:[%s10219_s0 + $0x4] ss:$28 sps:$4 sm:$0xff]  }
  0xfb   :  { %3092 = vmatpush1.bf16.msra.mxu1 %v6540_v20  ;;  %v6415_v20 = vcombine.high %v275_v9, %v279_v11 }
  0xfc   :  { %3093 = vmatprep.subr.bf16.mxu1 %v6549_v23  ;;  %v6604_v23 = vcombine.low %v466_v7, %v470_v8  ;;  %v331_v7 = vld [vmem:[%s10218_s1 + $0x910] sm:$0xff] }
  0xfd   :  { %3205 = vmatpush1.bf16.msra.mxu0 %v6350_v21  ;;  %v287_v21 = vld [vmem:[%s10218_s1 + $0x7b0] sm:$0xff] }
  0xfe   :  { %3206 = vmatprep.subr.bf16.mxu0 %v6359_v24  ;;  %v6414_v24 = vcombine.low %v275_v9, %v279_v11  ;;  %v6422_v38 = vcombine.low %v283_v19, %v287_v21  ;;  %v335_v8 = vld [vmem:[%s10218_s1 + $0x930] sm:$0xff]  ;;  %v76_v9 = vld [vmem:[%s10218_s1 + $0x118] sm:$0xff] }
  0xff   :  { %3094 = vmatpush1.bf16.msra.mxu1 %v6548_v30  ;;  %v80_v11 = vld [vmem:[%s10218_s1 + $0x138] sm:$0xff] }
 0x100   :  { %3095 = vmatprep.subr.bf16.mxu1 %v6557_v32  ;;  %v295_v32 = vld [vmem:[%s10218_s1 + $0x7f0] sm:$0xff] }
 0x101   :  { %3207 = vmatpush1.bf16.msra.mxu0 %v6358_v31  ;;  %v6423_v31 = vcombine.high %v283_v19, %v287_v21  ;;  %v6431_v43 = vcombine.high %v291_v29, %v295_v32  ;;  %v6430_v46 = vcombine.low %v291_v29, %v295_v32  ;;  %v84_v19 = vld [vmem:[%s10218_s1 + $0x158] sm:$0xff] }
 0x102   :  { %3208 = vmatprep.subr.bf16.mxu0 %v6367_v34  ;;  %v88_v21 = vld [vmem:[%s10218_s1 + $0x178] sm:$0xff] }
 0x103   :  { %3096 = vmatpush1.bf16.msra.mxu1 %v6556_v39  ;;  %v6621_v39 = vcombine.high %v482_v26, %v486_v27  ;;  %v347_v26 = vld [vmem:[%s10218_s1 + $0x990] sm:$0xff]  ;;  %v92_v29 = vld [vmem:[%s10218_s1 + $0x198] sm:$0xff] }
 0x104   :  { %3108 = vmatprep.subr.bf16.mxu1 %v6565_v40  ;;  %v303_v40 = vld [vmem:[%s10218_s1 + $0x830] sm:$0xff]  ;;  %v96_v32 = vld [vmem:[%s10218_s1 + $0x1b8] sm:$0xff] }
 0x105   :  { %3209 = vmatpush1.bf16.msra.mxu0 %v6366_v12  ;;  %v299_v12 = vld [vmem:[%s10218_s1 + $0x810] sm:$0xff] }
 0x106   :  { %3210 = vmatprep.subr.bf16.mxu0 %v6375_v42  ;;  %3098 = vmatmul.mubr.bf16.vlgmr.msra.gmra.mrb[4].mxu1 %v8111_v28  ;;  %v454_v28 = vld [vmem:[%s10218_s1 + $0xce8] sm:$0xff]  ;;  %v44_v42 = vld [vmem:[%s10218_s1 + $0x18] sm:$0xff]  ;;  %v6439_v16 = vcombine.high %v299_v12, %v303_v40  ;;  %v6438_v22 = vcombine.low %v299_v12, %v303_v40  ;;  %v351_v27 = vld [vmem:[%s10218_s1 + $0x9b0] sm:$0xff] }
 0x107   :  { %3109 = vmatpush1.bf16.msra.mxu1 %v6564_v47  ;;  %3140 = vmatprep.mubr.bf16.mxu1 %v7618_v41  ;;  %v6589_v62 = vcombine.high %v450_v54, %v454_v28  ;;  %v6588_v4 = vcombine.low %v450_v54, %v454_v28  ;;  %v6185_v47 = vcombine.high %v44_v42, %v48_v44  ;;  %v60_v54 = vld [vmem:[%s10218_s1 + $0x98] sm:$0xff]  ;;  %v355_v12 = vld [vmem:[%s10218_s1 + $0x9d0] sm:$0xff] }
 0x108   :  { %3110 = vmatprep.subr.bf16.mxu1 %v6573_v49  ;;  %v311_v49 = vld [vmem:[%s10218_s1 + $0x870] sm:$0xff]  ;;  %v6184_v51 = vcombine.low %v44_v42, %v48_v44  ;;  %v100_v42 = vld [vmem:[%s10218_s1 + $0x1d8] sm:$0xff] }
 0x109   :  { %3211 = vmatpush1.bf16.msra.mxu0 %v6374_v48  ;;  %v307_v48 = vld [vmem:[%s10218_s1 + $0x850] sm:$0xff]  ;;  %v104_v44 = vld [vmem:[%s10218_s1 + $0x1f8] sm:$0xff] }
 0x10a   :  { %3212 = vmatprep.subr.bf16.mxu0 %v6383_v50  ;;  %v56_v50 = vld [vmem:[%s10218_s1 + $0x78] sm:$0xff]  ;;  %v6447_v28 = vcombine.high %v307_v48, %v311_v49  ;;  %v359_v40 = vld [vmem:[%s10218_s1 + $0x9f0] sm:$0xff] }
 0x10b   :  { %3111 = vmatpush1.bf16.msra.mxu1 %v6572_v52  ;;  %v6193_v52 = vcombine.high %v52_v59, %v56_v50  ;;  %v6192_v58 = vcombine.low %v52_v59, %v56_v50  ;;  %v108_v59 = vld [vmem:[%s10218_s1 + $0x218] sm:$0xff] }
 0x10c   :  { %3112 = vmatprep.subr.bf16.mxu1 %v6581_v53  ;;  %v319_v53 = vld [vmem:[%s10218_s1 + $0x8b0] sm:$0xff]  ;;  %v112_v50 = vld [vmem:[%s10218_s1 + $0x238] sm:$0xff] }
 0x10d   :  { %3213 = vmatpush1.bf16.msra.mxu0 %v6382_v57  ;;  %v315_v57 = vld [vmem:[%s10218_s1 + $0x890] sm:$0xff] }
 0x10e   :  { %3214 = vmatprep.subr.bf16.mxu0 %v6391_v55  ;;  %v64_v55 = vld [vmem:[%s10218_s1 + $0xb8] sm:$0xff]  ;;  %v6455_v0 = vcombine.high %v315_v57, %v319_v53 }
 0x10f   :  { %3113 = vmatpush1.bf16.msra.mxu1 %v6580_v60  ;;  %v6446_v60 = vcombine.low %v307_v48, %v311_v49  ;;  %v363_v48 = vld [vmem:[%s10218_s1 + $0xa10] sm:$0xff] }
 0x110   :  { %3114 = vmatprep.subr.bf16.mxu1 %v6589_v62  ;;  %v323_v62 = vld [vmem:[%s10218_s1 + $0x8d0] sm:$0xff] }
 0x111   :  { %3215 = vmatpush1.bf16.msra.mxu0 %v6390_v61  ;;  %v6201_v61 = vcombine.high %v60_v54, %v64_v55  ;;  %v367_v49 = vld [vmem:[%s10218_s1 + $0xa30] sm:$0xff] }
 0x112   :  { %3216 = vmatprep.subr.bf16.mxu0 %v6399_v2  ;;  %v7609_v2 = vld [vmem:[%s10219_s0 + $0x14] ss:$28 sps:$4 sm:$0xff]  }
 0x113   :  { %3115 = vmatpush1.bf16.msra.mxu1 %v6588_v4  ;;  %v6200_v4 = vcombine.low %v60_v54, %v64_v55  ;;  %v116_v54 = vld [vmem:[%s10218_s1 + $0x258] sm:$0xff] }
 0x114   :  { %3116 = vmatprep.subr.bf16.mxu1 %v6597_v6  ;;  %v120_v55 = vld [vmem:[%s10218_s1 + $0x278] sm:$0xff] }
 0x115   :  { %3217 = vmatpush1.bf16.msra.mxu0 %v6398_v5  ;;  %v6454_v5 = vcombine.low %v315_v57, %v319_v53  ;;  %v371_v57 = vld [vmem:[%s10218_s1 + $0xa50] sm:$0xff] }
 0x116   :  { %3218 = vmatprep.subr.bf16.mxu0 %v6407_v10  ;;  %v6463_v10 = vcombine.high %v323_v62, %v327_v63  ;;  %v375_v53 = vld [vmem:[%s10218_s1 + $0xa70] sm:$0xff] }
 0x117   :  { %3117 = vmatpush1.bf16.msra.mxu1 %v6596_v13 }
 0x118   :  { %3118 = vmatprep.subr.bf16.mxu1 %v6605_v15  ;;  %v6217_v15 = vcombine.high %v76_v9, %v80_v11 }
 0x119   :  { %3219 = vmatpush1.bf16.msra.mxu0 %v6406_v14  ;;  %v8587_v30 = vpop.f32.mrb[0].mxu1  ;;  %v6462_v14 = vcombine.low %v323_v62, %v327_v63  ;;  %v124_v62 = vld [vmem:[%s10218_s1 + $0x298] sm:$0xff]  ;;  %v6511_v63 = vcombine.high %v371_v57, %v375_v53 }
 0x11a   :  { %3220 = vmatprep.subr.bf16.mxu0 %v6415_v20  ;;  %v8592_v34 = vpop.f32.mrb[1].mxu1  ;;  %v6471_v20 = vcombine.high %v331_v7, %v335_v8 }
 0x11b   :  { %v8594_v35 = vpop.f32.mrb[2].mxu1  ;;  %3119 = vmatpush1.bf16.msra.mxu1 %v6604_v23  ;;  %v6216_v23 = vcombine.low %v76_v9, %v80_v11 }
 0x11c   :  { %v8596_v37 = vpop.f32.mrb[3].mxu1  ;;  %3120 = vmatprep.subr.bf16.mxu1 %v6613_v25  ;;  %v6225_v25 = vcombine.high %v84_v19, %v88_v21 }
 0x11d   :  { %3221 = vmatpush1.bf16.msra.mxu0 %v6414_v24  ;;  %v6470_v24 = vcombine.low %v331_v7, %v335_v8  ;;  %v136_v8 = vld [vmem:[%s10218_s1 + $0x2f8] sm:$0xff] }
 0x11e   :  { %3222 = vmatprep.subr.bf16.mxu0 %v6423_v31  ;;  %v6479_v31 = vcombine.high %v339_v17, %v343_v18 }
 0x11f   :  { %3121 = vmatpush1.bf16.msra.mxu1 %v6612_v36  ;;  %v6224_v36 = vcombine.low %v84_v19, %v88_v21 }
 0x120   :  { %3122 = vmatprep.subr.bf16.mxu1 %v6621_v39  ;;  %v6233_v39 = vcombine.high %v92_v29, %v96_v32 }
 0x121   :  { %3223 = vmatpush1.bf16.msra.mxu0 %v6422_v38  ;;  %v6478_v38 = vcombine.low %v339_v17, %v343_v18  ;;  %v144_v18 = vld [vmem:[%s10218_s1 + $0x338] sm:$0xff] }
 0x122   :  { %3224 = vmatprep.subr.bf16.mxu0 %v6431_v43  ;;  %v6487_v43 = vcombine.high %v347_v26, %v351_v27 }
 0x123   :  { %3123 = vmatpush1.bf16.msra.mxu1 %v6620_v45  ;;  %v6232_v45 = vcombine.low %v92_v29, %v96_v32 }
 0x124   :  { %3323 = vmatprep.subr.bf16.mxu1 %v6185_v47  ;;  %v6241_v47 = vcombine.high %v100_v42, %v104_v44 }
 0x125   :  { %3225 = vmatpush1.bf16.msra.mxu0 %v6430_v46  ;;  %v6486_v46 = vcombine.low %v347_v26, %v351_v27  ;;  %v152_v27 = vld [vmem:[%s10218_s1 + $0x378] sm:$0xff] }
 0x126   :  { %3237 = vmatprep.subr.bf16.mxu0 %v6439_v16  ;;  %3141 = vmatmul.mubr.bf16.vlgmr.msra.gmra.mrb[4].mxu1 %v8216_v33  ;;  %v68_v33 = vld [vmem:[%s10218_s1 + $0xd8] sm:$0xff]  ;;  %v6495_v16 = vcombine.high %v355_v12, %v359_v40 }
 0x127   :  { %3324 = vmatpush1.bf16.msra.mxu1 %v6184_v51  ;;  %3355 = vmatprep.mubr.bf16.mxu1 %v7610_v3  ;;  %v6209_v6 = vcombine.high %v68_v33, %v72_v1  ;;  %v6208_v13 = vcombine.low %v68_v33, %v72_v1  ;;  %v6240_v51 = vcombine.low %v100_v42, %v104_v44  ;;  %v128_v33 = vld [vmem:[%s10218_s1 + $0x2b8] sm:$0xff] }
 0x128   :  { %3227 = vmatmul.mubr.bf16.vlgmr.msra.gmra.mrb[4].mxu0 %v7608_v56  ;;  %3325 = vmatprep.subr.bf16.mxu1 %v6193_v52  ;;  %v6249_v52 = vcombine.high %v108_v59, %v112_v50  ;;  %v6248_v56 = vcombine.low %v108_v59, %v112_v50  ;;  %v6256_v1 = vcombine.low %v116_v54, %v120_v55 }
 0x129   :  { %3238 = vmatpush1.bf16.msra.mxu0 %v6438_v22  ;;  %3269 = vmatprep.mubr.bf16.mxu0 %v7609_v2  ;;  %v6494_v22 = vcombine.low %v355_v12, %v359_v40  ;;  %v6510_v2 = vcombine.low %v371_v57, %v375_v53  ;;  %v6265_v3 = vcombine.high %v124_v62, %v128_v33  ;;  %v160_v40 = vld [vmem:[%s10218_s1 + $0x3b8] sm:$0xff] }
 0x12a   :  { %3239 = vmatprep.subr.bf16.mxu0 %v6447_v28  ;;  %v6503_v28 = vcombine.high %v363_v48, %v367_v49  ;;  %v6264_v9 = vcombine.low %v124_v62, %v128_v33  ;;  %v176_v53 = vld [vmem:[%s10218_s1 + $0x438] sm:$0xff] }
 0x12b   :  { %3326 = vmatpush1.bf16.msra.mxu1 %v6192_v58  ;;  %v6502_v58 = vcombine.low %v363_v48, %v367_v49  ;;  %v168_v49 = vld [vmem:[%s10218_s1 + $0x3f8] sm:$0xff] }
 0x12c   :  { %3327 = vmatprep.subr.bf16.mxu1 %v6201_v61  ;;  %v379_v61 = vld [vmem:[%s10218_s1 + $0xa90] sm:$0xff]  ;;  %v184_v62 = vld [vmem:[%s10218_s1 + $0x478] sm:$0xff] }
 0x12d   :  { %3240 = vmatpush1.bf16.msra.mxu0 %v6446_v60  ;;  %v6257_v60 = vcombine.high %v116_v54, %v120_v55 }
 0x12e   :  { %3241 = vmatprep.subr.bf16.mxu0 %v6455_v0  ;;  %v383_v0 = vld [vmem:[%s10218_s1 + $0xab0] sm:$0xff] }
 0x12f   :  { %3328 = vmatpush1.bf16.msra.mxu1 %v6200_v4  ;;  %v387_v4 = vld [vmem:[%s10218_s1 + $0xad0] sm:$0xff]  ;;  %v6519_v7 = vcombine.high %v379_v61, %v383_v0 }
 0x130   :  { %3329 = vmatprep.subr.bf16.mxu1 %v6209_v6  ;;  %v132_v6 = vld [vmem:[%s10218_s1 + $0x2d8] sm:$0xff] }
 0x131   :  { %3242 = vmatpush1.bf16.msra.mxu0 %v6454_v5  ;;  %v391_v5 = vld [vmem:[%s10218_s1 + $0xaf0] sm:$0xff]  ;;  %v6273_v11 = vcombine.high %v132_v6, %v136_v8  ;;  %v6272_v19 = vcombine.low %v132_v6, %v136_v8  ;;  %v7611_v6 = vld [vmem:[%s10219_s0] ss:$28 sps:$4 sm:$0xff]  }
 0x132   :  { %3243 = vmatprep.subr.bf16.mxu0 %v6463_v10  ;;  %v6518_v10 = vcombine.low %v379_v61, %v383_v0  ;;  %v6527_v17 = vcombine.high %v387_v4, %v391_v5 }
 0x133   :  { %3330 = vmatpush1.bf16.msra.mxu1 %v6208_v13  ;;  %v395_v13 = vld [vmem:[%s10218_s1 + $0xb10] sm:$0xff] }
 0x134   :  { %3331 = vmatprep.subr.bf16.mxu1 %v6217_v15  ;;  %v140_v15 = vld [vmem:[%s10218_s1 + $0x318] sm:$0xff] }
 0x135   :  { %3244 = vmatpush1.bf16.msra.mxu0 %v6462_v14  ;;  %v399_v14 = vld [vmem:[%s10218_s1 + $0xb30] sm:$0xff]  ;;  %v6281_v21 = vcombine.high %v140_v15, %v144_v18  ;;  %v6280_v29 = vcombine.low %v140_v15, %v144_v18  ;;  %v491_v15 = vlaneseq  ;;  %v200_v18 = vld [vmem:[%s10218_s1 + $0x4f8] sm:$0xff] }
 0x136   :  { %3245 = vmatprep.subr.bf16.mxu0 %v6471_v20  ;;  %v6526_v20 = vcombine.low %v387_v4, %v391_v5  ;;  %v6535_v26 = vcombine.high %v395_v13, %v399_v14  ;;  %v192_v5 = vld [vmem:[%s10218_s1 + $0x4b8] sm:$0xff] }
 0x137   :  { %3332 = vmatpush1.bf16.msra.mxu1 %v6216_v23  ;;  %v403_v23 = vld [vmem:[%s10218_s1 + $0xb50] sm:$0xff] }
 0x138   :  { %3333 = vmatprep.subr.bf16.mxu1 %v6225_v25  ;;  %v148_v25 = vld [vmem:[%s10218_s1 + $0x358] sm:$0xff] }
 0x139   :  { %3246 = vmatpush1.bf16.msra.mxu0 %v6470_v24  ;;  %v407_v24 = vld [vmem:[%s10218_s1 + $0xb70] sm:$0xff]  ;;  %v6289_v32 = vcombine.high %v148_v25, %v152_v27  ;;  %v6288_v42 = vcombine.low %v148_v25, %v152_v27  ;;  %v8870_v27 = vshrl.u32 %v491_v15, 7 }
 0x13a   :  { %3247 = vmatprep.subr.bf16.mxu0 %v6479_v31  ;;  %v6534_v31 = vcombine.low %v395_v13, %v399_v14  ;;  %v6543_v12 = vcombine.high %v403_v23, %v407_v24  ;;  %v455_v13 = vld [vmem:[%s10218_s1 + $0xcf0] sm:$0xff]  ;;  %v196_v14 = vld [vmem:[%s10218_s1 + $0x4d8] sm:$0xff] }
 0x13b   :  { %3334 = vmatpush1.bf16.msra.mxu1 %v6224_v36  ;;  %v411_v36 = vld [vmem:[%s10218_s1 + $0xb90] sm:$0xff] }
 0x13c   :  { %3335 = vmatprep.subr.bf16.mxu1 %v6233_v39  ;;  %v156_v39 = vld [vmem:[%s10218_s1 + $0x398] sm:$0xff]  ;;  %v463_v25 = vld [vmem:[%s10218_s1 + $0xd30] sm:$0xff] }
 0x13d   :  { %3248 = vmatpush1.bf16.msra.mxu0 %v6478_v38  ;;  %v415_v38 = vld [vmem:[%s10218_s1 + $0xbb0] sm:$0xff]  ;;  %v6297_v44 = vcombine.high %v156_v39, %v160_v40  ;;  %v6296_v59 = vcombine.low %v156_v39, %v160_v40 }
 0x13e   :  { %3249 = vmatprep.subr.bf16.mxu0 %v6487_v43  ;;  %v6542_v43 = vcombine.low %v403_v23, %v407_v24  ;;  %v6551_v48 = vcombine.high %v411_v36, %v415_v38  ;;  %v6337_v23 = vcombine.high %v196_v14, %v200_v18  ;;  %v459_v24 = vld [vmem:[%s10218_s1 + $0xd10] sm:$0xff] }
 0x13f   :  { %3336 = vmatpush1.bf16.msra.mxu1 %v6232_v45  ;;  %v419_v45 = vld [vmem:[%s10218_s1 + $0xbd0] sm:$0xff] }
 0x140   :  { %3337 = vmatprep.subr.bf16.mxu1 %v6241_v47  ;;  %v164_v47 = vld [vmem:[%s10218_s1 + $0x3d8] sm:$0xff]  ;;  %v471_v40 = vld [vmem:[%s10218_s1 + $0xd70] sm:$0xff] }
 0x141   :  { %3250 = vmatpush1.bf16.msra.mxu0 %v6486_v46  ;;  %v423_v46 = vld [vmem:[%s10218_s1 + $0xbf0] sm:$0xff]  ;;  %v6305_v50 = vcombine.high %v164_v47, %v168_v49  ;;  %v6304_v54 = vcombine.low %v164_v47, %v168_v49 }
 0x142   :  { %3251 = vmatprep.subr.bf16.mxu0 %v6495_v16  ;;  %v6550_v16 = vcombine.low %v411_v36, %v415_v38  ;;  %v6559_v57 = vcombine.high %v419_v45, %v423_v46  ;;  %v8878_v36 = vld [vmem:[%s10221_s2] sm:$0xff] }
 0x143   :  { %3338 = vmatpush1.bf16.msra.mxu1 %v6240_v51  ;;  %v427_v51 = vld [vmem:[%s10218_s1 + $0xc10] sm:$0xff] }
 0x144   :  { %3339 = vmatprep.subr.bf16.mxu1 %v6249_v52  ;;  %v172_v52 = vld [vmem:[%s10218_s1 + $0x418] sm:$0xff] }
 0x145   :  { %3252 = vmatpush1.bf16.msra.mxu0 %v6494_v22  ;;  %v431_v22 = vld [vmem:[%s10218_s1 + $0xc30] sm:$0xff]  ;;  %v6313_v55 = vcombine.high %v172_v52, %v176_v53 }
 0x146   :  { %3253 = vmatprep.subr.bf16.mxu0 %v6503_v28  ;;  %v6558_v28 = vcombine.low %v419_v45, %v423_v46  ;;  %v6567_v61 = vcombine.high %v427_v51, %v431_v22  ;;  %v6566_v33 = vcombine.low %v427_v51, %v431_v22  ;;  %v216_v45 = vld [vmem:[%s10218_s1 + $0x578] sm:$0xff]  ;;  %v8896_v46 = vsub.s32 1, %v8870_v27 }
 0x147   :  { %3340 = vmatpush1.bf16.msra.mxu1 %v6248_v56  ;;  %v435_v56 = vld [vmem:[%s10218_s1 + $0xc50] sm:$0xff] }
 0x148   :  { %3341 = vmatprep.subr.bf16.mxu1 %v6257_v60  ;;  %v180_v60 = vld [vmem:[%s10218_s1 + $0x458] sm:$0xff] }
 0x149   :  { %3254 = vmatpush1.bf16.msra.mxu0 %v6502_v58  ;;  %v439_v58 = vld [vmem:[%s10218_s1 + $0xc70] sm:$0xff]  ;;  %v6321_v0 = vcombine.high %v180_v60, %v184_v62  ;;  %v6320_v8 = vcombine.low %v180_v60, %v184_v62 }
 0x14a   :  { %3255 = vmatprep.subr.bf16.mxu0 %v6511_v63  ;;  %v6312_v63 = vcombine.low %v172_v52, %v176_v53  ;;  %v6575_v4 = vcombine.high %v435_v56, %v439_v58  ;;  %v224_v52 = vld [vmem:[%s10218_s1 + $0x5b8] sm:$0xff] }
 0x14b   :  { %3342 = vmatpush1.bf16.msra.mxu1 %v6256_v1  ;;  %v443_v1 = vld [vmem:[%s10218_s1 + $0xc90] sm:$0xff] }
 0x14c   :  { %3343 = vmatprep.subr.bf16.mxu1 %v6265_v3  ;;  %v188_v3 = vld [vmem:[%s10218_s1 + $0x498] sm:$0xff] }
 0x14d   :  { %3256 = vmatpush1.bf16.msra.mxu0 %v6510_v2  ;;  %v447_v2 = vld [vmem:[%s10218_s1 + $0xcb0] sm:$0xff] }
 0x14e   :  { %3257 = vmatprep.subr.bf16.mxu0 %v6519_v7  ;;  %v8842_v7 = vld [vmem:[%s10219_s0 + $0x10] ss:$28 sps:$4 sm:$0xff]  }
 0x14f   :  { %3344 = vmatpush1.bf16.msra.mxu1 %v6264_v9  ;;  %v6574_v9 = vcombine.low %v435_v56, %v439_v58  ;;  %v228_v56 = vld [vmem:[%s10218_s1 + $0x5d8] sm:$0xff] }
 0x150   :  { %3345 = vmatprep.subr.bf16.mxu1 %v6273_v11  ;;  %v451_v11 = vld [vmem:[%s10218_s1 + $0xcd0] sm:$0xff] }
 0x151   :  { %3258 = vmatpush1.bf16.msra.mxu0 %v6518_v10  ;;  %v6329_v10 = vcombine.high %v188_v3, %v192_v5  ;;  %v6590_v38 = vcombine.low %v451_v11, %v455_v13 }
 0x152   :  { %3259 = vmatprep.subr.bf16.mxu0 %v6527_v17  ;;  %v6583_v17 = vcombine.high %v443_v1, %v447_v2 }
 0x153   :  { %3346 = vmatpush1.bf16.msra.mxu1 %v6272_v19  ;;  %v7613_v19 = vld [vmem:[%s10219_s0 + $0xc] ss:$28 sps:$4 sm:$0xff]  }
 0x154   :  { %3347 = vmatprep.subr.bf16.mxu1 %v6281_v21  ;;  %v6582_v21 = vcombine.low %v443_v1, %v447_v2 }
 0x155   :  { %3260 = vmatpush1.bf16.msra.mxu0 %v6526_v20  ;;  %v6328_v20 = vcombine.low %v188_v3, %v192_v5 }
 0x156   :  { %3261 = vmatprep.subr.bf16.mxu0 %v6535_v26  ;;  %v204_v26 = vld [vmem:[%s10218_s1 + $0x518] sm:$0xff] }
 0x157   :  { %3348 = vmatpush1.bf16.msra.mxu1 %v6280_v29  ;;  %v6591_v29 = vcombine.high %v451_v11, %v455_v13  ;;  %v240_v13 = vld [vmem:[%s10218_s1 + $0x638] sm:$0xff] }
 0x158   :  { %3349 = vmatprep.subr.bf16.mxu1 %v6289_v32  ;;  %v6336_v32 = vcombine.low %v196_v14, %v200_v18 }
 0x159   :  { %3262 = vmatpush1.bf16.msra.mxu0 %v6534_v31  ;;  %v208_v31 = vld [vmem:[%s10218_s1 + $0x538] sm:$0xff] }
 0x15a   :  { %3263 = vmatprep.subr.bf16.mxu0 %v6543_v12  ;;  %v6345_v39 = vcombine.high %v204_v26, %v208_v31  ;;  %v467_v12 = vld [vmem:[%s10218_s1 + $0xd50] sm:$0xff]  ;;  %v6344_v47 = vcombine.low %v204_v26, %v208_v31  ;;  %v248_v26 = vld [vmem:[%s10218_s1 + $0x678] sm:$0xff] }
 0x15b   :  { %3350 = vmatpush1.bf16.msra.mxu1 %v6288_v42  ;;  %v212_v42 = vld [vmem:[%s10218_s1 + $0x558] sm:$0xff]  ;;  %v6607_v22 = vcombine.high %v467_v12, %v471_v40  ;;  %v7102_v31 = vld [vmem:[%s10220_s3] ss:$16 sps:$4 sm:$0xff]  }
 0x15c   :  { %3351 = vmatprep.subr.bf16.mxu1 %v6297_v44  ;;  %v6599_v44 = vcombine.high %v459_v24, %v463_v25  ;;  %v6353_v49 = vcombine.high %v212_v42, %v216_v45  ;;  %v6352_v53 = vcombine.low %v212_v42, %v216_v45  ;;  %v256_v45 = vld [vmem:[%s10218_s1 + $0x6b8] sm:$0xff] }
 0x15d   :  { %3264 = vmatpush1.bf16.msra.mxu0 %v6542_v43  ;;  %v8890_v43 = vsub.s32 0, %v8870_v27 }
 0x15e   :  { %3265 = vmatprep.subr.bf16.mxu0 %v6551_v48  ;;  %v6598_v48 = vcombine.low %v459_v24, %v463_v25  ;;  %v244_v25 = vld [vmem:[%s10218_s1 + $0x658] sm:$0xff] }
 0x15f   :  { %3352 = vmatpush1.bf16.msra.mxu1 %v6296_v59  ;;  %v475_v59 = vld [vmem:[%s10218_s1 + $0xd90] sm:$0xff]  ;;  %v494_v51 = vrot.slane %v8878_v36, %v8890_v43  ;;  %v6385_v42 = vcombine.high %v244_v25, %v248_v26 }
 0x160   :  { %3353 = vmatprep.subr.bf16.mxu1 %v6305_v50  ;;  %v220_v50 = vld [vmem:[%s10218_s1 + $0x598] sm:$0xff] }
 0x161   :  { %3266 = vmatpush1.bf16.msra.mxu0 %v6550_v16  ;;  %v479_v16 = vld [vmem:[%s10218_s1 + $0xdb0] sm:$0xff]  ;;  %v2842_v58 = vadd.f32 %v8587_v30, %v494_v51  ;;  %v6360_v30 = vcombine.low %v220_v50, %v224_v52 }
 0x162   :  { %3267 = vmatprep.subr.bf16.mxu0 %v6559_v57  ;;  %v498_v57 = vrot.slane %v8878_v36, %v8896_v46  ;;  %v6615_v60 = vcombine.high %v475_v59, %v479_v16  ;;  %v6614_v3 = vcombine.low %v475_v59, %v479_v16  ;;  %v7110_v16 = vld [vmem:[%s10220_s3 + $0x44] ss:$16 sps:$4 sm:$0xff]  }
 0x163   :  { %3354 = vmatpush1.bf16.msra.mxu1 %v6304_v54  ;;  %v6606_v54 = vcombine.low %v467_v12, %v471_v40  ;;  %v7107_v40 = vld [vmem:[%s10220_s3 + $0x24] ss:$16 sps:$4 sm:$0xff]  }
 0x164   :  { %3366 = vmatprep.subr.bf16.mxu1 %v6313_v55  ;;  %v483_v55 = vld [vmem:[%s10218_s1 + $0xdd0] sm:$0xff]  ;;  %v2844_v62 = vadd.f32 %v8592_v34, %v498_v57 }
 0x165   :  { %3268 = vmatpush1.bf16.msra.mxu0 %v6558_v28  ;;  %v6361_v28 = vcombine.high %v220_v50, %v224_v52  ;;  %v260_v50 = vld [vmem:[%s10218_s1 + $0x6d8] sm:$0xff]  ;;  %v7108_v52 = vld [vmem:[%s10220_s3 + $0x40] ss:$16 sps:$4 sm:$0xff]  }
 0x166   :  { %3280 = vmatprep.subr.bf16.mxu0 %v6567_v61  ;;  %3356 = vmatmul.mubr.bf16.vlgmr.msra.gmra.mrb[8].mxu1 %v7611_v6  ;;  %v232_v61 = vld [vmem:[%s10218_s1 + $0x5f8] sm:$0xff] }
 0x167   :  { %3367 = vmatpush1.bf16.msra.mxu1 %v6312_v63  ;;  %3398 = vmatprep.mubr.bf16.mxu1 %v7613_v19 }
 0x168   :  { %3270 = vmatmul.mubr.bf16.vlgmr.msra.gmra.mrb[4].mxu0 %v8842_v7  ;;  %3368 = vmatprep.subr.bf16.mxu1 %v6321_v0  ;;  %v2846_v0 = vadd.f32 %v8594_v35, %v494_v51  ;;  %v236_v35 = vld [vmem:[%s10218_s1 + $0x618] sm:$0xff] }
 0x169   :  { %3281 = vmatpush1.bf16.msra.mxu0 %v6566_v33  ;;  %3312 = vmatprep.mubr.bf16.mxu0 %v7618_v41  ;;  %v487_v33 = vld [vmem:[%s10218_s1 + $0xdf0] sm:$0xff]  ;;  %v264_v51 = vld [vmem:[%s10218_s1 + $0x6f8] sm:$0xff] }
 0x16a   :  { %3282 = vmatprep.subr.bf16.mxu0 %v6575_v4  ;;  %v2848_v4 = vadd.f32 %v8596_v37, %v498_v57  ;;  %v6623_v11 = vcombine.high %v483_v55, %v487_v33  ;;  %v6622_v19 = vcombine.low %v483_v55, %v487_v33  ;;  %v6401_v57 = vcombine.high %v260_v50, %v264_v51  ;;  %v7114_v33 = vld [vmem:[%s10220_s3 + $0x80] ss:$16 sps:$4 sm:$0xff]  }
 0x16b   :  { %3369 = vmatpush1.bf16.msra.mxu1 %v6320_v8  ;;  %v6369_v8 = vcombine.high %v228_v56, %v232_v61  ;;  %v6400_v55 = vcombine.low %v260_v50, %v264_v51  ;;  %v7137_v50 = vld [vmem:[%s10220_s3 + $0x164] ss:$16 sps:$4 sm:$0xff]   ;;  %v332_v51 = vld [vmem:[%s10218_s1 + $0x918] sm:$0xff] }
 0x16c   :  { %3370 = vmatprep.subr.bf16.mxu1 %v6329_v10 }
 0x16d   :  { %3283 = vmatpush1.bf16.msra.mxu0 %v6574_v9 }
 0x16e   :  { %3284 = vmatprep.subr.bf16.mxu0 %v6583_v17  ;;  %v6368_v17 = vcombine.low %v228_v56, %v232_v61  ;;  %v7111_v56 = vld [vmem:[%s10220_s3 + $0x60] ss:$16 sps:$4 sm:$0xff]   ;;  %v276_v61 = vld [vmem:[%s10218_s1 + $0x758] sm:$0xff] }
 0x16f   :  { %3371 = vmatpush1.bf16.msra.mxu1 %v6328_v20  ;;  %v6377_v20 = vcombine.high %v236_v35, %v240_v13 }
 0x170   :  { %3372 = vmatprep.subr.bf16.mxu1 %v6337_v23 }
 0x171   :  { %3285 = vmatpush1.bf16.msra.mxu0 %v6582_v21  ;;  %v7104_v21 = vld [vmem:[%s10220_s3 + $0x4] ss:$16 sps:$4 sm:$0xff]  }
 0x172   :  { %3286 = vmatprep.subr.bf16.mxu0 %v6591_v29 }
 0x173   :  { %3373 = vmatpush1.bf16.msra.mxu1 %v6336_v32 }
 0x174   :  { %3374 = vmatprep.subr.bf16.mxu1 %v6345_v39  ;;  %v6376_v39 = vcombine.low %v236_v35, %v240_v13  ;;  %v7125_v35 = vld [vmem:[%s10220_s3 + $0xe4] ss:$16 sps:$4 sm:$0xff]   ;;  %v300_v13 = vld [vmem:[%s10218_s1 + $0x818] sm:$0xff] }
 0x175   :  { %3287 = vmatpush1.bf16.msra.mxu0 %v6590_v38 }
 0x176   :  { %3288 = vmatprep.subr.bf16.mxu0 %v6599_v44  ;;  %v252_v44 = vld [vmem:[%s10218_s1 + $0x698] sm:$0xff] }
 0x177   :  { %3375 = vmatpush1.bf16.msra.mxu1 %v6344_v47  ;;  %v8965_v47 = vld [vmem:[%s10219_s0 + $0x18] ss:$28 sps:$4 sm:$0xff]   ;;  %v6393_v59 = vcombine.high %v252_v44, %v256_v45 }
 0x178   :  { %3376 = vmatprep.subr.bf16.mxu1 %v6353_v49  ;;  %v7105_v49 = vld [vmem:[%s10220_s3 + $0x20] ss:$16 sps:$4 sm:$0xff]  }
 0x179   :  { %3289 = vmatpush1.bf16.msra.mxu0 %v6598_v48  ;;  %v6384_v48 = vcombine.low %v244_v25, %v248_v26  ;;  %v7131_v25 = vld [vmem:[%s10220_s3 + $0x124] ss:$16 sps:$4 sm:$0xff]   ;;  %v316_v26 = vld [vmem:[%s10218_s1 + $0x898] sm:$0xff] }
 0x17a   :  { %3290 = vmatprep.subr.bf16.mxu0 %v6607_v22  ;;  %v6392_v22 = vcombine.low %v252_v44, %v256_v45  ;;  %v7134_v44 = vld [vmem:[%s10220_s3 + $0x144] ss:$16 sps:$4 sm:$0xff]   ;;  %v324_v45 = vld [vmem:[%s10218_s1 + $0x8d8] sm:$0xff] }
 0x17b   :  { %v2970_v63 = vpop.f32.mrb[0].mxu0  ;;  %3377 = vmatpush1.bf16.msra.mxu1 %v6352_v53  ;;  %v7113_v53 = vld [vmem:[%s10220_s3 + $0x64] ss:$16 sps:$4 sm:$0xff]  }
 0x17c   :  { %v6988_v1 = vadd.f32 %v2970_v63, %v2842_v58  ;;  %v2972_v2 = vpop.f32.mrb[1].mxu0  ;;  %3378 = vmatprep.subr.bf16.mxu1 %v6361_v28  ;;  %v272_v28 = vld [vmem:[%s10218_s1 + $0x738] sm:$0xff] }
 0x17d   :  { %v6990_v5 = vadd.f32 %v2972_v2, %v2844_v62  ;;  %v2974_v6 = vpop.f32.mrb[2].mxu0  ;;  %3291 = vmatpush1.bf16.msra.mxu0 %v6606_v54  ;;  %v268_v54 = vld [vmem:[%s10218_s1 + $0x718] sm:$0xff] }
 0x17e   :  { %v3511_v34 = vmul.f32 0.2, %v6988_v1  ;;  %v6992_v9 = vadd.f32 %v2974_v6, %v2846_v0  ;;  %v2976_v10 = vpop.f32.mrb[3].mxu0  ;;  %3292 = vmatprep.subr.bf16.mxu0 %v6615_v60  ;;  %vm3495_vm0 = vcmp.gt.f32.partialorder %v6988_v1, 0.0  ;;  %v6409_v58 = vcombine.high %v268_v54, %v272_v28  ;;  %v7116_v60 = vld [vmem:[%s10220_s3 + $0x84] ss:$16 sps:$4 sm:$0xff]  }
 0x17f   :  { %vm3496_vm1 = vcmp.gt.f32.partialorder %v6990_v5, 0.0  ;;  %v3512_v37 = vmul.f32 0.2, %v6990_v5  ;;  %v6994_v14 = vadd.f32 %v2976_v10, %v2848_v4  ;;  %3379 = vmatpush1.bf16.msra.mxu1 %v6360_v30  ;;  %v280_v62 = vld [vmem:[%s10218_s1 + $0x778] sm:$0xff]  ;;  %v6408_v63 = vcombine.low %v268_v54, %v272_v28  ;;  %v7117_v4 = vld [vmem:[%s10220_s3 + $0xa0] ss:$16 sps:$4 sm:$0xff]  }
 0x180   :  { %vm3503_vm2 = vcmp.gt.f32.partialorder %v6992_v9, 0.0  ;;  %v3519_v15 = vmul.f32 0.2, %v6992_v9  ;;  %3380 = vmatprep.subr.bf16.mxu1 %v6369_v8  ;;  %v3527_v23 = vsel %vm3495_vm0, %v6988_v1, %v3511_v34  ;;  %v6417_v0 = vcombine.high %v276_v61, %v280_v62  ;;  %v7119_v1 = vld [vmem:[%s10220_s3 + $0xa4] ss:$16 sps:$4 sm:$0xff]   ;;  %v284_v2 = vld [vmem:[%s10218_s1 + $0x798] sm:$0xff] }
 0x181   :  { %vm3504_vm3 = vcmp.gt.f32.partialorder %v6994_v14, 0.0  ;;  %v3520_v18 = vmul.f32 0.2, %v6994_v14  ;;  %3293 = vmatpush1.bf16.msra.mxu0 %v6614_v3  ;;  %v3528_v32 = vsel %vm3496_vm1, %v6990_v5, %v3512_v37  ;;  %v288_v3 = vld [vmem:[%s10218_s1 + $0x7b8] sm:$0xff]  ;;  %v6416_v30 = vcombine.low %v276_v61, %v280_v62  ;;  %v7122_v6 = vld [vmem:[%s10220_s3 + $0xc4] ss:$16 sps:$4 sm:$0xff]  }
 0x182   :  { %v3535_v24 = vsel %vm3503_vm2, %v6992_v9, %v3519_v15  ;;  %3294 = vmatprep.subr.bf16.mxu0 %v6623_v11  ;;  %v6425_v5 = vcombine.high %v284_v2, %v288_v3  ;;  %v292_v8 = vld [vmem:[%s10218_s1 + $0x7d8] sm:$0xff]  ;;  %v6424_v9 = vcombine.low %v284_v2, %v288_v3  ;;  %v7120_v10 = vld [vmem:[%s10220_s3 + $0xc0] ss:$16 sps:$4 sm:$0xff]   ;;  %v7140_v54 = vld [vmem:[%s10220_s3 + $0x184] ss:$16 sps:$4 sm:$0xff]  }
 0x183   :  { %v8945_v29 = vpack.c.bf16 %v3535_v24, %v3527_v23  ;;  %v3536_v38 = vsel %vm3504_vm3, %v6994_v14, %v3520_v18  ;;  %3381 = vmatpush1.bf16.msra.mxu1 %v6368_v17  ;;  %v296_v34 = vld [vmem:[%s10218_s1 + $0x7f8] sm:$0xff]  ;;  %v7123_v15 = vld [vmem:[%s10220_s3 + $0xe0] ss:$16 sps:$4 sm:$0xff]   ;;  %v7128_v18 = vld [vmem:[%s10220_s3 + $0x104] ss:$16 sps:$4 sm:$0xff]  }
 0x184   :  { %v8951_v12 = vpack.c.bf16 %v3536_v38, %v3528_v32  ;;  %3382 = vmatprep.subr.bf16.mxu1 %v6377_v20  ;;  %v6433_v11 = vcombine.high %v292_v8, %v296_v34  ;;  %v304_v37 = vld [vmem:[%s10218_s1 + $0x838] sm:$0xff]  ;;  %v6432_v14 = vcombine.low %v292_v8, %v296_v34  ;;  %v7126_v23 = vld [vmem:[%s10220_s3 + $0x100] ss:$16 sps:$4 sm:$0xff]   ;;  %v7615_v32 = vld [vmem:[%s10219_s0 + $0x8] ss:$28 sps:$4 sm:$0xff]  }
 0x185   :  { %3295 = vmatpush1.bf16.msra.mxu0 %v6622_v19  ;;  %v6441_v17 = vcombine.high %v300_v13, %v304_v37  ;;  %v308_v19 = vld [vmem:[%s10218_s1 + $0x858] sm:$0xff]  ;;  %v7143_v61 = vld [vmem:[%s10220_s3 + $0x1a4] ss:$16 sps:$4 sm:$0xff]  }
 0x186   :  { %5109 = vmatprep.subr.bf16.mxu0 %v7104_v21  ;;  %v312_v20 = vld [vmem:[%s10218_s1 + $0x878] sm:$0xff]  ;;  %v6440_v21 = vcombine.low %v300_v13, %v304_v37  ;;  %v7146_v2 = vld [vmem:[%s10220_s3 + $0x1c4] ss:$16 sps:$4 sm:$0xff]  }
 0x187   :  { %3383 = vmatpush1.bf16.msra.mxu1 %v6376_v39  ;;  %v6449_v24 = vcombine.high %v308_v19, %v312_v20  ;;  %v6448_v38 = vcombine.low %v308_v19, %v312_v20  ;;  %v7616_v39 = vld [vmem:[%s10219_s0 + $0x14] ss:$28 sps:$4 sm:$0xff]   ;;  %v340_v28 = vld [vmem:[%s10218_s1 + $0x958] sm:$0xff] }
 0x188   :  { %3313 = vmatmul.mubr.bf16.vlgmr.msra.gmra.mrb[4].mxu0 %v8965_v47  ;;  %3384 = vmatprep.subr.bf16.mxu1 %v6385_v42  ;;  %v348_v62 = vld [vmem:[%s10218_s1 + $0x998] sm:$0xff]  ;;  %v7149_v8 = vld [vmem:[%s10220_s3 + $0x1e4] ss:$16 sps:$4 sm:$0xff]  }
 0x189   :  { %5110 = vmatpush1.bf16.msra.mxu0 %v7102_v31  ;;  %5141 = vmatprep.mubr.bf16.mxu0 %v8951_v12  ;;  %v320_v31 = vld [vmem:[%s10218_s1 + $0x8b8] sm:$0xff]  ;;  %v7152_v13 = vld [vmem:[%s10220_s3 + $0x204] ss:$16 sps:$4 sm:$0xff]  }
 0x18a   :  { %5111 = vmatprep.subr.bf16.mxu0 %v7107_v40  ;;  %v7129_v40 = vld [vmem:[%s10220_s3 + $0x120] ss:$16 sps:$4 sm:$0xff]   ;;  %v6457_v42 = vcombine.high %v316_v26, %v320_v31  ;;  %v356_v3 = vld [vmem:[%s10218_s1 + $0x9d8] sm:$0xff]  ;;  %v7155_v19 = vld [vmem:[%s10220_s3 + $0x224] ss:$16 sps:$4 sm:$0xff]  }
 0x18b   :  { %3385 = vmatpush1.bf16.msra.mxu1 %v6384_v48  ;;  %v328_v48 = vld [vmem:[%s10218_s1 + $0x8f8] sm:$0xff] }
 0x18c   :  { %3386 = vmatprep.subr.bf16.mxu1 %v6393_v59  ;;  %v7132_v59 = vld [vmem:[%s10220_s3 + $0x140] ss:$16 sps:$4 sm:$0xff]   ;;  %v364_v34 = vld [vmem:[%s10218_s1 + $0xa18] sm:$0xff] }
 0x18d   :  { %5112 = vmatpush1.bf16.msra.mxu0 %v7105_v49  ;;  %v6456_v49 = vcombine.low %v316_v26, %v320_v31  ;;  %v372_v37 = vld [vmem:[%s10218_s1 + $0xa58] sm:$0xff]  ;;  %v7158_v26 = vld [vmem:[%s10220_s3 + $0x244] ss:$16 sps:$4 sm:$0xff]  }
 0x18e   :  { %5113 = vmatprep.subr.bf16.mxu0 %v7110_v16  ;;  %v6465_v16 = vcombine.high %v324_v45, %v328_v48  ;;  %v380_v20 = vld [vmem:[%s10218_s1 + $0xa98] sm:$0xff] }
 0x18f   :  { %3387 = vmatpush1.bf16.msra.mxu1 %v6392_v22  ;;  %v336_v22 = vld [vmem:[%s10218_s1 + $0x938] sm:$0xff] }
 0x190   :  { %3388 = vmatprep.subr.bf16.mxu1 %v6401_v57  ;;  %v7135_v57 = vld [vmem:[%s10220_s3 + $0x160] ss:$16 sps:$4 sm:$0xff]   ;;  %v388_v31 = vld [vmem:[%s10218_s1 + $0xad8] sm:$0xff] }
 0x191   :  { %5114 = vmatpush1.bf16.msra.mxu0 %v7108_v52  ;;  %v6464_v52 = vcombine.low %v324_v45, %v328_v48  ;;  %v400_v45 = vld [vmem:[%s10218_s1 + $0xb38] sm:$0xff] }
 0x192   :  { %5115 = vmatprep.subr.bf16.mxu0 %v7113_v53  ;;  %v6473_v53 = vcombine.high %v332_v51, %v336_v22 }
 0x193   :  { %3389 = vmatpush1.bf16.msra.mxu1 %v6400_v55  ;;  %v344_v55 = vld [vmem:[%s10218_s1 + $0x978] sm:$0xff] }
 0x194   :  { %3390 = vmatprep.subr.bf16.mxu1 %v6409_v58  ;;  %v7138_v58 = vld [vmem:[%s10220_s3 + $0x180] ss:$16 sps:$4 sm:$0xff]  }
 0x195   :  { %5116 = vmatpush1.bf16.msra.mxu0 %v7111_v56  ;;  %v6472_v56 = vcombine.low %v332_v51, %v336_v22  ;;  %v408_v51 = vld [vmem:[%s10218_s1 + $0xb78] sm:$0xff] }
 0x196   :  { %5117 = vmatprep.subr.bf16.mxu0 %v7116_v60  ;;  %v6481_v60 = vcombine.high %v340_v28, %v344_v55 }
 0x197   :  { %3391 = vmatpush1.bf16.msra.mxu1 %v6408_v63  ;;  %v352_v63 = vld [vmem:[%s10218_s1 + $0x9b8] sm:$0xff] }
 0x198   :  { %3392 = vmatprep.subr.bf16.mxu1 %v6417_v0  ;;  %v7141_v0 = vld [vmem:[%s10220_s3 + $0x1a0] ss:$16 sps:$4 sm:$0xff]  }
 0x199   :  { %5118 = vmatpush1.bf16.msra.mxu0 %v7114_v33  ;;  %v6480_v33 = vcombine.low %v340_v28, %v344_v55  ;;  %v416_v28 = vld [vmem:[%s10218_s1 + $0xbb8] sm:$0xff] }
 0x19a   :  { %5119 = vmatprep.subr.bf16.mxu0 %v7119_v1  ;;  %v6489_v1 = vcombine.high %v348_v62, %v352_v63 }
 0x19b   :  { %3393 = vmatpush1.bf16.msra.mxu1 %v6416_v30  ;;  %v360_v30 = vld [vmem:[%s10218_s1 + $0x9f8] sm:$0xff] }
 0x19c   :  { %3394 = vmatprep.subr.bf16.mxu1 %v6425_v5  ;;  %v7144_v5 = vld [vmem:[%s10220_s3 + $0x1c0] ss:$16 sps:$4 sm:$0xff]  }
 0x19d   :  { %5120 = vmatpush1.bf16.msra.mxu0 %v7117_v4  ;;  %v6488_v4 = vcombine.low %v348_v62, %v352_v63  ;;  %v424_v62 = vld [vmem:[%s10218_s1 + $0xbf8] sm:$0xff] }
 0x19e   :  { %5121 = vmatprep.subr.bf16.mxu0 %v7122_v6  ;;  %v6497_v6 = vcombine.high %v356_v3, %v360_v30 }
 0x19f   :  { %3395 = vmatpush1.bf16.msra.mxu1 %v6424_v9  ;;  %v368_v9 = vld [vmem:[%s10218_s1 + $0xa38] sm:$0xff] }
 0x1a0   :  { %3396 = vmatprep.subr.bf16.mxu1 %v6433_v11  ;;  %v7147_v11 = vld [vmem:[%s10220_s3 + $0x1e0] ss:$16 sps:$4 sm:$0xff]  }
 0x1a1   :  { %5122 = vmatpush1.bf16.msra.mxu0 %v7120_v10  ;;  %v6496_v10 = vcombine.low %v356_v3, %v360_v30  ;;  %v432_v3 = vld [vmem:[%s10218_s1 + $0xc38] sm:$0xff] }
 0x1a2   :  { %5123 = vmatprep.subr.bf16.mxu0 %v7125_v35  ;;  %v6505_v35 = vcombine.high %v364_v34, %v368_v9 }
 0x1a3   :  { %3397 = vmatpush1.bf16.msra.mxu1 %v6432_v14  ;;  %v376_v14 = vld [vmem:[%s10218_s1 + $0xa78] sm:$0xff] }
 0x1a4   :  { %3409 = vmatprep.subr.bf16.mxu1 %v6441_v17  ;;  %v7150_v17 = vld [vmem:[%s10220_s3 + $0x200] ss:$16 sps:$4 sm:$0xff]  }
 0x1a5   :  { %5124 = vmatpush1.bf16.msra.mxu0 %v7123_v15  ;;  %v6504_v15 = vcombine.low %v364_v34, %v368_v9  ;;  %v440_v34 = vld [vmem:[%s10218_s1 + $0xc78] sm:$0xff] }
 0x1a6   :  { %5125 = vmatprep.subr.bf16.mxu0 %v7128_v18  ;;  %3399 = vmatmul.mubr.bf16.vlgmr.msra.gmra.mrb[8].mxu1 %v7615_v32  ;;  %v6513_v18 = vcombine.high %v372_v37, %v376_v14  ;;  %v392_v32 = vld [vmem:[%s10218_s1 + $0xaf8] sm:$0xff] }
 0x1a7   :  { %3410 = vmatpush1.bf16.msra.mxu1 %v6440_v21  ;;  %3441 = vmatprep.mubr.bf16.mxu1 %v7616_v39  ;;  %v384_v21 = vld [vmem:[%s10218_s1 + $0xab8] sm:$0xff]  ;;  %v7156_v39 = vld [vmem:[%s10220_s3 + $0x240] ss:$16 sps:$4 sm:$0xff]   ;;  %v6528_v48 = vcombine.low %v388_v31, %v392_v32 }
 0x1a8   :  { %3411 = vmatprep.subr.bf16.mxu1 %v6449_v24  ;;  %v7153_v24 = vld [vmem:[%s10220_s3 + $0x220] ss:$16 sps:$4 sm:$0xff]  }
 0x1a9   :  { %5126 = vmatpush1.bf16.msra.mxu0 %v7126_v23  ;;  %v6512_v23 = vcombine.low %v372_v37, %v376_v14  ;;  %v448_v37 = vld [vmem:[%s10218_s1 + $0xcb8] sm:$0xff] }
 0x1aa   :  { %5127 = vmatprep.subr.bf16.mxu0 %v7131_v25  ;;  %v6521_v25 = vcombine.high %v380_v20, %v384_v21 }
 0x1ab   :  { %3412 = vmatpush1.bf16.msra.mxu1 %v6448_v38  ;;  %v6520_v38 = vcombine.low %v380_v20, %v384_v21  ;;  %v7180_v20 = vld [vmem:[%s10220_s3 + $0x340] ss:$16 sps:$4 sm:$0xff]  }
 0x1ac   :  { %3413 = vmatprep.subr.bf16.mxu1 %v6457_v42  ;;  %v7161_v42 = vld [vmem:[%s10220_s3 + $0x264] ss:$16 sps:$4 sm:$0xff]  }
 0x1ad   :  { %5128 = vmatpush1.bf16.msra.mxu0 %v7129_v40  ;;  %v6529_v40 = vcombine.high %v388_v31, %v392_v32  ;;  %v7183_v31 = vld [vmem:[%s10220_s3 + $0x360] ss:$16 sps:$4 sm:$0xff]  }
 0x1ae   :  { %5129 = vmatprep.subr.bf16.mxu0 %v7134_v44  ;;  %v396_v44 = vld [vmem:[%s10218_s1 + $0xb18] sm:$0xff] }
 0x1af   :  { %3414 = vmatpush1.bf16.msra.mxu1 %v6456_v49  ;;  %v7159_v49 = vld [vmem:[%s10220_s3 + $0x260] ss:$16 sps:$4 sm:$0xff]   ;;  %v6536_v22 = vcombine.low %v396_v44, %v400_v45 }
 0x1b0   :  { %3415 = vmatprep.subr.bf16.mxu1 %v6465_v16  ;;  %v7164_v16 = vld [vmem:[%s10220_s3 + $0x284] ss:$16 sps:$4 sm:$0xff]  }
 0x1b1   :  { %5130 = vmatpush1.bf16.msra.mxu0 %v7132_v59  ;;  %v6537_v59 = vcombine.high %v396_v44, %v400_v45  ;;  %v505_v45 = vsub.s32 3, %v8870_v27 }
 0x1b2   :  { %5131 = vmatprep.subr.bf16.mxu0 %v7137_v50  ;;  %v404_v50 = vld [vmem:[%s10218_s1 + $0xb58] sm:$0xff] }
 0x1b3   :  { %3416 = vmatpush1.bf16.msra.mxu1 %v6464_v52  ;;  %v7162_v52 = vld [vmem:[%s10220_s3 + $0x280] ss:$16 sps:$4 sm:$0xff]   ;;  %v6544_v55 = vcombine.low %v404_v50, %v408_v51 }
 0x1b4   :  { %3417 = vmatprep.subr.bf16.mxu1 %v6473_v53  ;;  %v7167_v53 = vld [vmem:[%s10220_s3 + $0x2a4] ss:$16 sps:$4 sm:$0xff]  }
 0x1b5   :  { %5132 = vmatpush1.bf16.msra.mxu0 %v7135_v57  ;;  %v6545_v57 = vcombine.high %v404_v50, %v408_v51  ;;  %v480_v50 = vld [vmem:[%s10218_s1 + $0xdb8] sm:$0xff] }
 0x1b6   :  { %5133 = vmatprep.subr.bf16.mxu0 %v7140_v54  ;;  %v412_v54 = vld [vmem:[%s10218_s1 + $0xb98] sm:$0xff] }
 0x1b7   :  { %3418 = vmatpush1.bf16.msra.mxu1 %v6472_v56  ;;  %v7165_v56 = vld [vmem:[%s10220_s3 + $0x2a0] ss:$16 sps:$4 sm:$0xff]   ;;  %v6552_v63 = vcombine.low %v412_v54, %v416_v28 }
 0x1b8   :  { %3419 = vmatprep.subr.bf16.mxu1 %v6481_v60  ;;  %v7170_v60 = vld [vmem:[%s10220_s3 + $0x2c4] ss:$16 sps:$4 sm:$0xff]  }
 0x1b9   :  { %5134 = vmatpush1.bf16.msra.mxu0 %v7138_v58  ;;  %v6553_v58 = vcombine.high %v412_v54, %v416_v28  ;;  %v7194_v28 = vld [vmem:[%s10220_s3 + $0x3c4] ss:$16 sps:$4 sm:$0xff]  }
 0x1ba   :  { %5135 = vmatprep.subr.bf16.mxu0 %v7143_v61  ;;  %v420_v61 = vld [vmem:[%s10218_s1 + $0xbd8] sm:$0xff] }
 0x1bb   :  { %3420 = vmatpush1.bf16.msra.mxu1 %v6480_v33  ;;  %v7168_v33 = vld [vmem:[%s10220_s3 + $0x2c0] ss:$16 sps:$4 sm:$0xff]   ;;  %v6560_v30 = vcombine.low %v420_v61, %v424_v62 }
 0x1bc   :  { %3421 = vmatprep.subr.bf16.mxu1 %v6489_v1  ;;  %v7173_v1 = vld [vmem:[%s10220_s3 + $0x2e4] ss:$16 sps:$4 sm:$0xff]  }
 0x1bd   :  { %5136 = vmatpush1.bf16.msra.mxu0 %v7141_v0  ;;  %v6561_v0 = vcombine.high %v420_v61, %v424_v62 }
 0x1be   :  { %5137 = vmatprep.subr.bf16.mxu0 %v7146_v2  ;;  %v428_v2 = vld [vmem:[%s10218_s1 + $0xc18] sm:$0xff] }
 0x1bf   :  { %3422 = vmatpush1.bf16.msra.mxu1 %v6488_v4  ;;  %v7171_v4 = vld [vmem:[%s10220_s3 + $0x2e0] ss:$16 sps:$4 sm:$0xff]   ;;  %v6568_v9 = vcombine.low %v428_v2, %v432_v3 }
 0x1c0   :  { %3423 = vmatprep.subr.bf16.mxu1 %v6497_v6  ;;  %v7176_v6 = vld [vmem:[%s10220_s3 + $0x304] ss:$16 sps:$4 sm:$0xff]  }
 0x1c1   :  { %5138 = vmatpush1.bf16.msra.mxu0 %v7144_v5  ;;  %v6569_v5 = vcombine.high %v428_v2, %v432_v3 }
 0x1c2   :  { %5139 = vmatprep.subr.bf16.mxu0 %v7149_v8  ;;  %v436_v8 = vld [vmem:[%s10218_s1 + $0xc58] sm:$0xff] }
 0x1c3   :  { %3424 = vmatpush1.bf16.msra.mxu1 %v6496_v10  ;;  %v7174_v10 = vld [vmem:[%s10220_s3 + $0x300] ss:$16 sps:$4 sm:$0xff]   ;;  %v6576_v14 = vcombine.low %v436_v8, %v440_v34 }
 0x1c4   :  { %3425 = vmatprep.subr.bf16.mxu1 %v6505_v35  ;;  %v7179_v35 = vld [vmem:[%s10220_s3 + $0x324] ss:$16 sps:$4 sm:$0xff]  }
 0x1c5   :  { %5140 = vmatpush1.bf16.msra.mxu0 %v7147_v11  ;;  %v6577_v11 = vcombine.high %v436_v8, %v440_v34 }
 0x1c6   :  { %5152 = vmatprep.subr.bf16.mxu0 %v7152_v13  ;;  %v444_v13 = vld [vmem:[%s10218_s1 + $0xc98] sm:$0xff] }
 0x1c7   :  { %3426 = vmatpush1.bf16.msra.mxu1 %v6504_v15  ;;  %v7177_v15 = vld [vmem:[%s10220_s3 + $0x320] ss:$16 sps:$4 sm:$0xff]  }
 0x1c8   :  { %5142 = vmatmul.mubr.bf16.vlgmr.msra.gmra.mrb[8].mxu0 %v8945_v29  ;;  %3427 = vmatprep.subr.bf16.mxu1 %v6513_v18  ;;  %v7182_v18 = vld [vmem:[%s10220_s3 + $0x344] ss:$16 sps:$4 sm:$0xff]  }
 0x1c9   :  { %5153 = vmatpush1.bf16.msra.mxu0 %v7150_v17  ;;  %v6585_v17 = vcombine.high %v444_v13, %v448_v37 }
 0x1ca   :  { %5154 = vmatprep.subr.bf16.mxu0 %v7155_v19  ;;  %v6584_v19 = vcombine.low %v444_v13, %v448_v37  ;;  %v7200_v37 = vld [vmem:[%s10220_s3 + $0xc] ss:$16 sps:$4 sm:$0xff]  }
 0x1cb   :  { %3428 = vmatpush1.bf16.msra.mxu1 %v6512_v23  ;;  %v7185_v23 = vld [vmem:[%s10220_s3 + $0x364] ss:$16 sps:$4 sm:$0xff]  }
 0x1cc   :  { %3429 = vmatprep.subr.bf16.mxu1 %v6521_v25  ;;  %v464_v25 = vld [vmem:[%s10218_s1 + $0xd38] sm:$0xff] }
 0x1cd   :  { %5155 = vmatpush1.bf16.msra.mxu0 %v7153_v24  ;;  %v460_v24 = vld [vmem:[%s10218_s1 + $0xd18] sm:$0xff] }
 0x1ce   :  { %5156 = vmatprep.subr.bf16.mxu0 %v7158_v26  ;;  %v6601_v32 = vcombine.high %v460_v24, %v464_v25  ;;  %v6600_v44 = vcombine.low %v460_v24, %v464_v25  ;;  %v7234_v24 = vld [vmem:[%s10220_s3 + $0x440] ss:$16 sps:$4 sm:$0xff]   ;;  %v7242_v25 = vld [vmem:[%s10220_s3 + $0x464] ss:$16 sps:$4 sm:$0xff]  }
 0x1cf   :  { %3430 = vmatpush1.bf16.msra.mxu1 %v6520_v38  ;;  %v7188_v38 = vld [vmem:[%s10220_s3 + $0x384] ss:$16 sps:$4 sm:$0xff]  }
 0x1d0   :  { %3431 = vmatprep.subr.bf16.mxu1 %v6529_v40  ;;  %v472_v40 = vld [vmem:[%s10218_s1 + $0xd78] sm:$0xff] }
 0x1d1   :  { %5157 = vmatpush1.bf16.msra.mxu0 %v7156_v39  ;;  %v468_v39 = vld [vmem:[%s10218_s1 + $0xd58] sm:$0xff] }
 0x1d2   :  { %5158 = vmatprep.subr.bf16.mxu0 %v7161_v42  ;;  %v501_v42 = vsub.s32 2, %v8870_v27 }
 0x1d3   :  { %3432 = vmatpush1.bf16.msra.mxu1 %v6528_v48  ;;  %v7186_v48 = vld [vmem:[%s10220_s3 + $0x380] ss:$16 sps:$4 sm:$0xff]  }
 0x1d4   :  { %3433 = vmatprep.subr.bf16.mxu1 %v6537_v59  ;;  %v7191_v59 = vld [vmem:[%s10220_s3 + $0x3a4] ss:$16 sps:$4 sm:$0xff]   ;;  %v502_v51 = vrot.slane %v8878_v36, %v501_v42 }
 0x1d5   :  { %5159 = vmatpush1.bf16.msra.mxu0 %v7159_v49  ;;  %v6609_v49 = vcombine.high %v468_v39, %v472_v40 }
 0x1d6   :  { %5160 = vmatprep.subr.bf16.mxu0 %v7164_v16  ;;  %v476_v16 = vld [vmem:[%s10218_s1 + $0xd98] sm:$0xff] }
 0x1d7   :  { %3434 = vmatpush1.bf16.msra.mxu1 %v6536_v22  ;;  %v506_v22 = vrot.slane %v8878_v36, %v505_v45  ;;  %v488_v36 = vld [vmem:[%s10218_s1 + $0xdf8] sm:$0xff]  ;;  %v6616_v62 = vcombine.low %v476_v16, %v480_v50 }
 0x1d8   :  { %3435 = vmatprep.subr.bf16.mxu1 %v6545_v57  ;;  %v7189_v57 = vld [vmem:[%s10220_s3 + $0x3a0] ss:$16 sps:$4 sm:$0xff]  }
 0x1d9   :  { %5161 = vmatpush1.bf16.msra.mxu0 %v7162_v52  ;;  %v6608_v52 = vcombine.low %v468_v39, %v472_v40  ;;  %v7210_v39 = vld [vmem:[%s10220_s3 + $0x88] ss:$16 sps:$4 sm:$0xff]   ;;  %v7215_v40 = vld [vmem:[%s10220_s3 + $0xac] ss:$16 sps:$4 sm:$0xff]  }
 0x1da   :  { %5162 = vmatprep.subr.bf16.mxu0 %v7167_v53  ;;  %v6617_v53 = vcombine.high %v476_v16, %v480_v50  ;;  %v7252_v16 = vld [vmem:[%s10220_s3 + $0x4a0] ss:$16 sps:$4 sm:$0xff]   ;;  %v7260_v50 = vld [vmem:[%s10220_s3 + $0x4c4] ss:$16 sps:$4 sm:$0xff]  }
 0x1db   :  { %3436 = vmatpush1.bf16.msra.mxu1 %v6544_v55  ;;  %v484_v55 = vld [vmem:[%s10218_s1 + $0xdd8] sm:$0xff] }
 0x1dc   :  { %3437 = vmatprep.subr.bf16.mxu1 %v6553_v58  ;;  %v6625_v2 = vcombine.high %v484_v55, %v488_v36  ;;  %v6624_v8 = vcombine.low %v484_v55, %v488_v36  ;;  %v7272_v55 = vld [vmem:[%s10220_s3 + $0x504] ss:$16 sps:$4 sm:$0xff]   ;;  %v7225_v36 = vld [vmem:[%s10220_s3 + $0x108] ss:$16 sps:$4 sm:$0xff]  }
 0x1dd   :  { %5163 = vmatpush1.bf16.msra.mxu0 %v7165_v56 }
 0x1de   :  { %5164 = vmatprep.subr.bf16.mxu0 %v7170_v60 }
 0x1df   :  { %3438 = vmatpush1.bf16.msra.mxu1 %v6552_v63 }
 0x1e0   :  { %3439 = vmatprep.subr.bf16.mxu1 %v6561_v0 }
 0x1e1   :  { %5165 = vmatpush1.bf16.msra.mxu0 %v7168_v33 }
 0x1e2   :  { %5166 = vmatprep.subr.bf16.mxu0 %v7173_v1  ;;  %v7192_v1 = vld [vmem:[%s10220_s3 + $0x3c0] ss:$16 sps:$4 sm:$0xff]  }
 0x1e3   :  { %3440 = vmatpush1.bf16.msra.mxu1 %v6560_v30 }
 0x1e4   :  { %3452 = vmatprep.subr.bf16.mxu1 %v6569_v5 }
 0x1e5   :  { %5167 = vmatpush1.bf16.msra.mxu0 %v7171_v4  ;;  %v7197_v4 = vld [vmem:[%s10220_s3 + $0x3e4] ss:$16 sps:$4 sm:$0xff]  }
 0x1e6   :  { %5168 = vmatprep.subr.bf16.mxu0 %v7176_v6  ;;  %3442 = vmatmul.mubr.bf16.vlgmr.msra.gmra.mrb[8].mxu1 %v8842_v7  ;;  %v452_v7 = vld [vmem:[%s10218_s1 + $0xcd8] sm:$0xff] }
 0x1e7   :  { %3453 = vmatpush1.bf16.msra.mxu1 %v6568_v9  ;;  %3484 = vmatprep.mubr.bf16.mxu1 %v7618_v41  ;;  %v456_v41 = vld [vmem:[%s10218_s1 + $0xcf8] sm:$0xff] }
 0x1e8   :  { %3454 = vmatprep.subr.bf16.mxu1 %v6577_v11  ;;  %v6593_v21 = vcombine.high %v452_v7, %v456_v41  ;;  %v6592_v26 = vcombine.low %v452_v7, %v456_v41  ;;  %v7222_v7 = vld [vmem:[%s10220_s3 + $0x400] ss:$16 sps:$4 sm:$0xff]   ;;  %v7230_v41 = vld [vmem:[%s10220_s3 + $0x424] ss:$16 sps:$4 sm:$0xff]  }
 0x1e9   :  { %5169 = vmatpush1.bf16.msra.mxu0 %v7174_v10  ;;  %v7195_v10 = vld [vmem:[%s10220_s3 + $0x3e0] ss:$16 sps:$4 sm:$0xff]  }
 0x1ea   :  { %5170 = vmatprep.subr.bf16.mxu0 %v7179_v35 }
 0x1eb   :  { %3455 = vmatpush1.bf16.msra.mxu1 %v6576_v14  ;;  %v7224_v14 = vld [vmem:[%s10220_s3 + $0x404] ss:$16 sps:$4 sm:$0xff]  }
 0x1ec   :  { %3456 = vmatprep.subr.bf16.mxu1 %v6585_v17  ;;  %v7198_v17 = vld [vmem:[%s10220_s3 + $0x8] ss:$16 sps:$4 sm:$0xff]  }
 0x1ed   :  { %5171 = vmatpush1.bf16.msra.mxu0 %v7177_v15 }
 0x1ee   :  { %5172 = vmatprep.subr.bf16.mxu0 %v7182_v18  ;;  %v7203_v18 = vld [vmem:[%s10220_s3 + $0x2c] ss:$16 sps:$4 sm:$0xff]  }
 0x1ef   :  { %3457 = vmatpush1.bf16.msra.mxu1 %v6584_v19  ;;  %v7201_v19 = vld [vmem:[%s10220_s3 + $0x28] ss:$16 sps:$4 sm:$0xff]  }
 0x1f0   :  { %3458 = vmatprep.subr.bf16.mxu1 %v6593_v21  ;;  %v7236_v21 = vld [vmem:[%s10220_s3 + $0x444] ss:$16 sps:$4 sm:$0xff]  }
 0x1f1   :  { %5173 = vmatpush1.bf16.msra.mxu0 %v7180_v20  ;;  %v7206_v20 = vld [vmem:[%s10220_s3 + $0x4c] ss:$16 sps:$4 sm:$0xff]  }
 0x1f2   :  { %5174 = vmatprep.subr.bf16.mxu0 %v7185_v23  ;;  %v7209_v23 = vld [vmem:[%s10220_s3 + $0x6c] ss:$16 sps:$4 sm:$0xff]  }
 0x1f3   :  { %3459 = vmatpush1.bf16.msra.mxu1 %v6592_v26  ;;  %v7207_v26 = vld [vmem:[%s10220_s3 + $0x68] ss:$16 sps:$4 sm:$0xff]  }
 0x1f4   :  { %3460 = vmatprep.subr.bf16.mxu1 %v6601_v32  ;;  %v7240_v32 = vld [vmem:[%s10220_s3 + $0x460] ss:$16 sps:$4 sm:$0xff]  }
 0x1f5   :  { %5175 = vmatpush1.bf16.msra.mxu0 %v7183_v31  ;;  %v7212_v31 = vld [vmem:[%s10220_s3 + $0x8c] ss:$16 sps:$4 sm:$0xff]  }
 0x1f6   :  { %5176 = vmatprep.subr.bf16.mxu0 %v7188_v38  ;;  %v7248_v38 = vld [vmem:[%s10220_s3 + $0x484] ss:$16 sps:$4 sm:$0xff]  }
 0x1f7   :  { %3461 = vmatpush1.bf16.msra.mxu1 %v6600_v44  ;;  %v7246_v44 = vld [vmem:[%s10220_s3 + $0x480] ss:$16 sps:$4 sm:$0xff]  }
 0x1f8   :  { %3462 = vmatprep.subr.bf16.mxu1 %v6609_v49  ;;  %v7213_v49 = vld [vmem:[%s10220_s3 + $0xa8] ss:$16 sps:$4 sm:$0xff]  }
 0x1f9   :  { %5177 = vmatpush1.bf16.msra.mxu0 %v7186_v48  ;;  %v3142_v54 = vpop.f32.mrb[4].mxu1  ;;  %v7254_v48 = vld [vmem:[%s10220_s3 + $0x4a4] ss:$16 sps:$4 sm:$0xff]  }
 0x1fa   :  { %5178 = vmatprep.subr.bf16.mxu0 %v7191_v59  ;;  %v6995_v56 = vadd.f32 %v3142_v54, %v502_v51  ;;  %v3144_v58 = vpop.f32.mrb[5].mxu1  ;;  %v7218_v59 = vld [vmem:[%s10220_s3 + $0xcc] ss:$16 sps:$4 sm:$0xff]  }
 0x1fb   :  { %v6996_v60 = vadd.f32 %v3144_v58, %v506_v22  ;;  %v3146_v61 = vpop.f32.mrb[6].mxu1  ;;  %3463 = vmatpush1.bf16.msra.mxu1 %v6608_v52  ;;  %v7258_v52 = vld [vmem:[%s10220_s3 + $0x4c0] ss:$16 sps:$4 sm:$0xff]   ;;  %v7227_v54 = vld [vmem:[%s10220_s3 + $0x10c] ss:$16 sps:$4 sm:$0xff]  }
 0x1fc   :  { %v3513_v63 = vmul.f32 0.2, %v6995_v56  ;;  %v6997_v33 = vadd.f32 %v3146_v61, %v502_v51  ;;  %v3148_v0 = vpop.f32.mrb[7].mxu1  ;;  %3464 = vmatprep.subr.bf16.mxu1 %v6617_v53  ;;  %vm3497_vm4 = vcmp.gt.f32.partialorder %v6995_v56, 0.0  ;;  %v7216_v51 = vld [vmem:[%s10220_s3 + $0xc8] ss:$16 sps:$4 sm:$0xff]  }
 0x1fd   :  { %5179 = vmatpush1.bf16.msra.mxu0 %v7189_v57  ;;  %v3514_v3 = vmul.f32 0.2, %v6996_v60  ;;  %v6998_v30 = vadd.f32 %v3148_v0, %v506_v22  ;;  %vm3498_vm5 = vcmp.gt.f32.partialorder %v6996_v60, 0.0  ;;  %v7221_v22 = vld [vmem:[%s10220_s3 + $0xec] ss:$16 sps:$4 sm:$0xff]  }
 0x1fe   :  { %5180 = vmatprep.subr.bf16.mxu0 %v7194_v28  ;;  %vm3505_vm6 = vcmp.gt.f32.partialorder %v6997_v33, 0.0  ;;  %v3521_v5 = vmul.f32 0.2, %v6997_v33  ;;  %v3529_v34 = vsel %vm3497_vm4, %v6995_v56, %v3513_v63  ;;  %v7266_v57 = vld [vmem:[%s10220_s3 + $0x4e4] ss:$16 sps:$4 sm:$0xff]  }
 0x1ff   :  { %vm3506_vm7 = vcmp.gt.f32.partialorder %v6998_v30, 0.0  ;;  %v3522_v6 = vmul.f32 0.2, %v6998_v30  ;;  %3465 = vmatpush1.bf16.msra.mxu1 %v6616_v62  ;;  %v3530_v35 = vsel %vm3498_vm5, %v6996_v60, %v3514_v3  ;;  %v7219_v53 = vld [vmem:[%s10220_s3 + $0xe8] ss:$16 sps:$4 sm:$0xff]  }
 0x200   :  { %v3537_v9 = vsel %vm3505_vm6, %v6997_v33, %v3521_v5  ;;  %3466 = vmatprep.subr.bf16.mxu1 %v6625_v2  ;;  %v7264_v28 = vld [vmem:[%s10220_s3 + $0x4e0] ss:$16 sps:$4 sm:$0xff]   ;;  %v7233_v56 = vld [vmem:[%s10220_s3 + $0x12c] ss:$16 sps:$4 sm:$0xff]   ;;  %v7278_v60 = vld [vmem:[%s10220_s3 + $0x524] ss:$16 sps:$4 sm:$0xff]  }
 0x201   :  { %5181 = vmatpush1.bf16.msra.mxu0 %v7192_v1  ;;  %v9343_v11 = vpack.c.bf16 %v3537_v9, %v3529_v34  ;;  %v3538_v13 = vsel %vm3506_vm7, %v6998_v30, %v3522_v6  ;;  %v7270_v58 = vld [vmem:[%s10220_s3 + $0x500] ss:$16 sps:$4 sm:$0xff]   ;;  %v7231_v61 = vld [vmem:[%s10220_s3 + $0x128] ss:$16 sps:$4 sm:$0xff]   ;;  %v7239_v62 = vld [vmem:[%s10220_s3 + $0x14c] ss:$16 sps:$4 sm:$0xff]  }
 0x202   :  { %5182 = vmatprep.subr.bf16.mxu0 %v7197_v4  ;;  %v9351_v15 = vpack.c.bf16 %v3538_v13, %v3530_v35  ;;  %v7276_v63 = vld [vmem:[%s10220_s3 + $0x520] ss:$16 sps:$4 sm:$0xff]   ;;  %v7284_v33 = vld [vmem:[%s10220_s3 + $0x544] ss:$16 sps:$4 sm:$0xff]   ;;  %v7237_v0 = vld [vmem:[%s10220_s3 + $0x148] ss:$16 sps:$4 sm:$0xff]  }
 0x203   :  { %3467 = vmatpush1.bf16.msra.mxu1 %v6624_v8  ;;  %v7245_v1 = vld [vmem:[%s10220_s3 + $0x16c] ss:$16 sps:$4 sm:$0xff]   ;;  %v7282_v2 = vld [vmem:[%s10220_s3 + $0x540] ss:$16 sps:$4 sm:$0xff]   ;;  %v7290_v3 = vld [vmem:[%s10220_s3 + $0x564] ss:$16 sps:$4 sm:$0xff]  }
 0x204   :  { %5184 = vmatprep.mubr.bf16.mxu0 %v9351_v15  ;;  %5281 = vmatprep.subr.bf16.mxu1 %v7200_v37  ;;  %v7243_v30 = vld [vmem:[%s10220_s3 + $0x168] ss:$16 sps:$4 sm:$0xff]   ;;  %v7251_v4 = vld [vmem:[%s10220_s3 + $0x18c] ss:$16 sps:$4 sm:$0xff]   ;;  %v7288_v5 = vld [vmem:[%s10220_s3 + $0x560] ss:$16 sps:$4 sm:$0xff]  }
 0x205   :  { %5183 = vmatpush1.bf16.msra.mxu0 %v7195_v10  ;;  %v7296_v6 = vld [vmem:[%s10220_s3 + $0x584] ss:$16 sps:$4 sm:$0xff]   ;;  %v7249_v8 = vld [vmem:[%s10220_s3 + $0x188] ss:$16 sps:$4 sm:$0xff]   ;;  %v7257_v34 = vld [vmem:[%s10220_s3 + $0x1ac] ss:$16 sps:$4 sm:$0xff]  }
 0x206   :  { %5195 = vmatprep.subr.bf16.mxu0 %v7224_v14  ;;  %3485 = vmatmul.mubr.bf16.vlgmr.msra.gmra.mrb[8].mxu1 %v8965_v47  ;;  %v7228_v47 = vld [vmem:[%s10220_s3 + $0x420] ss:$16 sps:$4 sm:$0xff]   ;;  %v7302_v10 = vld [vmem:[%s10220_s3 + $0x5a4] ss:$16 sps:$4 sm:$0xff]   ;;  %v7255_v35 = vld [vmem:[%s10220_s3 + $0x1a8] ss:$16 sps:$4 sm:$0xff]  }
 0x207   :  { %5282 = vmatpush1.bf16.msra.mxu1 %v7198_v17  ;;  %5313 = vmatprep.mubr.bf16.mxu1 %v8951_v12  ;;  %v7204_v12 = vld [vmem:[%s10220_s3 + $0x48] ss:$16 sps:$4 sm:$0xff]   ;;  %v7294_v9 = vld [vmem:[%s10220_s3 + $0x580] ss:$16 sps:$4 sm:$0xff]   ;;  %v7263_v13 = vld [vmem:[%s10220_s3 + $0x1cc] ss:$16 sps:$4 sm:$0xff]  }
 0x208   :  { %5185 = vmatmul.mubr.bf16.vlgmr.msra.gmra.mrb[8].mxu0 %v9343_v11  ;;  %5283 = vmatprep.subr.bf16.mxu1 %v7203_v18  ;;  %v7300_v37 = vld [vmem:[%s10220_s3 + $0x5a0] ss:$16 sps:$4 sm:$0xff]   ;;  %v7308_v14 = vld [vmem:[%s10220_s3 + $0x5c4] ss:$16 sps:$4 sm:$0xff]   ;;  %v7261_v17 = vld [vmem:[%s10220_s3 + $0x1c8] ss:$16 sps:$4 sm:$0xff]  }
 0x209   :  { %5196 = vmatpush1.bf16.msra.mxu0 %v7222_v7  ;;  %v7269_v18 = vld [vmem:[%s10220_s3 + $0x1ec] ss:$16 sps:$4 sm:$0xff]   ;;  %v7306_v7 = vld [vmem:[%s10220_s3 + $0x5c0] ss:$16 sps:$4 sm:$0xff]  }
 0x20a   :  { %5197 = vmatprep.subr.bf16.mxu0 %v7230_v41  ;;  %v7314_v41 = vld [vmem:[%s10220_s3 + $0x5e4] ss:$16 sps:$4 sm:$0xff]  }
 0x20b   :  { %5284 = vmatpush1.bf16.msra.mxu1 %v7201_v19  ;;  %v7267_v19 = vld [vmem:[%s10220_s3 + $0x1e8] ss:$16 sps:$4 sm:$0xff]  }
 0x20c   :  { %5285 = vmatprep.subr.bf16.mxu1 %v7206_v20  ;;  %v7275_v20 = vld [vmem:[%s10220_s3 + $0x20c] ss:$16 sps:$4 sm:$0xff]  }
 0x20d   :  { %5198 = vmatpush1.bf16.msra.mxu0 %v7228_v47  ;;  %v7312_v47 = vld [vmem:[%s10220_s3 + $0x5e0] ss:$16 sps:$4 sm:$0xff]  }
 0x20e   :  { %5199 = vmatprep.subr.bf16.mxu0 %v7236_v21  ;;  %v7368_v21 = vld [vmem:[%s10220_s3 + $0x604] ss:$16 sps:$4 sm:$0xff]  }
 0x20f   :  { %5286 = vmatpush1.bf16.msra.mxu1 %v7204_v12  ;;  %v7273_v12 = vld [vmem:[%s10220_s3 + $0x208] ss:$16 sps:$4 sm:$0xff]  }
 0x210   :  { %5287 = vmatprep.subr.bf16.mxu1 %v7209_v23  ;;  %v7281_v23 = vld [vmem:[%s10220_s3 + $0x22c] ss:$16 sps:$4 sm:$0xff]  }
 0x211   :  { %5200 = vmatpush1.bf16.msra.mxu0 %v7234_v24  ;;  %v7279_v24 = vld [vmem:[%s10220_s3 + $0x228] ss:$16 sps:$4 sm:$0xff]  }
 0x212   :  { %5201 = vmatprep.subr.bf16.mxu0 %v7242_v25  ;;  %v7287_v25 = vld [vmem:[%s10220_s3 + $0x24c] ss:$16 sps:$4 sm:$0xff]  }
 0x213   :  { %5288 = vmatpush1.bf16.msra.mxu1 %v7207_v26  ;;  %v7285_v26 = vld [vmem:[%s10220_s3 + $0x248] ss:$16 sps:$4 sm:$0xff]  }
 0x214   :  { %5289 = vmatprep.subr.bf16.mxu1 %v7212_v31  ;;  %v7299_v31 = vld [vmem:[%s10220_s3 + $0x28c] ss:$16 sps:$4 sm:$0xff]  }
 0x215   :  { %5202 = vmatpush1.bf16.msra.mxu0 %v7240_v32  ;;  %v7297_v32 = vld [vmem:[%s10220_s3 + $0x288] ss:$16 sps:$4 sm:$0xff]  }
 0x216   :  { %5203 = vmatprep.subr.bf16.mxu0 %v7248_v38  ;;  %v509_v38 = vsub.s32 4, %v8870_v27 }
 0x217   :  { %5290 = vmatpush1.bf16.msra.mxu1 %v7210_v39  ;;  %v513_v39 = vsub.s32 5, %v8870_v27 }
 0x218   :  { %5291 = vmatprep.subr.bf16.mxu1 %v7215_v40  ;;  %v7305_v40 = vld [vmem:[%s10220_s3 + $0x2ac] ss:$16 sps:$4 sm:$0xff]  }
 0x219   :  { %5204 = vmatpush1.bf16.msra.mxu0 %v7246_v44  ;;  %v9586_v44 = vld [vmem:[%s10221_s2] sm:$0xff] }
 0x21a   :  { %5205 = vmatprep.subr.bf16.mxu0 %v7254_v48  ;;  %v510_v48 = vrot.slane %v9586_v44, %v509_v38  ;;  %v7339_v38 = vld [vmem:[%s10220_s3 + $0x3e8] ss:$16 sps:$4 sm:$0xff]  }
 0x21b   :  { %5292 = vmatpush1.bf16.msra.mxu1 %v7213_v49  ;;  %v7303_v49 = vld [vmem:[%s10220_s3 + $0x2a8] ss:$16 sps:$4 sm:$0xff]  }
 0x21c   :  { %5293 = vmatprep.subr.bf16.mxu1 %v7218_v59  ;;  %v514_v59 = vrot.slane %v9586_v44, %v513_v39  ;;  %v7408_v39 = vld [vmem:[%s10220_s3 + $0x6e0] ss:$16 sps:$4 sm:$0xff]  }
 0x21d   :  { %5206 = vmatpush1.bf16.msra.mxu0 %v7252_v16  ;;  %v7311_v16 = vld [vmem:[%s10220_s3 + $0x2cc] ss:$16 sps:$4 sm:$0xff]  }
 0x21e   :  { %5207 = vmatprep.subr.bf16.mxu0 %v7260_v50 }
 0x21f   :  { %5294 = vmatpush1.bf16.msra.mxu1 %v7216_v51 }
 0x220   :  { %5295 = vmatprep.subr.bf16.mxu1 %v7221_v22 }
 0x221   :  { %5208 = vmatpush1.bf16.msra.mxu0 %v7258_v52  ;;  %v7309_v52 = vld [vmem:[%s10220_s3 + $0x2c8] ss:$16 sps:$4 sm:$0xff]  }
 0x222   :  { %5209 = vmatprep.subr.bf16.mxu0 %v7266_v57 }
 0x223   :  { %5296 = vmatpush1.bf16.msra.mxu1 %v7219_v53 }
 0x224   :  { %5297 = vmatprep.subr.bf16.mxu1 %v7227_v54  ;;  %v7317_v54 = vld [vmem:[%s10220_s3 + $0x2ec] ss:$16 sps:$4 sm:$0xff]  }
 0x225   :  { %5210 = vmatpush1.bf16.msra.mxu0 %v7264_v28 }
 0x226   :  { %5211 = vmatprep.subr.bf16.mxu0 %v7272_v55 }
 0x227   :  { %5298 = vmatpush1.bf16.msra.mxu1 %v7225_v36 }
 0x228   :  { %5299 = vmatprep.subr.bf16.mxu1 %v7233_v56 }
 0x229   :  { %5212 = vmatpush1.bf16.msra.mxu0 %v7270_v58 }
 0x22a   :  { %5213 = vmatprep.subr.bf16.mxu0 %v7278_v60 }
 0x22b   :  { %5300 = vmatpush1.bf16.msra.mxu1 %v7231_v61  ;;  %v7315_v61 = vld [vmem:[%s10220_s3 + $0x2e8] ss:$16 sps:$4 sm:$0xff]  }
 0x22c   :  { %5301 = vmatprep.subr.bf16.mxu1 %v7239_v62 }
 0x22d   :  { %5214 = vmatpush1.bf16.msra.mxu0 %v7276_v63  ;;  %v7320_v63 = vld [vmem:[%s10220_s3 + $0x30c] ss:$16 sps:$4 sm:$0xff]  }
 0x22e   :  { %5215 = vmatprep.subr.bf16.mxu0 %v7284_v33 }
 0x22f   :  { %5302 = vmatpush1.bf16.msra.mxu1 %v7237_v0 }
 0x230   :  { %5303 = vmatprep.subr.bf16.mxu1 %v7245_v1 }
 0x231   :  { %5216 = vmatpush1.bf16.msra.mxu0 %v7282_v2 }
 0x232   :  { %5217 = vmatprep.subr.bf16.mxu0 %v7290_v3 }
 0x233   :  { %5304 = vmatpush1.bf16.msra.mxu1 %v7243_v30 }
 0x234   :  { %5305 = vmatprep.subr.bf16.mxu1 %v7251_v4  ;;  %v7318_v4 = vld [vmem:[%s10220_s3 + $0x308] ss:$16 sps:$4 sm:$0xff]  }
 0x235   :  { %5218 = vmatpush1.bf16.msra.mxu0 %v7288_v5  ;;  %v7366_v5 = vld [vmem:[%s10220_s3 + $0x600] ss:$16 sps:$4 sm:$0xff]  }
 0x236   :  { %5219 = vmatprep.subr.bf16.mxu0 %v7296_v6  ;;  %v7323_v6 = vld [vmem:[%s10220_s3 + $0x32c] ss:$16 sps:$4 sm:$0xff]  }
 0x237   :  { %5306 = vmatpush1.bf16.msra.mxu1 %v7249_v8  ;;  %v7374_v8 = vld [vmem:[%s10220_s3 + $0x624] ss:$16 sps:$4 sm:$0xff]  }
 0x238   :  { %5307 = vmatprep.subr.bf16.mxu1 %v7257_v34  ;;  %v7321_v34 = vld [vmem:[%s10220_s3 + $0x328] ss:$16 sps:$4 sm:$0xff]  }
 0x239   :  { %5220 = vmatpush1.bf16.msra.mxu0 %v7294_v9  ;;  %v7372_v9 = vld [vmem:[%s10220_s3 + $0x620] ss:$16 sps:$4 sm:$0xff]  }
 0x23a   :  { %5221 = vmatprep.subr.bf16.mxu0 %v7302_v10  ;;  %v7326_v10 = vld [vmem:[%s10220_s3 + $0x34c] ss:$16 sps:$4 sm:$0xff]  }
 0x23b   :  { %5308 = vmatpush1.bf16.msra.mxu1 %v7255_v35  ;;  %v7380_v35 = vld [vmem:[%s10220_s3 + $0x644] ss:$16 sps:$4 sm:$0xff]  }
 0x23c   :  { %5309 = vmatprep.subr.bf16.mxu1 %v7263_v13  ;;  %v7324_v13 = vld [vmem:[%s10220_s3 + $0x348] ss:$16 sps:$4 sm:$0xff]  }
 0x23d   :  { %5222 = vmatpush1.bf16.msra.mxu0 %v7300_v37  ;;  %v7378_v37 = vld [vmem:[%s10220_s3 + $0x640] ss:$16 sps:$4 sm:$0xff]  }
 0x23e   :  { %5223 = vmatprep.subr.bf16.mxu0 %v7308_v14  ;;  %v7329_v14 = vld [vmem:[%s10220_s3 + $0x36c] ss:$16 sps:$4 sm:$0xff]  }
 0x23f   :  { %5310 = vmatpush1.bf16.msra.mxu1 %v7261_v17  ;;  %v7386_v17 = vld [vmem:[%s10220_s3 + $0x664] ss:$16 sps:$4 sm:$0xff]  }
 0x240   :  { %5311 = vmatprep.subr.bf16.mxu1 %v7269_v18  ;;  %v7327_v18 = vld [vmem:[%s10220_s3 + $0x368] ss:$16 sps:$4 sm:$0xff]  }
 0x241   :  { %5224 = vmatpush1.bf16.msra.mxu0 %v7306_v7  ;;  %v7384_v7 = vld [vmem:[%s10220_s3 + $0x660] ss:$16 sps:$4 sm:$0xff]  }
 0x242   :  { %5225 = vmatprep.subr.bf16.mxu0 %v7314_v41  ;;  %v7332_v41 = vld [vmem:[%s10220_s3 + $0x38c] ss:$16 sps:$4 sm:$0xff]  }
 0x243   :  { %5312 = vmatpush1.bf16.msra.mxu1 %v7267_v19  ;;  %v7392_v19 = vld [vmem:[%s10220_s3 + $0x684] ss:$16 sps:$4 sm:$0xff]  }
 0x244   :  { %5324 = vmatprep.subr.bf16.mxu1 %v7275_v20  ;;  %v7330_v20 = vld [vmem:[%s10220_s3 + $0x388] ss:$16 sps:$4 sm:$0xff]  }
 0x245   :  { %5226 = vmatpush1.bf16.msra.mxu0 %v7312_v47  ;;  %v7390_v47 = vld [vmem:[%s10220_s3 + $0x680] ss:$16 sps:$4 sm:$0xff]  }
 0x246   :  { %5314 = vmatmul.mubr.bf16.vlgmr.msra.gmra.mrb[12].mxu1 %v8945_v29  ;;  %5238 = vmatprep.subr.bf16.mxu0 %v7368_v21  ;;  %v7293_v29 = vld [vmem:[%s10220_s3 + $0x26c] ss:$16 sps:$4 sm:$0xff]  }
 0x247   :  { %5325 = vmatpush1.bf16.msra.mxu1 %v7273_v12  ;;  %5356 = vmatprep.mubr.bf16.mxu1 %v9351_v15  ;;  %v7291_v15 = vld [vmem:[%s10220_s3 + $0x268] ss:$16 sps:$4 sm:$0xff]   ;;  %v7335_v21 = vld [vmem:[%s10220_s3 + $0x3ac] ss:$16 sps:$4 sm:$0xff]   ;;  %v7398_v12 = vld [vmem:[%s10220_s3 + $0x6a4] ss:$16 sps:$4 sm:$0xff]  }
 0x248   :  { %5326 = vmatprep.subr.bf16.mxu1 %v7281_v23  ;;  %v7333_v23 = vld [vmem:[%s10220_s3 + $0x3a8] ss:$16 sps:$4 sm:$0xff]  }
 0x24b   :  { %5327 = vmatpush1.bf16.msra.mxu1 %v7279_v24  ;;  %v7396_v24 = vld [vmem:[%s10220_s3 + $0x6a0] ss:$16 sps:$4 sm:$0xff]  }
 0x24c   :  { %5328 = vmatprep.subr.bf16.mxu1 %v7287_v25  ;;  %v7338_v25 = vld [vmem:[%s10220_s3 + $0x3cc] ss:$16 sps:$4 sm:$0xff]  }
 0x24f   :  { %5329 = vmatpush1.bf16.msra.mxu1 %v7285_v26  ;;  %v7404_v26 = vld [vmem:[%s10220_s3 + $0x6c4] ss:$16 sps:$4 sm:$0xff]  }
 0x250   :  { %5330 = vmatprep.subr.bf16.mxu1 %v7293_v29  ;;  %v7336_v29 = vld [vmem:[%s10220_s3 + $0x3c8] ss:$16 sps:$4 sm:$0xff]  }
 0x253   :  { %5331 = vmatpush1.bf16.msra.mxu1 %v7291_v15  ;;  %v7402_v15 = vld [vmem:[%s10220_s3 + $0x6c0] ss:$16 sps:$4 sm:$0xff]  }
 0x254   :  { %5332 = vmatprep.subr.bf16.mxu1 %v7299_v31  ;;  %v7341_v31 = vld [vmem:[%s10220_s3 + $0x3ec] ss:$16 sps:$4 sm:$0xff]  }
 0x257   :  { %5333 = vmatpush1.bf16.msra.mxu1 %v7297_v32  ;;  %v7410_v32 = vld [vmem:[%s10220_s3 + $0x6e4] ss:$16 sps:$4 sm:$0xff]  }
 0x258   :  { %5334 = vmatprep.subr.bf16.mxu1 %v7305_v40  ;;  %v7344_v40 = vld [vmem:[%s10220_s3 + $0x40c] ss:$16 sps:$4 sm:$0xff]  }
 0x25b   :  { %v3314_v50 = vpop.f32.mrb[4].mxu0  ;;  %5335 = vmatpush1.bf16.msra.mxu1 %v7303_v49  ;;  %v7342_v49 = vld [vmem:[%s10220_s3 + $0x408] ss:$16 sps:$4 sm:$0xff]  }
 0x25c   :  { %v6999_v51 = vadd.f32 %v3314_v50, %v510_v48  ;;  %v3316_v22 = vpop.f32.mrb[5].mxu0  ;;  %5336 = vmatprep.subr.bf16.mxu1 %v7311_v16  ;;  %v7414_v16 = vld [vmem:[%s10220_s3 + $0x700] ss:$16 sps:$4 sm:$0xff]   ;;  %v7422_v50 = vld [vmem:[%s10220_s3 + $0x724] ss:$16 sps:$4 sm:$0xff]  }
 0x25d   :  { %v7000_v57 = vadd.f32 %v3316_v22, %v514_v59  ;;  %v3318_v53 = vpop.f32.mrb[6].mxu0  ;;  %v7350_v22 = vld [vmem:[%s10220_s3 + $0x44c] ss:$16 sps:$4 sm:$0xff]  }
 0x25e   :  { %v3515_v28 = vmul.f32 0.2, %v6999_v51  ;;  %v7001_v55 = vadd.f32 %v3318_v53, %v510_v48  ;;  %v3320_v36 = vpop.f32.mrb[7].mxu0  ;;  %vm3499_vm8 = vcmp.gt.f32.partialorder %v6999_v51, 0.0  ;;  %v7416_v48 = vld [vmem:[%s10220_s3 + $0x704] ss:$16 sps:$4 sm:$0xff]  }
 0x25f   :  { %v3516_v56 = vmul.f32 0.2, %v7000_v57  ;;  %v7002_v58 = vadd.f32 %v3320_v36, %v514_v59  ;;  %vm3500_vm9 = vcmp.gt.f32.partialorder %v7000_v57, 0.0  ;;  %5337 = vmatpush1.bf16.msra.mxu1 %v7309_v52  ;;  %v7347_v59 = vld [vmem:[%s10220_s3 + $0x42c] ss:$16 sps:$4 sm:$0xff]  }
 0x260   :  { %vm3507_vm10 = vcmp.gt.f32.partialorder %v7001_v55, 0.0  ;;  %v3523_v60 = vmul.f32 0.2, %v7001_v55  ;;  %5338 = vmatprep.subr.bf16.mxu1 %v7317_v54  ;;  %v3531_v33 = vsel %vm3499_vm8, %v6999_v51, %v3515_v28  ;;  %v7345_v51 = vld [vmem:[%s10220_s3 + $0x428] ss:$16 sps:$4 sm:$0xff]  }
 0x261   :  { %vm3508_vm11 = vcmp.gt.f32.partialorder %v7002_v58, 0.0  ;;  %v3524_v62 = vmul.f32 0.2, %v7002_v58  ;;  %v3532_v2 = vsel %vm3500_vm9, %v7000_v57, %v3516_v56  ;;  %v7420_v52 = vld [vmem:[%s10220_s3 + $0x720] ss:$16 sps:$4 sm:$0xff]  }
 0x262   :  { %v3539_v0 = vsel %vm3507_vm10, %v7001_v55, %v3523_v60  ;;  %v7348_v57 = vld [vmem:[%s10220_s3 + $0x448] ss:$16 sps:$4 sm:$0xff]   ;;  %v7353_v53 = vld [vmem:[%s10220_s3 + $0x46c] ss:$16 sps:$4 sm:$0xff]   ;;  %v7426_v54 = vld [vmem:[%s10220_s3 + $0x740] ss:$16 sps:$4 sm:$0xff]  }
 0x263   :  { %v9608_v1 = vpack.c.bf16 %v3539_v0, %v3531_v33  ;;  %v3540_v3 = vsel %vm3508_vm11, %v7002_v58, %v3524_v62  ;;  %5339 = vmatpush1.bf16.msra.mxu1 %v7315_v61  ;;  %v7434_v28 = vld [vmem:[%s10220_s3 + $0x764] ss:$16 sps:$4 sm:$0xff]   ;;  %v7351_v55 = vld [vmem:[%s10220_s3 + $0x468] ss:$16 sps:$4 sm:$0xff]   ;;  %v7356_v36 = vld [vmem:[%s10220_s3 + $0x48c] ss:$16 sps:$4 sm:$0xff]  }
 0x264   :  { %v9610_v30 = vpack.c.bf16 %v3540_v3, %v3532_v2  ;;  %5340 = vmatprep.subr.bf16.mxu1 %v7320_v63  ;;  %v7432_v56 = vld [vmem:[%s10220_s3 + $0x760] ss:$16 sps:$4 sm:$0xff]   ;;  %v7440_v58 = vld [vmem:[%s10220_s3 + $0x784] ss:$16 sps:$4 sm:$0xff]   ;;  %v7354_v60 = vld [vmem:[%s10220_s3 + $0x488] ss:$16 sps:$4 sm:$0xff]  }
 0x265   :  { %v7359_v61 = vld [vmem:[%s10220_s3 + $0x4ac] ss:$16 sps:$4 sm:$0xff]   ;;  %v7438_v62 = vld [vmem:[%s10220_s3 + $0x780] ss:$16 sps:$4 sm:$0xff]   ;;  %v7446_v63 = vld [vmem:[%s10220_s3 + $0x7a4] ss:$16 sps:$4 sm:$0xff]  }
 0x266   :  { %5227 = vmatprep.mubr.bf16.mxu0 %v9610_v30  ;;  %v7357_v33 = vld [vmem:[%s10220_s3 + $0x4a8] ss:$16 sps:$4 sm:$0xff]   ;;  %v7362_v0 = vld [vmem:[%s10220_s3 + $0x4cc] ss:$16 sps:$4 sm:$0xff]   ;;  %v7444_v2 = vld [vmem:[%s10220_s3 + $0x7a0] ss:$16 sps:$4 sm:$0xff]  }
 0x267   :  { %5228 = vmatmul.mubr.bf16.vlgmr.msra.gmra.mrb[8].mxu0 %v9608_v1  ;;  %5341 = vmatpush1.bf16.msra.mxu1 %v7318_v4  ;;  %v7360_v3 = vld [vmem:[%s10220_s3 + $0x4c8] ss:$16 sps:$4 sm:$0xff]   ;;  %v7365_v4 = vld [vmem:[%s10220_s3 + $0x4ec] ss:$16 sps:$4 sm:$0xff]  }
 0x268   :  { %5239 = vmatpush1.bf16.msra.mxu0 %v7366_v5  ;;  %5342 = vmatprep.subr.bf16.mxu1 %v7323_v6  ;;  %v7450_v5 = vld [vmem:[%s10220_s3 + $0x7c0] ss:$16 sps:$4 sm:$0xff]   ;;  %v7458_v6 = vld [vmem:[%s10220_s3 + $0x7e4] ss:$16 sps:$4 sm:$0xff]  }
 0x269   :  { %5240 = vmatprep.subr.bf16.mxu0 %v7374_v8  ;;  %v7363_v8 = vld [vmem:[%s10220_s3 + $0x4e8] ss:$16 sps:$4 sm:$0xff]  }
 0x26b   :  { %5343 = vmatpush1.bf16.msra.mxu1 %v7321_v34  ;;  %v7371_v34 = vld [vmem:[%s10220_s3 + $0x50c] ss:$16 sps:$4 sm:$0xff]  }
 0x26c   :  { %5241 = vmatpush1.bf16.msra.mxu0 %v7372_v9  ;;  %5344 = vmatprep.subr.bf16.mxu1 %v7326_v10  ;;  %v7456_v9 = vld [vmem:[%s10220_s3 + $0x7e0] ss:$16 sps:$4 sm:$0xff]   ;;  %v7488_v10 = vld [vmem:[%s10222_s5 + $0x4] ss:$8 sps:$4 sm:$0xff]  }
 0x26d   :  { %5242 = vmatprep.subr.bf16.mxu0 %v7380_v35  ;;  %v7369_v35 = vld [vmem:[%s10220_s3 + $0x508] ss:$16 sps:$4 sm:$0xff]  }
 0x26f   :  { %5345 = vmatpush1.bf16.msra.mxu1 %v7324_v13  ;;  %v7377_v13 = vld [vmem:[%s10220_s3 + $0x52c] ss:$16 sps:$4 sm:$0xff]  }
 0x270   :  { %5243 = vmatpush1.bf16.msra.mxu0 %v7378_v37  ;;  %5346 = vmatprep.subr.bf16.mxu1 %v7329_v14  ;;  %v7375_v37 = vld [vmem:[%s10220_s3 + $0x528] ss:$16 sps:$4 sm:$0xff]   ;;  %v7383_v14 = vld [vmem:[%s10220_s3 + $0x54c] ss:$16 sps:$4 sm:$0xff]  }
 0x271   :  { %5244 = vmatprep.subr.bf16.mxu0 %v7386_v17  ;;  %v7381_v17 = vld [vmem:[%s10220_s3 + $0x548] ss:$16 sps:$4 sm:$0xff]  }
 0x273   :  { %5347 = vmatpush1.bf16.msra.mxu1 %v7327_v18  ;;  %v7389_v18 = vld [vmem:[%s10220_s3 + $0x56c] ss:$16 sps:$4 sm:$0xff]  }
 0x274   :  { %5245 = vmatpush1.bf16.msra.mxu0 %v7384_v7  ;;  %5348 = vmatprep.subr.bf16.mxu1 %v7332_v41  ;;  %v7387_v7 = vld [vmem:[%s10220_s3 + $0x568] ss:$16 sps:$4 sm:$0xff]   ;;  %v7395_v41 = vld [vmem:[%s10220_s3 + $0x58c] ss:$16 sps:$4 sm:$0xff]  }
 0x275   :  { %5246 = vmatprep.subr.bf16.mxu0 %v7392_v19  ;;  %v7393_v19 = vld [vmem:[%s10220_s3 + $0x588] ss:$16 sps:$4 sm:$0xff]  }
 0x277   :  { %5349 = vmatpush1.bf16.msra.mxu1 %v7330_v20  ;;  %v7401_v20 = vld [vmem:[%s10220_s3 + $0x5ac] ss:$16 sps:$4 sm:$0xff]  }
 0x278   :  { %5247 = vmatpush1.bf16.msra.mxu0 %v7390_v47  ;;  %5350 = vmatprep.subr.bf16.mxu1 %v7335_v21  ;;  %v7399_v47 = vld [vmem:[%s10220_s3 + $0x5a8] ss:$16 sps:$4 sm:$0xff]   ;;  %v7407_v21 = vld [vmem:[%s10220_s3 + $0x5cc] ss:$16 sps:$4 sm:$0xff]  }
 0x279   :  { %5248 = vmatprep.subr.bf16.mxu0 %v7398_v12  ;;  %v7405_v12 = vld [vmem:[%s10220_s3 + $0x5c8] ss:$16 sps:$4 sm:$0xff]  }
 0x27b   :  { %5351 = vmatpush1.bf16.msra.mxu1 %v7333_v23  ;;  %v7413_v23 = vld [vmem:[%s10220_s3 + $0x5ec] ss:$16 sps:$4 sm:$0xff]  }
 0x27c   :  { %5249 = vmatpush1.bf16.msra.mxu0 %v7396_v24  ;;  %5352 = vmatprep.subr.bf16.mxu1 %v7338_v25  ;;  %v7411_v24 = vld [vmem:[%s10220_s3 + $0x5e8] ss:$16 sps:$4 sm:$0xff]   ;;  %v7419_v25 = vld [vmem:[%s10220_s3 + $0x60c] ss:$16 sps:$4 sm:$0xff]  }
 0x27d   :  { %5250 = vmatprep.subr.bf16.mxu0 %v7404_v26  ;;  %v7417_v26 = vld [vmem:[%s10220_s3 + $0x608] ss:$16 sps:$4 sm:$0xff]  }
 0x27f   :  { %5353 = vmatpush1.bf16.msra.mxu1 %v7336_v29  ;;  %v7425_v29 = vld [vmem:[%s10220_s3 + $0x62c] ss:$16 sps:$4 sm:$0xff]  }
 0x280   :  { %5251 = vmatpush1.bf16.msra.mxu0 %v7402_v15  ;;  %5354 = vmatprep.subr.bf16.mxu1 %v7341_v31  ;;  %v7423_v15 = vld [vmem:[%s10220_s3 + $0x628] ss:$16 sps:$4 sm:$0xff]   ;;  %v7431_v31 = vld [vmem:[%s10220_s3 + $0x64c] ss:$16 sps:$4 sm:$0xff]  }
 0x281   :  { %5252 = vmatprep.subr.bf16.mxu0 %v7410_v32  ;;  %v7429_v32 = vld [vmem:[%s10220_s3 + $0x648] ss:$16 sps:$4 sm:$0xff]  }
 0x283   :  { %5355 = vmatpush1.bf16.msra.mxu1 %v7339_v38  ;;  %v7435_v38 = vld [vmem:[%s10220_s3 + $0x668] ss:$16 sps:$4 sm:$0xff]  }
 0x284   :  { %5253 = vmatpush1.bf16.msra.mxu0 %v7408_v39  ;;  %5367 = vmatprep.subr.bf16.mxu1 %v7344_v40  ;;  %v7443_v39 = vld [vmem:[%s10220_s3 + $0x68c] ss:$16 sps:$4 sm:$0xff]   ;;  %v517_v40 = vsub.s32 6, %v8870_v27 }
 0x285   :  { %5254 = vmatprep.subr.bf16.mxu0 %v7416_v48  ;;  %v7441_v48 = vld [vmem:[%s10220_s3 + $0x688] ss:$16 sps:$4 sm:$0xff]  }
 0x286   :  { %5357 = vmatmul.mubr.bf16.vlgmr.msra.gmra.mrb[12].mxu1 %v9343_v11  ;;  %v7428_v11 = vld [vmem:[%s10220_s3 + $0x744] ss:$16 sps:$4 sm:$0xff]  }
 0x287   :  { %5368 = vmatpush1.bf16.msra.mxu1 %v7342_v49  ;;  %5399 = vmatprep.mubr.bf16.mxu1 %v9610_v30  ;;  %v7452_v30 = vld [vmem:[%s10220_s3 + $0x7c4] ss:$16 sps:$4 sm:$0xff]   ;;  %v521_v49 = vsub.s32 7, %v8870_v27 }
 0x288   :  { %5369 = vmatprep.subr.bf16.mxu1 %v7347_v59  ;;  %5255 = vmatpush1.bf16.msra.mxu0 %v7414_v16  ;;  %v7449_v59 = vld [vmem:[%s10220_s3 + $0x6ac] ss:$16 sps:$4 sm:$0xff]   ;;  %v518_v16 = vrot.slane %v9586_v44, %v517_v40  ;;  %v7483_v40 = vld [vmem:[%s10220_s3 + $0x7e8] ss:$16 sps:$4 sm:$0xff]  }
 0x289   :  { %5256 = vmatprep.subr.bf16.mxu0 %v7422_v50  ;;  %v522_v50 = vrot.slane %v9586_v44, %v521_v49  ;;  %v7510_v49 = vld [vmem:[%s10222_s5 + $0x80] ss:$8 sps:$4 sm:$0xff]  }
 0x28b   :  { %5370 = vmatpush1.bf16.msra.mxu1 %v7345_v51  ;;  %v7447_v51 = vld [vmem:[%s10220_s3 + $0x6a8] ss:$16 sps:$4 sm:$0xff]  }
 0x28c   :  { %5371 = vmatprep.subr.bf16.mxu1 %v7350_v22  ;;  %5257 = vmatpush1.bf16.msra.mxu0 %v7420_v52  ;;  %v7455_v22 = vld [vmem:[%s10220_s3 + $0x6cc] ss:$16 sps:$4 sm:$0xff]  }
 0x28d   :  { %5258 = vmatprep.subr.bf16.mxu0 %v7428_v11 }
 0x28f   :  { %5372 = vmatpush1.bf16.msra.mxu1 %v7348_v57 }
 0x290   :  { %5373 = vmatprep.subr.bf16.mxu1 %v7353_v53  ;;  %5259 = vmatpush1.bf16.msra.mxu0 %v7426_v54 }
 0x291   :  { %5260 = vmatprep.subr.bf16.mxu0 %v7434_v28  ;;  %v7453_v28 = vld [vmem:[%s10220_s3 + $0x6c8] ss:$16 sps:$4 sm:$0xff]  }
 0x293   :  { %5374 = vmatpush1.bf16.msra.mxu1 %v7351_v55 }
 0x294   :  { %5375 = vmatprep.subr.bf16.mxu1 %v7356_v36  ;;  %5261 = vmatpush1.bf16.msra.mxu0 %v7432_v56  ;;  %v7461_v56 = vld [vmem:[%s10220_s3 + $0x6ec] ss:$16 sps:$4 sm:$0xff]  }
 0x295   :  { %5262 = vmatprep.subr.bf16.mxu0 %v7440_v58 }
 0x297   :  { %5376 = vmatpush1.bf16.msra.mxu1 %v7354_v60 }
 0x298   :  { %5377 = vmatprep.subr.bf16.mxu1 %v7359_v61  ;;  %5263 = vmatpush1.bf16.msra.mxu0 %v7438_v62 }
 0x299   :  { %5264 = vmatprep.subr.bf16.mxu0 %v7446_v63  ;;  %v7459_v63 = vld [vmem:[%s10220_s3 + $0x6e8] ss:$16 sps:$4 sm:$0xff]  }
 0x29b   :  { %5378 = vmatpush1.bf16.msra.mxu1 %v7357_v33 }
 0x29c   :  { %5379 = vmatprep.subr.bf16.mxu1 %v7362_v0  ;;  %5265 = vmatpush1.bf16.msra.mxu0 %v7444_v2 }
 0x29d   :  { %5266 = vmatprep.subr.bf16.mxu0 %v7452_v30 }
 0x29f   :  { %5380 = vmatpush1.bf16.msra.mxu1 %v7360_v3 }
 0x2a0   :  { %5381 = vmatprep.subr.bf16.mxu1 %v7365_v4  ;;  %5267 = vmatpush1.bf16.msra.mxu0 %v7450_v5  ;;  %v7464_v4 = vld [vmem:[%s10220_s3 + $0x70c] ss:$16 sps:$4 sm:$0xff]  }
 0x2a1   :  { %5268 = vmatprep.subr.bf16.mxu0 %v7458_v6  ;;  %v7486_v6 = vld [vmem:[%s10222_s5] ss:$8 sps:$4 sm:$0xff]  }
 0x2a3   :  { %5382 = vmatpush1.bf16.msra.mxu1 %v7363_v8  ;;  %v7462_v8 = vld [vmem:[%s10220_s3 + $0x708] ss:$16 sps:$4 sm:$0xff]  }
 0x2a4   :  { %5383 = vmatprep.subr.bf16.mxu1 %v7371_v34  ;;  %5269 = vmatpush1.bf16.msra.mxu0 %v7456_v9  ;;  %v7491_v34 = vld [vmem:[%s10222_s5 + $0x14] ss:$8 sps:$4 sm:$0xff]  }
 0x2a5   :  { %5877 = vmatprep.subr.bf16.mxu0 %v7488_v10  ;;  %v7467_v9 = vld [vmem:[%s10220_s3 + $0x72c] ss:$16 sps:$4 sm:$0xff]   ;;  %v7489_v10 = vld [vmem:[%s10222_s5 + $0x10] ss:$8 sps:$4 sm:$0xff]  }
 0x2a7   :  { %5384 = vmatpush1.bf16.msra.mxu1 %v7369_v35  ;;  %v7465_v35 = vld [vmem:[%s10220_s3 + $0x728] ss:$16 sps:$4 sm:$0xff]  }
 0x2a8   :  { %5385 = vmatprep.subr.bf16.mxu1 %v7377_v13  ;;  %v7494_v13 = vld [vmem:[%s10222_s5 + $0x24] ss:$8 sps:$4 sm:$0xff]  }
 0x2ab   :  { %5386 = vmatpush1.bf16.msra.mxu1 %v7375_v37  ;;  %v7470_v37 = vld [vmem:[%s10220_s3 + $0x74c] ss:$16 sps:$4 sm:$0xff]  }
 0x2ac   :  { %5387 = vmatprep.subr.bf16.mxu1 %v7383_v14  ;;  %v7492_v14 = vld [vmem:[%s10222_s5 + $0x20] ss:$8 sps:$4 sm:$0xff]  }
 0x2af   :  { %5388 = vmatpush1.bf16.msra.mxu1 %v7381_v17  ;;  %v7468_v17 = vld [vmem:[%s10220_s3 + $0x748] ss:$16 sps:$4 sm:$0xff]  }
 0x2b0   :  { %5389 = vmatprep.subr.bf16.mxu1 %v7389_v18  ;;  %v7497_v18 = vld [vmem:[%s10222_s5 + $0x34] ss:$8 sps:$4 sm:$0xff]  }
 0x2b3   :  { %5390 = vmatpush1.bf16.msra.mxu1 %v7387_v7  ;;  %v7473_v7 = vld [vmem:[%s10220_s3 + $0x76c] ss:$16 sps:$4 sm:$0xff]  }
 0x2b4   :  { %5391 = vmatprep.subr.bf16.mxu1 %v7395_v41  ;;  %v7495_v41 = vld [vmem:[%s10222_s5 + $0x30] ss:$8 sps:$4 sm:$0xff]  }
 0x2b7   :  { %5392 = vmatpush1.bf16.msra.mxu1 %v7393_v19  ;;  %v7471_v19 = vld [vmem:[%s10220_s3 + $0x768] ss:$16 sps:$4 sm:$0xff]  }
 0x2b8   :  { %5393 = vmatprep.subr.bf16.mxu1 %v7401_v20  ;;  %v7500_v20 = vld [vmem:[%s10222_s5 + $0x44] ss:$8 sps:$4 sm:$0xff]  }
 0x2bb   :  { %5394 = vmatpush1.bf16.msra.mxu1 %v7399_v47  ;;  %v7476_v47 = vld [vmem:[%s10220_s3 + $0x78c] ss:$16 sps:$4 sm:$0xff]  }
 0x2bc   :  { %5395 = vmatprep.subr.bf16.mxu1 %v7407_v21  ;;  %v7498_v21 = vld [vmem:[%s10222_s5 + $0x40] ss:$8 sps:$4 sm:$0xff]  }
 0x2bf   :  { %5396 = vmatpush1.bf16.msra.mxu1 %v7405_v12  ;;  %v7474_v12 = vld [vmem:[%s10220_s3 + $0x788] ss:$16 sps:$4 sm:$0xff]  }
 0x2c0   :  { %5397 = vmatprep.subr.bf16.mxu1 %v7413_v23  ;;  %v7503_v23 = vld [vmem:[%s10222_s5 + $0x54] ss:$8 sps:$4 sm:$0xff]  }
 0x2c3   :  { %5398 = vmatpush1.bf16.msra.mxu1 %v7411_v24  ;;  %v7479_v24 = vld [vmem:[%s10220_s3 + $0x7ac] ss:$16 sps:$4 sm:$0xff]  }
 0x2c4   :  { %5410 = vmatprep.subr.bf16.mxu1 %v7419_v25  ;;  %v7501_v25 = vld [vmem:[%s10222_s5 + $0x50] ss:$8 sps:$4 sm:$0xff]  }
 0x2c6   :  { %5400 = vmatmul.mubr.bf16.vlgmr.msra.gmra.mrb[12].mxu1 %v9608_v1  ;;  %v7437_v1 = vld [vmem:[%s10220_s3 + $0x66c] ss:$16 sps:$4 sm:$0xff]  }
 0x2c7   :  { %5411 = vmatpush1.bf16.msra.mxu1 %v7417_v26  ;;  %v7477_v26 = vld [vmem:[%s10220_s3 + $0x7a8] ss:$16 sps:$4 sm:$0xff]  }
 0x2c8   :  { %5412 = vmatprep.subr.bf16.mxu1 %v7425_v29  ;;  %v7506_v29 = vld [vmem:[%s10222_s5 + $0x64] ss:$8 sps:$4 sm:$0xff]  }
 0x2cb   :  { %5413 = vmatpush1.bf16.msra.mxu1 %v7423_v15  ;;  %v7482_v15 = vld [vmem:[%s10220_s3 + $0x7cc] ss:$16 sps:$4 sm:$0xff]  }
 0x2cc   :  { %5414 = vmatprep.subr.bf16.mxu1 %v7431_v31  ;;  %v7504_v31 = vld [vmem:[%s10222_s5 + $0x60] ss:$8 sps:$4 sm:$0xff]  }
 0x2cf   :  { %5415 = vmatpush1.bf16.msra.mxu1 %v7429_v32  ;;  %v7480_v32 = vld [vmem:[%s10220_s3 + $0x7c8] ss:$16 sps:$4 sm:$0xff]  }
 0x2d0   :  { %5416 = vmatprep.subr.bf16.mxu1 %v7437_v1  ;;  %v7509_v1 = vld [vmem:[%s10222_s5 + $0x74] ss:$8 sps:$4 sm:$0xff]  }
 0x2d3   :  { %5417 = vmatpush1.bf16.msra.mxu1 %v7435_v38  ;;  %v7485_v38 = vld [vmem:[%s10220_s3 + $0x7ec] ss:$16 sps:$4 sm:$0xff]  }
 0x2d4   :  { %5418 = vmatprep.subr.bf16.mxu1 %v7443_v39  ;;  %v7507_v39 = vld [vmem:[%s10222_s5 + $0x70] ss:$8 sps:$4 sm:$0xff]  }
 0x2d7   :  { %5419 = vmatpush1.bf16.msra.mxu1 %v7441_v48  ;;  %v7512_v48 = vld [vmem:[%s10222_s5 + $0x84] ss:$8 sps:$4 sm:$0xff]  }
 0x2d8   :  { %5420 = vmatprep.subr.bf16.mxu1 %v7449_v59  ;;  %v7515_v59 = vld [vmem:[%s10222_s5 + $0x94] ss:$8 sps:$4 sm:$0xff]  }
 0x2d9   :  { %v3486_v52 = vpop.f32.mrb[8].mxu1 }
 0x2da   :  { %v7003_v11 = vadd.f32 %v3486_v52, %v518_v16  ;;  %v3488_v57 = vpop.f32.mrb[9].mxu1  ;;  %v7519_v52 = vld [vmem:[%s10222_s5 + $0xb0] ss:$8 sps:$4 sm:$0xff]  }
 0x2db   :  { %v7004_v53 = vadd.f32 %v3488_v57, %v522_v50  ;;  %v3490_v54 = vpop.f32.mrb[10].mxu1  ;;  %5421 = vmatpush1.bf16.msra.mxu1 %v7447_v51  ;;  %v7516_v51 = vld [vmem:[%s10222_s5 + $0xa0] ss:$8 sps:$4 sm:$0xff]  }
 0x2dc   :  { %v3517_v44 = vmul.f32 0.2, %v7003_v11  ;;  %v7005_v55 = vadd.f32 %v3490_v54, %v518_v16  ;;  %v3492_v36 = vpop.f32.mrb[11].mxu1  ;;  %5422 = vmatprep.subr.bf16.mxu1 %v7455_v22  ;;  %vm3501_vm12 = vcmp.gt.f32.partialorder %v7003_v11, 0.0  ;;  %v7513_v16 = vld [vmem:[%s10222_s5 + $0x90] ss:$8 sps:$4 sm:$0xff]  }
 0x2dd   :  { %v3518_v58 = vmul.f32 0.2, %v7004_v53  ;;  %v7006_v60 = vadd.f32 %v3492_v36, %v522_v50  ;;  %vm3502_vm13 = vcmp.gt.f32.partialorder %v7004_v53, 0.0  ;;  %v7518_v50 = vld [vmem:[%s10222_s5 + $0xa4] ss:$8 sps:$4 sm:$0xff]  }
 0x2de   :  { %vm3509_vm14 = vcmp.gt.f32.partialorder %v7005_v55, 0.0  ;;  %v3525_v61 = vmul.f32 0.2, %v7005_v55  ;;  %v3533_v33 = vsel %vm3501_vm12, %v7003_v11, %v3517_v44  ;;  %v7521_v22 = vld [vmem:[%s10222_s5 + $0xb4] ss:$8 sps:$4 sm:$0xff]  }
 0x2df   :  { %vm3510_vm15 = vcmp.gt.f32.partialorder %v7006_v60, 0.0  ;;  %v3526_v62 = vmul.f32 0.2, %v7006_v60  ;;  %5423 = vmatpush1.bf16.msra.mxu1 %v7453_v28  ;;  %v3534_v3 = vsel %vm3502_vm13, %v7004_v53, %v3518_v58  ;;  %v7524_v11 = vld [vmem:[%s10222_s5 + $0xc4] ss:$8 sps:$4 sm:$0xff]  }
 0x2e0   :  { %v3541_v0 = vsel %vm3509_vm14, %v7005_v55, %v3525_v61  ;;  %5424 = vmatprep.subr.bf16.mxu1 %v7461_v56  ;;  %v7522_v57 = vld [vmem:[%s10222_s5 + $0xc0] ss:$8 sps:$4 sm:$0xff]   ;;  %v7527_v53 = vld [vmem:[%s10222_s5 + $0xd4] ss:$8 sps:$4 sm:$0xff]   ;;  %v7525_v54 = vld [vmem:[%s10222_s5 + $0xd0] ss:$8 sps:$4 sm:$0xff]  }
 0x2e1   :  { %v9906_v2 = vpack.c.bf16 %v3541_v0, %v3533_v33  ;;  %v3542_v30 = vsel %vm3510_vm15, %v7006_v60, %v3526_v62  ;;  %v7530_v28 = vld [vmem:[%s10222_s5 + $0xe4] ss:$8 sps:$4 sm:$0xff]   ;;  %v7528_v44 = vld [vmem:[%s10222_s5 + $0xe0] ss:$8 sps:$4 sm:$0xff]   ;;  %v7533_v55 = vld [vmem:[%s10222_s5 + $0xf4] ss:$8 sps:$4 sm:$0xff]  }
 0x2e2   :  { %v3550_v5 = vpack.c.bf16 %v3542_v30, %v3534_v3  ;;  %v7531_v36 = vld [vmem:[%s10222_s5 + $0xf0] ss:$8 sps:$4 sm:$0xff]   ;;  %v7536_v56 = vld [vmem:[%s10222_s5 + $0x104] ss:$8 sps:$4 sm:$0xff]  }
 0x2e3   :  { %5425 = vmatpush1.bf16.msra.mxu1 %v7459_v63  ;;  %v7582_v58 = vld [vmem:[%s10223_s7 + $0x40] sm:$0xff]   ;;  %v7584_v61 = vld [vmem:[%s10223_s7 + $0x48] sm:$0xff]   ;;  %v7586_v63 = vld [vmem:[%s10223_s7 + $0x50] sm:$0xff]  }
 0x2e4   :  { %5270 = vmatprep.mubr.bf16.mxu0 %v3550_v5  ;;  %5442 = vmatprep.mubr.bf16.mxu1 %v3550_v5  ;;  %v7583_v60 = vld [vmem:[%s10223_s7] sm:$0xff]   ;;  %v7585_v62 = vld [vmem:[%s10223_s7 + $0x8] sm:$0xff]   ;;  %v7587_v33 = vld [vmem:[%s10223_s7 + $0x10] sm:$0xff]  }
 0x2e5   :  { %5271 = vmatmul.mubr.bf16.vlgmr.msra.gmra.mrb[8].mxu0 %v9906_v2  ;;  %5426 = vmatprep.subr.bf16.mxu1 %v7464_v4  ;;  %v7588_v0 = vld [vmem:[%s10223_s7 + $0x58] sm:$0xff]   ;;  %v7590_v3 = vld [vmem:[%s10223_s7 + $0x60] sm:$0xff]  }
 0x2e6   :  { %5878 = vmatpush1.bf16.msra.mxu0 %v7486_v6  ;;  %v7591_v30 = vld [vmem:[%s10223_s7 + $0x20] sm:$0xff]  }
 0x2e7   :  { %5427 = vmatpush1.bf16.msra.mxu1 %v7462_v8  ;;  %5879 = vmatprep.subr.bf16.mxu0 %v7491_v34  ;;  %v3807_v4 = vld [vmem:[%s10224_s4] sm:$0xf] }
 0x2e8   :  { %5428 = vmatprep.subr.bf16.mxu1 %v7467_v9  ;;  %v3812_v5 = vrot.slane %v3807_v4, %v8890_v43  ;;  %v3816_v6 = vrot.slane %v3807_v4, %v8896_v46 }
 0x2ea   :  { %5880 = vmatpush1.bf16.msra.mxu0 %v7489_v10 }
 0x2eb   :  { %5429 = vmatpush1.bf16.msra.mxu1 %v7465_v35  ;;  %5881 = vmatprep.subr.bf16.mxu0 %v7494_v13 }
 0x2ec   :  { %5430 = vmatprep.subr.bf16.mxu1 %v7470_v37 }
 0x2ee   :  { %5882 = vmatpush1.bf16.msra.mxu0 %v7492_v14 }
 0x2ef   :  { %5431 = vmatpush1.bf16.msra.mxu1 %v7468_v17  ;;  %5883 = vmatprep.subr.bf16.mxu0 %v7497_v18 }
 0x2f0   :  { %5432 = vmatprep.subr.bf16.mxu1 %v7473_v7 }
 0x2f2   :  { %5884 = vmatpush1.bf16.msra.mxu0 %v7495_v41 }
 0x2f3   :  { %5433 = vmatpush1.bf16.msra.mxu1 %v7471_v19  ;;  %5885 = vmatprep.subr.bf16.mxu0 %v7500_v20 }
 0x2f4   :  { %5434 = vmatprep.subr.bf16.mxu1 %v7476_v47 }
 0x2f6   :  { %5886 = vmatpush1.bf16.msra.mxu0 %v7498_v21 }
 0x2f7   :  { %5435 = vmatpush1.bf16.msra.mxu1 %v7474_v12  ;;  %5887 = vmatprep.subr.bf16.mxu0 %v7503_v23 }
 0x2f8   :  { %5436 = vmatprep.subr.bf16.mxu1 %v7479_v24  ;;  %v7534_v24 = vld [vmem:[%s10222_s5 + $0x100] ss:$8 sps:$4 sm:$0xff]  }
 0x2fa   :  { %5888 = vmatpush1.bf16.msra.mxu0 %v7501_v25  ;;  %v7539_v25 = vld [vmem:[%s10222_s5 + $0x114] ss:$8 sps:$4 sm:$0xff]  }
 0x2fb   :  { %5437 = vmatpush1.bf16.msra.mxu1 %v7477_v26  ;;  %5889 = vmatprep.subr.bf16.mxu0 %v7506_v29  ;;  %v7537_v26 = vld [vmem:[%s10222_s5 + $0x110] ss:$8 sps:$4 sm:$0xff]   ;;  %v7542_v29 = vld [vmem:[%s10222_s5 + $0x124] ss:$8 sps:$4 sm:$0xff]  }
 0x2fc   :  { %5438 = vmatprep.subr.bf16.mxu1 %v7482_v15  ;;  %v7540_v15 = vld [vmem:[%s10222_s5 + $0x120] ss:$8 sps:$4 sm:$0xff]  }
 0x2fe   :  { %5890 = vmatpush1.bf16.msra.mxu0 %v7504_v31  ;;  %v7545_v31 = vld [vmem:[%s10222_s5 + $0x134] ss:$8 sps:$4 sm:$0xff]  }
 0x2ff   :  { %5439 = vmatpush1.bf16.msra.mxu1 %v7480_v32  ;;  %5891 = vmatprep.subr.bf16.mxu0 %v7509_v1  ;;  %v7543_v32 = vld [vmem:[%s10222_s5 + $0x130] ss:$8 sps:$4 sm:$0xff]   ;;  %v7548_v1 = vld [vmem:[%s10222_s5 + $0x144] ss:$8 sps:$4 sm:$0xff]  }
 0x300   :  { %5440 = vmatprep.subr.bf16.mxu1 %v7485_v38  ;;  %v7546_v38 = vld [vmem:[%s10222_s5 + $0x140] ss:$8 sps:$4 sm:$0xff]  }
 0x302   :  { %5892 = vmatpush1.bf16.msra.mxu0 %v7507_v39  ;;  %v7551_v39 = vld [vmem:[%s10222_s5 + $0x154] ss:$8 sps:$4 sm:$0xff]  }
 0x303   :  { %5441 = vmatpush1.bf16.msra.mxu1 %v7483_v40  ;;  %5893 = vmatprep.subr.bf16.mxu0 %v7512_v48  ;;  %v7549_v40 = vld [vmem:[%s10222_s5 + $0x150] ss:$8 sps:$4 sm:$0xff]   ;;  %v3820_v48 = vrot.slane %v3807_v4, %v501_v42  ;;  %v7557_v42 = vld [vmem:[%s10222_s5 + $0x174] ss:$8 sps:$4 sm:$0xff]  }
 0x304   :  { %6965 = vmatprep.subr.bf16.mxu1 %v7582_v58 }
 0x306   :  { %5443 = vmatmul.mubr.bf16.vlgmr.msra.gmra.mrb[12].mxu1 %v9906_v2  ;;  %5894 = vmatpush1.bf16.msra.mxu0 %v7510_v49  ;;  %v7589_v2 = vld [vmem:[%s10223_s7 + $0x18] sm:$0xff]   ;;  %v7554_v49 = vld [vmem:[%s10222_s5 + $0x164] ss:$8 sps:$4 sm:$0xff]  }
 0x307   :  { %5895 = vmatprep.subr.bf16.mxu0 %v7515_v59  ;;  %6966 = vmatpush3.bf16.msra.mxu1 %v7583_v60  ;;  %v3824_v59 = vrot.slane %v3807_v4, %v505_v45  ;;  %v7569_v4 = vld [vmem:[%s10222_s5 + $0x1b4] ss:$8 sps:$4 sm:$0xff]  }
 0x308   :  { %6967 = vmatprep.subr.bf16.mxu1 %v7584_v61  ;;  %v7558_v61 = vld [vmem:[%s10222_s5 + $0x180] ss:$8 sps:$4 sm:$0xff]  }
 0x30a   :  { %5896 = vmatpush1.bf16.msra.mxu0 %v7513_v16 }
 0x30b   :  { %5897 = vmatprep.subr.bf16.mxu0 %v7518_v50  ;;  %6968 = vmatpush3.bf16.msra.mxu1 %v7585_v62  ;;  %v7552_v50 = vld [vmem:[%s10222_s5 + $0x160] ss:$8 sps:$4 sm:$0xff]  }
 0x30c   :  { %6969 = vmatprep.subr.bf16.mxu1 %v7586_v63 }
 0x30e   :  { %5898 = vmatpush1.bf16.msra.mxu0 %v7516_v51 }
 0x30f   :  { %5899 = vmatprep.subr.bf16.mxu0 %v7521_v22  ;;  %6970 = vmatpush3.bf16.msra.mxu1 %v7587_v33 }
 0x310   :  { %6971 = vmatprep.subr.bf16.mxu1 %v7588_v0  ;;  %v7563_v0 = vld [vmem:[%s10222_s5 + $0x194] ss:$8 sps:$4 sm:$0xff]  }
 0x312   :  { %5900 = vmatpush1.bf16.msra.mxu0 %v7519_v52 }
 0x313   :  { %5901 = vmatprep.subr.bf16.mxu0 %v7524_v11  ;;  %6972 = vmatpush3.bf16.msra.mxu1 %v7589_v2  ;;  %v7561_v2 = vld [vmem:[%s10222_s5 + $0x190] ss:$8 sps:$4 sm:$0xff]  }
 0x314   :  { %6973 = vmatprep.subr.bf16.mxu1 %v7590_v3  ;;  %v7566_v3 = vld [vmem:[%s10222_s5 + $0x1a4] ss:$8 sps:$4 sm:$0xff]  }
 0x316   :  { %5902 = vmatpush1.bf16.msra.mxu0 %v7522_v57 }
 0x317   :  { %5903 = vmatprep.subr.bf16.mxu0 %v7527_v53  ;;  %6974 = vmatpush3.bf16.msra.mxu1 %v7591_v30  ;;  %v7564_v30 = vld [vmem:[%s10222_s5 + $0x1a0] ss:$8 sps:$4 sm:$0xff]  }
 0x31a   :  { %5904 = vmatpush1.bf16.msra.mxu0 %v7525_v54 }
 0x31b   :  { %5905 = vmatprep.subr.bf16.mxu0 %v7530_v28  ;;  %v7555_v28 = vld [vmem:[%s10222_s5 + $0x170] ss:$8 sps:$4 sm:$0xff]  }
 0x31e   :  { %5906 = vmatpush1.bf16.msra.mxu0 %v7528_v44 }
 0x31f   :  { %5907 = vmatprep.subr.bf16.mxu0 %v7533_v55  ;;  %v7560_v55 = vld [vmem:[%s10222_s5 + $0x184] ss:$8 sps:$4 sm:$0xff]  }
 0x322   :  { %5908 = vmatpush1.bf16.msra.mxu0 %v7531_v36 }
 0x323   :  { %5920 = vmatprep.subr.bf16.mxu0 %v7536_v56 }
 0x3b8   :  { %v5272_v8 = vpop.f32.mrb[8].mxu0 }
 0x3b9   :  { %v7007_v34 = vadd.f32 %v5272_v8, %v3812_v5  ;;  %v5274_v9 = vpop.f32.mrb[9].mxu0  ;;  %v7570_v8 = vld [vmem:[%s10222_s5 + $0x1c0] ss:$8 sps:$4 sm:$0xff]  }
 0x3ba   :  { %v7008_v10 = vadd.f32 %v5274_v9, %v3816_v6  ;;  %v5276_v35 = vpop.f32.mrb[10].mxu0  ;;  %v7573_v9 = vld [vmem:[%s10222_s5 + $0x1d0] ss:$8 sps:$4 sm:$0xff]  }
 0x3bb   :  { %v5461_v13 = vmul.f32 0.2, %v7007_v34  ;;  %v7009_v37 = vadd.f32 %v5276_v35, %v3812_v5  ;;  %v5278_v14 = vpop.f32.mrb[11].mxu0  ;;  %vm5453_vm0 = vcmp.gt.f32.partialorder %v7007_v34, 0.0  ;;  %v7567_v5 = vld [vmem:[%s10222_s5 + $0x1b0] ss:$8 sps:$4 sm:$0xff]  }
 0x3bc   :  { %v5462_v17 = vmul.f32 0.2, %v7008_v10  ;;  %v7010_v18 = vadd.f32 %v5278_v14, %v3816_v6  ;;  %vm5454_vm1 = vcmp.gt.f32.partialorder %v7008_v10, 0.0  ;;  %v7572_v6 = vld [vmem:[%s10222_s5 + $0x1c4] ss:$8 sps:$4 sm:$0xff]  }
 0x3bd   :  { %vm5457_vm2 = vcmp.gt.f32.partialorder %v7009_v37, 0.0  ;;  %v5465_v7 = vmul.f32 0.2, %v7009_v37  ;;  %v5469_v19 = vsel %vm5453_vm0, %v7007_v34, %v5461_v13  ;;  %v7575_v34 = vld [vmem:[%s10222_s5 + $0x1d4] ss:$8 sps:$4 sm:$0xff]   ;;  %v7592_v14 = vld [vmem:[%s10223_s7 + $0x68] sm:$0xff]  }
 0x3be   :  { %vm5458_vm3 = vcmp.gt.f32.partialorder %v7010_v18, 0.0  ;;  %v5466_v41 = vmul.f32 0.2, %v7010_v18  ;;  %v5470_v21 = vsel %vm5454_vm1, %v7008_v10, %v5462_v17  ;;  %v7578_v10 = vld [vmem:[%s10222_s5 + $0x1e4] ss:$8 sps:$4 sm:$0xff]   ;;  %6975 = vmatprep.subr.bf16.mxu1 %v7592_v14 }
 0x3bf   :  { %v5473_v20 = vsel %vm5457_vm2, %v7009_v37, %v5465_v7  ;;  %v7576_v35 = vld [vmem:[%s10222_s5 + $0x1e0] ss:$8 sps:$4 sm:$0xff]   ;;  %v7581_v13 = vld [vmem:[%s10222_s5 + $0x1f4] ss:$8 sps:$4 sm:$0xff]   ;;  %v7579_v37 = vld [vmem:[%s10222_s5 + $0x1f0] ss:$8 sps:$4 sm:$0xff]  }
 0x3c0   :  { %v5477_v47 = vpack.c.bf16 %v5473_v20, %v5469_v19  ;;  %v5474_v12 = vsel %vm5458_vm3, %v7010_v18, %v5466_v41  ;;  %v7593_v17 = vld [vmem:[%s10223_s7 + $0x28] sm:$0xff]   ;;  %v7594_v18 = vld [vmem:[%s10223_s7 + $0x70] sm:$0xff]   ;;  %v7596_v41 = vld [vmem:[%s10223_s7 + $0x78] sm:$0xff]  }
 0x3c1   :  { %v5478_v23 = vpack.c.bf16 %v5474_v12, %v5470_v21  ;;  %6976 = vmatpush3.bf16.msra.mxu1 %v7593_v17  ;;  %v7595_v7 = vld [vmem:[%s10223_s7 + $0x30] sm:$0xff]   ;;  %v7597_v19 = vld [vmem:[%s10223_s7 + $0x38] sm:$0xff]   ;;  %v5545_v20 = vld [vmem:[%s10225_s6] sm:$0x3] }
 0x3c2   :  { %6977 = vmatprep.subr.bf16.mxu1 %v7594_v18  ;;  %v5554_v21 = vrot.slane %v5545_v20, %v8896_v46 }
 0x3c3   :  { %5909 = vmatprep.mubr.bf16.mxu0 %v5478_v23 }
 0x3c4   :  { %5910 = vmatmul.mubr.bf16.vlgmr.msra.gmra.mrb[12].mxu0 %v5477_v47  ;;  %v5550_v47 = vrot.slane %v5545_v20, %v8890_v43 }
 0x3c5   :  { %5921 = vmatpush1.bf16.msra.mxu0 %v7534_v24  ;;  %6978 = vmatpush3.bf16.msra.mxu1 %v7595_v7 }
 0x3c6   :  { %5922 = vmatprep.subr.bf16.mxu0 %v7539_v25  ;;  %6979 = vmatprep.subr.bf16.mxu1 %v7596_v41 }
 0x3c9   :  { %5923 = vmatpush1.bf16.msra.mxu0 %v7537_v26  ;;  %6980 = vmatpush3.bf16.msra.mxu1 %v7597_v19 }
 0x3ca   :  { %5924 = vmatprep.subr.bf16.mxu0 %v7542_v29 }
 0x3cd   :  { %5925 = vmatpush1.bf16.msra.mxu0 %v7540_v15 }
 0x3ce   :  { %5926 = vmatprep.subr.bf16.mxu0 %v7545_v31 }
 0x3d1   :  { %5927 = vmatpush1.bf16.msra.mxu0 %v7543_v32 }
 0x3d2   :  { %5928 = vmatprep.subr.bf16.mxu0 %v7548_v1 }
 0x3d5   :  { %5929 = vmatpush1.bf16.msra.mxu0 %v7546_v38 }
 0x3d6   :  { %5930 = vmatprep.subr.bf16.mxu0 %v7551_v39 }
 0x3d9   :  { %5931 = vmatpush1.bf16.msra.mxu0 %v7549_v40  ;;  %v5444_v16 = vpop.f32.mrb[12].mxu1 }
 0x3da   :  { %v7011_v51 = vadd.f32 %v5444_v16, %v3820_v48  ;;  %v5446_v22 = vpop.f32.mrb[13].mxu1  ;;  %5932 = vmatprep.subr.bf16.mxu0 %v7554_v49 }
 0x3db   :  { %v7012_v52 = vadd.f32 %v5446_v22, %v3824_v59  ;;  %v5448_v11 = vpop.f32.mrb[14].mxu1 }
 0x3dc   :  { %v5463_v57 = vmul.f32 0.2, %v7011_v51  ;;  %v7013_v53 = vadd.f32 %v5448_v11, %v3820_v48  ;;  %v5450_v54 = vpop.f32.mrb[15].mxu1  ;;  %vm5455_vm4 = vcmp.gt.f32.partialorder %v7011_v51, 0.0 }
 0x3dd   :  { %v5464_v27 = vmul.f32 0.2, %v7012_v52  ;;  %v7014_v45 = vadd.f32 %v5450_v54, %v3824_v59  ;;  %5933 = vmatpush1.bf16.msra.mxu0 %v7552_v50  ;;  %vm5456_vm5 = vcmp.gt.f32.partialorder %v7012_v52, 0.0  ;;  %v6946_v50 = vld [vmem:[%s10226_s8] ss:$0 sm:$0xff] }
 0x3de   :  { %vm5459_vm6 = vcmp.gt.f32.partialorder %v7013_v53, 0.0  ;;  %v5467_v44 = vmul.f32 0.2, %v7013_v53  ;;  %5934 = vmatprep.subr.bf16.mxu0 %v7557_v42  ;;  %v5471_v56 = vsel %vm5455_vm4, %v7011_v51, %v5463_v57 }
 0x3df   :  { %vm5460_vm7 = vcmp.gt.f32.partialorder %v7014_v45, 0.0  ;;  %v5468_v36 = vmul.f32 0.2, %v7014_v45  ;;  %v5472_v62 = vsel %vm5456_vm5, %v7012_v52, %v5464_v27 }
 0x3e0   :  { %v5475_v58 = vsel %vm5459_vm6, %v7013_v53, %v5467_v44 }
 0x3e1   :  { %v5479_v60 = vpack.c.bf16 %v5475_v58, %v5471_v56  ;;  %5935 = vmatpush1.bf16.msra.mxu0 %v7555_v28  ;;  %v5476_v63 = vsel %vm5460_vm7, %v7014_v45, %v5468_v36 }
 0x3e2   :  { %5936 = vmatprep.subr.bf16.mxu0 %v7560_v55  ;;  %v5480_v33 = vpack.c.bf16 %v5476_v63, %v5472_v62 }
 0x3e4   :  { %5952 = vmatprep.mubr.bf16.mxu0 %v5480_v33 }
 0x3e5   :  { %5937 = vmatpush1.bf16.msra.mxu0 %v7558_v61 }
 0x3e6   :  { %5938 = vmatprep.subr.bf16.mxu0 %v7563_v0 }
 0x3e9   :  { %5939 = vmatpush1.bf16.msra.mxu0 %v7561_v2 }
 0x3ea   :  { %5940 = vmatprep.subr.bf16.mxu0 %v7566_v3 }
 0x3ed   :  { %5941 = vmatpush1.bf16.msra.mxu0 %v7564_v30 }
 0x3ee   :  { %5942 = vmatprep.subr.bf16.mxu0 %v7569_v4 }
 0x3f1   :  { %5943 = vmatpush1.bf16.msra.mxu0 %v7567_v5 }
 0x3f2   :  { %5944 = vmatprep.subr.bf16.mxu0 %v7572_v6 }
 0x3f5   :  { %5945 = vmatpush1.bf16.msra.mxu0 %v7570_v8 }
 0x3f6   :  { %5946 = vmatprep.subr.bf16.mxu0 %v7575_v34 }
 0x3f9   :  { %5947 = vmatpush1.bf16.msra.mxu0 %v7573_v9 }
 0x3fa   :  { %5948 = vmatprep.subr.bf16.mxu0 %v7578_v10 }
 0x3fd   :  { %5949 = vmatpush1.bf16.msra.mxu0 %v7576_v35 }
 0x3fe   :  { %5950 = vmatprep.subr.bf16.mxu0 %v7581_v13 }
 0x401   :  { %5951 = vmatpush1.bf16.msra.mxu0 %v7579_v37 }
 0x404   :  { %5953 = vmatmul.mubr.bf16.vlgmr.msra.gmra.mrb[12].mxu0 %v5479_v60 }
 0x4d7   :  { %v5954_v12 = vpop.f32.mrb[12].mxu0 }
 0x4d8   :  { %v7015_v23 = vadd.f32 %v5954_v12, %v5550_v47  ;;  %v5956_v24 = vpop.f32.mrb[13].mxu0 }
 0x4d9   :  { %v7016_v25 = vadd.f32 %v5956_v24, %v5554_v21  ;;  %v5958_v26 = vpop.f32.mrb[14].mxu0 }
 0x4da   :  { %v5967_v29 = vmul.f32 0.2, %v7015_v23  ;;  %v7017_v15 = vadd.f32 %v5958_v26, %v5550_v47  ;;  %v5960_v31 = vpop.f32.mrb[15].mxu0  ;;  %vm5963_vm8 = vcmp.gt.f32.partialorder %v7015_v23, 0.0 }
 0x4db   :  { %v5968_v32 = vmul.f32 0.2, %v7016_v25  ;;  %v7018_v1 = vadd.f32 %v5960_v31, %v5554_v21  ;;  %vm5964_vm9 = vcmp.gt.f32.partialorder %v7016_v25, 0.0 }
 0x4dc   :  { %vm5965_vm10 = vcmp.gt.f32.partialorder %v7017_v15, 0.0  ;;  %v5969_v38 = vmul.f32 0.2, %v7017_v15  ;;  %v5971_v40 = vsel %vm5963_vm8, %v7015_v23, %v5967_v29 }
 0x4dd   :  { %vm5966_vm11 = vcmp.gt.f32.partialorder %v7018_v1, 0.0  ;;  %v5970_v39 = vmul.f32 0.2, %v7018_v1  ;;  %v5972_v46 = vsel %vm5964_vm9, %v7016_v25, %v5968_v32 }
 0x4de   :  { %v5973_v43 = vsel %vm5965_vm10, %v7017_v15, %v5969_v38 }
 0x4df   :  { %v5975_v48 = vpack.c.bf16 %v5973_v43, %v5971_v40  ;;  %v5974_v49 = vsel %vm5966_vm11, %v7018_v1, %v5970_v39 }
 0x4e0   :  { %v5976_v59 = vpack.c.bf16 %v5974_v49, %v5972_v46 }
 0x4e2   :  { %6144 = vmatprep.mubr.bf16.mxu1 %v5976_v59 }
 0x4e3   :  { %6145 = vmatmul.mubr.bf16.vlgmr.msra.gmra.mrb[16].mxu1 %v5975_v48 }
 0x5b6   :  { %v6981_v16 = vpop.f32.mrb[16].mxu1 }
 0x5b7   :  { %v6982_v51 = vpop.f32.mrb[17].mxu1 }
 0x5b8   :  { %v6983_v22 = vadd.f32 %v6982_v51, %v6981_v16  ;;  %v6984_v42 = vpop.f32.mrb[18].mxu1 }
 0x5b9   :  { %v6985_v52 = vpop.f32.mrb[19].mxu1 }
 0x5ba   :  { %v6147_v11 = vadd.f32 %v6983_v22, %v6946_v50  ;;  %v6986_v57 = vadd.f32 %v6985_v52, %v6984_v42 }
 0x5bc   :  { %v6963_v53 = vmul.f32 -1.442695, %v6147_v11  ;;  %v6150_v54 = vadd.f32 %v6986_v57, %v6946_v50 }
 0x5be   :  { %7598 = vpow2.f32 %v6963_v53  ;;  %v6964_v27 = vmul.f32 -1.442695, %v6150_v54 }
 0x5c0   :  { %7600 = vpow2.f32 %v6964_v27 }
 0x5c8   :  { %v7599_v45 = vpop.eup %7598 }
 0x5c9   :  { %v6159_v28 = vadd.f32 1.0, %v7599_v45 }
 0x5ca   :  { %v7601_v44 = vpop.eup %7600 }
 0x5cb   :  { %7602 = vrcp.f32 %v6159_v28  ;;  %v6160_v55 = vadd.f32 1.0, %v7601_v44 }
 0x5cd   :  { %7604 = vrcp.f32 %v6160_v55 }
 0x5d5   :  { %v7603_v36 = vpop.eup %7602 }
 0x5d6   :  { %6165 = vst [vmem:[%s10227_s9] sm:$0xff] %v7603_v36 }
 0x5d7   :  { %v7605_v56 = vpop.eup %7604 }
 0x5d8   :  { %6166 = vst [vmem:[%s10227_s9 + $0x8] sm:$0xff] %v7605_v56 }

</bundles_post_ra>
